<compile_context>
chip_gen: v7x
topology: tpu7x:2x2x1
jax: 0.10.0
libtpu: 0.0.40
codegen_flags: <defaults>
</compile_context>

<pallas_src>
import numpy as np
import jax
import jax.numpy as jnp
from jax.experimental import pallas as pl
from jax.experimental.pallas import tpu as pltpu


# ---------------------------------------------------------------------------
# Flat "pixels-on-lanes" layout helpers (data-independent glue; numpy/JAX only)
# ---------------------------------------------------------------------------
def _taps():
    # tap order (dh major, dw minor) == (kh, kw) raster order of the 3x3 kernel
    return [(dh, dw) for dh in (-1, 0, 1) for dw in (-1, 0, 1)]


def _flat_dims(B, H, W):
    Hp, Wp = H + 2, W + 2                  # "same" conv halo of 1
    img = Hp * Wp
    ipad = -(-img // 128) * 128            # pad each image's flat block to a lane-tile multiple
    return Hp, Wp, img, ipad, B * ipad


def _roll_shifts(B, H, W):
    # pltpu.roll(feat, shift, axis=1)[:, p] == feat[:, (p - shift) % Np]   (jnp.roll convention)
    # we want rolled[:, p] == feat[:, p + dh*Wp + dw]  ->  shift = (-(dh*Wp + dw)) % Np
    Hp, Wp, img, ipad, Np = _flat_dims(B, H, W)
    return [(-(dh * Wp + dw)) % Np for dh, dw in _taps()]


def _embed_flat(v):
    """(..., B, H, W, C) interior values -> (..., C, Np) flat padded layout (halo/dummy = 0)."""
    *lead, B, H, W, C = v.shape
    Hp, Wp, img, ipad, Np = _flat_dims(B, H, W)
    v = jnp.pad(v, [(0, 0)] * len(lead) + [(0, 0), (1, 1), (1, 1), (0, 0)])
    v = jnp.moveaxis(v, -1, -4)                                    # (..., C, B, Hp, Wp)
    v = v.reshape(tuple(lead) + (C, B, Hp * Wp))
    v = jnp.pad(v, [(0, 0)] * (len(lead) + 2) + [(0, ipad - img)])
    return v.reshape(tuple(lead) + (C, B * ipad))


def _x_patches(x_tbhwc):
    """Precomputed im2col of the input sequence: (T, 9*Cin, Np), rows tap-major / channel-minor."""
    T, B, H, W, C = x_tbhwc.shape
    xpad = jnp.pad(x_tbhwc, ((0, 0), (0, 0), (1, 1), (1, 1), (0, 0)))
    pieces = []
    for dh, dw in _taps():
        win = xpad[:, :, dh + 1:dh + 1 + H, dw + 1:dw + 1 + W, :]  # tap value at every output pixel
        pieces.append(_embed_flat(win))                             # (T, C, Np)
    return jnp.concatenate(pieces, axis=1)                          # (T, 9C, Np)


def _conv_weight(w):
    """(3,3,Cin,Ch) HWIO -> (Ch, 9*Cin), columns tap-major / channel-minor (matches patch rows)."""
    KH, KW, Cin, Ch = w.shape
    return jnp.transpose(w, (3, 0, 1, 2)).reshape(Ch, KH * KW * Cin)


def _interior_mask(B, H, W):
    Hp, Wp, img, ipad, Np = _flat_dims(B, H, W)
    m = np.zeros((Hp, Wp), np.float32)
    m[1:H + 1, 1:W + 1] = 1.0
    full = np.zeros((B, ipad), np.float32)
    full[:, :img] = m.reshape(-1)[None, :]
    return jnp.asarray(full.reshape(1, Np))


def _pool_matrix(B, H, W):
    """(Np_in, Np_out): 2x2/2 average pool, flat layout -> flat layout; output halo/dummy stays 0."""
    Hp1, Wp1, img1, ip1, Np1 = _flat_dims(B, H, W)
    H2, W2 = H // 2, W // 2
    Hp2, Wp2, img2, ip2, Np2 = _flat_dims(B, H2, W2)
    M = np.zeros((Np1, Np2), np.float32)
    for b in range(B):
        for u in range(H2):
            for v in range(W2):
                p = b * ip2 + (u + 1) * Wp2 + (v + 1)
                for du in range(2):
                    for dv in range(2):
                        q = b * ip1 + (2 * u + 1 + du) * Wp1 + (2 * v + 1 + dv)
                        M[q, p] = 0.25
    return jnp.asarray(M)


def _head_pool_matrix(B, H, W):
    """(Np_in, B*S): 2x2/2 pool + spatial flatten; output column b*S + (u*(W//2) + v)."""
    Hp, Wp, img, ipad, Np = _flat_dims(B, H, W)
    H2, W2 = H // 2, W // 2
    S = H2 * W2
    M = np.zeros((Np, B * S), np.float32)
    for b in range(B):
        for u in range(H2):
            for v in range(W2):
                col = b * S + u * W2 + v
                for du in range(2):
                    for dv in range(2):
                        q = b * ipad + (2 * u + 1 + du) * Wp + (2 * v + 1 + dv)
                        M[q, col] = 0.25
    return jnp.asarray(M)


def _head_cross_mats(C, S, B):
    """Matmul-only "channels on sublanes -> (c,s) features on rows" crossing:
       Xt(C*S, B) = (E @ pooled(C, B*S) * SEL) @ ONEB,  Xt[c*S+s, b] = pooled[c, b*S+s]."""
    E = np.zeros((C * S, C), np.float32)
    SEL = np.zeros((C * S, B * S), np.float32)
    ONEB = np.zeros((B * S, B), np.float32)
    for c in range(C):
        for s in range(S):
            E[c * S + s, c] = 1.0
            for b in range(B):
                SEL[c * S + s, b * S + s] = 1.0
    for b in range(B):
        for s in range(S):
            ONEB[b * S + s, b] = 1.0
    return jnp.asarray(E), jnp.asarray(SEL), jnp.asarray(ONEB)


# ---------------------------------------------------------------------------
# Fused forward: 3 ConvRNN layers + pools + MLP head in one pallas_call
# ---------------------------------------------------------------------------
@jax.jit
def conv_rnn_forward(x_tbchw, params):
    T, B, C0, H, W = x_tbchw.shape
    C1 = params["wx1"].shape[-1]
    C2 = params["wx2"].shape[-1]
    C3 = params["wx3"].shape[-1]
    n_cls = params["fcw2"].shape[-1]

    H2, W2 = H // 2, W // 2
    _, _, _, _, Np1 = _flat_dims(B, H, W)      # full-res flat pixel count (lane-dense, 128-multiple)
    _, _, _, _, Np2 = _flat_dims(B, H2, W2)    # pooled-res flat pixel count
    S = (H2 // 2) * (W2 // 2)                  # spatial cells after pool2 (4*4 = 16)

    shifts1 = _roll_shifts(B, H, W)
    shifts2 = _roll_shifts(B, H2, W2)

    # ---- glue: precomputed input im2col, constants, reshaped weights ----
    x_tbhwc = jnp.transpose(x_tbchw, (0, 1, 3, 4, 2)).astype(jnp.float32)
    xp = _x_patches(x_tbhwc)                                   # (T, 9*C0, Np1)

    w1x, w1h = _conv_weight(params["wx1"]), _conv_weight(params["wh1"])
    w2x, w2h = _conv_weight(params["wx2"]), _conv_weight(params["wh2"])
    w3x, w3h = _conv_weight(params["wx3"]), _conv_weight(params["wh3"])
    b1 = params["b1"].reshape(C1, 1)
    b2 = params["b2"].reshape(C2, 1)
    b3 = params["b3"].reshape(C3, 1)

    m1 = _interior_mask(B, H, W)                               # (1, Np1)
    m2 = _interior_mask(B, H2, W2)                             # (1, Np2)
    pool1_m = _pool_matrix(B, H, W)                            # (Np1, Np2)
    hpool_m = _head_pool_matrix(B, H2, W2)                     # (Np2, B*S)
    e_m, sel_m, oneb_m = _head_cross_mats(C3, S, B)

    fc1w = params["fcw1"].T                                    # (fc1_out, C3*S)  NCHW flatten order
    fc1b = params["fcb1"].reshape(-1, 1)
    fc2w = params["fcw2"].T                                    # (n_cls, fc1_out)
    fc2b = params["fcb2"].reshape(-1, 1)

    def kernel(xp_ref,
               w1x_ref, w1h_ref, b1_ref,
               w2x_ref, w2h_ref, b2_ref,
               w3x_ref, w3h_ref, b3_ref,
               m1_ref, m2_ref, pool_ref,
               hp_ref, e_ref, sel_ref, oneb_ref,
               fc1w_ref, fc1b_ref, fc2w_ref, fc2b_ref,
               o_ref,
               p1_ref, p2_ref, p3_ref, q3_ref):
        t = pl.program_id(0)
        f32 = jnp.float32

        @pl.when(t == 0)
        def _init():                              # init_hidden: zeros -> zero im2col patches
            p1_ref[...] = jnp.zeros_like(p1_ref)
            p2_ref[...] = jnp.zeros_like(p2_ref)
            p3_ref[...] = jnp.zeros_like(p3_ref)

        def build_patches(feat, dst_ref, shifts, C):
            # im2col: 9 lane-rolls of the (C, Np) feature stacked on sublanes (tap-major rows).
            for k, sh in enumerate(shifts):
                rolled = feat if sh == 0 else pltpu.roll(feat, sh, axis=1)
                dst_ref[k * C:(k + 1) * C, :] = rolled

        # ----- layer 1: h1 = tanh(Wx1*x_t + Wh1*h1_{t-1} + b1), halo zeroed by mask -----
        acc = jnp.dot(w1x_ref[...], xp_ref[...], preferred_element_type=f32)
        acc = acc + jnp.dot(w1h_ref[...], p1_ref[...], preferred_element_type=f32)
        h1 = jnp.tanh(acc + b1_ref[...]) * m1_ref[...]
        build_patches(h1, p1_ref, shifts1, C1)    # layer-2 input now, layer-1 state next step

        # ----- layer 2 -----
        acc = jnp.dot(w2x_ref[...], p1_ref[...], preferred_element_type=f32)
        acc = acc + jnp.dot(w2h_ref[...], p2_ref[...], preferred_element_type=f32)
        h2 = jnp.tanh(acc + b2_ref[...]) * m1_ref[...]
        build_patches(h2, p2_ref, shifts1, C2)

        # ----- pool1 (constant matmul) + layer 3 -----
        h2p = jnp.dot(h2, pool_ref[...], preferred_element_type=f32)          # (C2, Np2)
        build_patches(h2p, q3_ref, shifts2, C2)
        acc = jnp.dot(w3x_ref[...], q3_ref[...], preferred_element_type=f32)
        acc = acc + jnp.dot(w3h_ref[...], p3_ref[...], preferred_element_type=f32)
        h3 = jnp.tanh(acc + b3_ref[...]) * m2_ref[...]
        build_patches(h3, p3_ref, shifts2, C3)

        # ----- head (pool2 + NCHW flatten + fc1 + fc2), last time step only -----
        @pl.when(t == T - 1)
        def _head():
            pooled = jnp.dot(h3, hp_ref[...], preferred_element_type=f32)     # (C3, B*S)
            xe = jnp.dot(e_ref[...], pooled, preferred_element_type=f32)      # (C3*S, B*S)
            xt = jnp.dot(xe * sel_ref[...], oneb_ref[...],
                         preferred_element_type=f32)                          # (C3*S, B)
            y1 = jnp.dot(fc1w_ref[...], xt, preferred_element_type=f32) + fc1b_ref[...]
            o_ref[...] = (jnp.dot(fc2w_ref[...], y1, preferred_element_type=f32)
                          + fc2b_ref[...])                                    # (n_cls, B)

    consts = (w1x, w1h, b1, w2x, w2h, b2, w3x, w3h, b3,
              m1, m2, pool1_m, hpool_m, e_m, sel_m, oneb_m,
              fc1w, fc1b, fc2w, fc2b)

    in_specs = [pl.BlockSpec((pl.Squeezed(), 9 * C0, Np1), lambda t: (t, 0, 0))]
    in_specs += [pl.BlockSpec(c.shape, lambda t: (0, 0)) for c in consts]     # resident constants

    out_t = pl.pallas_call(
        kernel,
        out_shape=jax.ShapeDtypeStruct((n_cls, B), jnp.float32),
        grid_spec=pltpu.PrefetchScalarGridSpec(
            num_scalar_prefetch=0,
            grid=(T,),
            in_specs=in_specs,
            out_specs=pl.BlockSpec((n_cls, B), lambda t: (0, 0)),
            scratch_shapes=[
                pltpu.VMEM((9 * C1, Np1), jnp.float32),   # p1: im2col of h1
                pltpu.VMEM((9 * C2, Np1), jnp.float32),   # p2: im2col of h2
                pltpu.VMEM((9 * C3, Np2), jnp.float32),   # p3: im2col of h3
                pltpu.VMEM((9 * C2, Np2), jnp.float32),   # q3: im2col of pool1(h2_t)
            ],
        ),
        # Time recurrence -> "arbitrary". Total VMEM ~3 MB, far under every generation's scoped
        # default, so vmem_limit_bytes is left alone (set it if H/W/B are scaled up).
        compiler_params=pltpu.CompilerParams(dimension_semantics=("arbitrary",)),
    )(xp, *consts)

    return out_t.T                                            # (B, n_cls)


# ---------------------------------------------------------------------------
# Pure-JAX reference (correctness check of the fused Pallas kernel)
# ---------------------------------------------------------------------------
def avg_pool(x, k):
    *lead, H_, W_, C_ = x.shape
    x = x.reshape(*lead, H_ // k, k, W_ // k, k, C_)
    return x.mean(axis=(-4, -2))


def ref_convrnn_layer(x_seq, wx, wh, b):
    w = jnp.concatenate([wx, wh], axis=2)
    B = x_seq.shape[1]
    H, W = x_seq.shape[2], x_seq.shape[3]
    Ch = wx.shape[-1]

    def step(h, x):
        comb = jnp.concatenate([x, h], axis=-1)
        y = jax.lax.conv_general_dilated(
            comb, w, (1, 1), "SAME",
            dimension_numbers=("NHWC", "HWIO", "NHWC"),
            precision=jax.lax.Precision.HIGHEST)
        h_new = jnp.tanh(y + b.reshape(1, 1, 1, -1))
        return h_new, h_new

    h0 = jnp.zeros((B, H, W, Ch), jnp.float32)
    _, hs = jax.lax.scan(step, h0, x_seq)
    return hs


def ref_forward(x_tbchw, p):
    x = jnp.transpose(x_tbchw, (0, 1, 3, 4, 2))
    h1 = ref_convrnn_layer(x, p["wx1"], p["wh1"], p["b1"])
    h2 = ref_convrnn_layer(h1, p["wx2"], p["wh2"], p["b2"])
    h3 = ref_convrnn_layer(avg_pool(h2, 2), p["wx3"], p["wh3"], p["b3"])
    last = avg_pool(h3[-1], 2)
    flat = jnp.transpose(last, (0, 3, 1, 2)).reshape(last.shape[0], -1)
    h = jnp.dot(flat, p["fcw1"], precision=jax.lax.Precision.HIGHEST) + p["fcb1"]
    return jnp.dot(h, p["fcw2"], precision=jax.lax.Precision.HIGHEST) + p["fcb2"]


# ---------------------------------------------------------------------------
if __name__ == "__main__":
    # Module hyper-parameters (consistent with the constructor):
    #   input_size=(16,16), conv_dim=[(2,8),(8,16),(16,16)], pool_size=[(2,2),(2,2)],
    #   kernel_size=[(3,3)]*3, fc_size=[32,11], batch_first=False, bias=True
    H = W = 16
    conv_dim = [(2, 8), (8, 16), (16, 16)]
    fc_size = [32, 11]
    T, B = 8, 2

    key = jax.random.PRNGKey(0)
    ks = jax.random.split(key, 16)

    def uinit(k, shape, fan_in):
        bound = float(fan_in) ** -0.5
        return jax.random.uniform(k, shape, jnp.float32, minval=-bound, maxval=bound)

    params = {}
    i = 0
    for li, (cin, ch) in enumerate(conv_dim, start=1):
        fan = (cin + ch) * 9
        params[f"wx{li}"] = uinit(ks[i], (3, 3, cin, ch), fan); i += 1
        params[f"wh{li}"] = uinit(ks[i], (3, 3, ch, ch), fan); i += 1
        params[f"b{li}"] = uinit(ks[i], (1, ch), fan); i += 1

    final_hw = (H // 2) // 2
    fc_in = final_hw * final_hw * conv_dim[2][1]          # 4*4*16 = 256
    params["fcw1"] = uinit(ks[i], (fc_in, fc_size[0]), fc_in); i += 1
    params["fcb1"] = uinit(ks[i], (1, fc_size[0]), fc_in); i += 1
    params["fcw2"] = uinit(ks[i], (fc_size[0], fc_size[1]), fc_size[0]); i += 1
    params["fcb2"] = uinit(ks[i], (1, fc_size[1]), fc_size[0]); i += 1

    # Input: (seq, batch, C, H, W) since batch_first=False.
    x = jax.random.normal(ks[i], (T, B, conv_dim[0][0], H, W), jnp.float32)

    out = jax.block_until_ready(conv_rnn_forward(x, params))
    ref = jax.block_until_ready(ref_forward(x, params))

    assert out.shape == (B, fc_size[1]), out.shape
    assert bool(jnp.all(jnp.isfinite(out)))
    assert bool(jnp.allclose(out, ref, atol=2e-3, rtol=2e-3)), (out, ref)

    print("KERNEL_OK")
</pallas_src>

<mosaic_0001>
module attributes {stable_mosaic.version = 11 : i64} {
  func.func @kernel(%arg0: i32, %arg1: memref<1x18x768xf32, #tpu.memory_space<vmem>>, %arg2: memref<8x18xf32, #tpu.memory_space<vmem>>, %arg3: memref<8x72xf32, #tpu.memory_space<vmem>>, %arg4: memref<8x1xf32, #tpu.memory_space<vmem>>, %arg5: memref<16x72xf32, #tpu.memory_space<vmem>>, %arg6: memref<16x144xf32, #tpu.memory_space<vmem>>, %arg7: memref<16x1xf32, #tpu.memory_space<vmem>>, %arg8: memref<16x144xf32, #tpu.memory_space<vmem>>, %arg9: memref<16x144xf32, #tpu.memory_space<vmem>>, %arg10: memref<16x1xf32, #tpu.memory_space<vmem>>, %arg11: memref<1x768xf32, #tpu.memory_space<vmem>>, %arg12: memref<1x256xf32, #tpu.memory_space<vmem>>, %arg13: memref<768x256xf32, #tpu.memory_space<vmem>>, %arg14: memref<256x32xf32, #tpu.memory_space<vmem>>, %arg15: memref<256x16xf32, #tpu.memory_space<vmem>>, %arg16: memref<256x32xf32, #tpu.memory_space<vmem>>, %arg17: memref<32x2xf32, #tpu.memory_space<vmem>>, %arg18: memref<32x256xf32, #tpu.memory_space<vmem>>, %arg19: memref<32x1xf32, #tpu.memory_space<vmem>>, %arg20: memref<11x32xf32, #tpu.memory_space<vmem>>, %arg21: memref<11x1xf32, #tpu.memory_space<vmem>>, %arg22: memref<11x2xf32, #tpu.memory_space<vmem>>, %arg23: memref<72x768xf32, #tpu.memory_space<vmem>>, %arg24: memref<144x768xf32, #tpu.memory_space<vmem>>, %arg25: memref<144x256xf32, #tpu.memory_space<vmem>>, %arg26: memref<144x256xf32, #tpu.memory_space<vmem>>) attributes {dimension_semantics = [#tpu.dimension_semantics<arbitrary>], iteration_bounds = array<i64: 8>, scalar_prefetch = 0 : i64, scratch_operands = 4 : i64, tpu.core_type = #tpu.core_type<tc>, window_params = [{transform_indices = @transform_0, window_bounds = array<i64: 1, 18, 768>}, {pipeline_mode = #tpu.pipeline_mode<synchronous>, transform_indices = @transform_1, window_bounds = array<i64: 8, 18>}, {pipeline_mode = #tpu.pipeline_mode<synchronous>, transform_indices = @transform_2, window_bounds = array<i64: 8, 72>}, {pipeline_mode = #tpu.pipeline_mode<synchronous>, transform_indices = @transform_3, window_bounds = array<i64: 8, 1>}, {pipeline_mode = #tpu.pipeline_mode<synchronous>, transform_indices = @transform_4, window_bounds = array<i64: 16, 72>}, {pipeline_mode = #tpu.pipeline_mode<synchronous>, transform_indices = @transform_5, window_bounds = array<i64: 16, 144>}, {pipeline_mode = #tpu.pipeline_mode<synchronous>, transform_indices = @transform_6, window_bounds = array<i64: 16, 1>}, {pipeline_mode = #tpu.pipeline_mode<synchronous>, transform_indices = @transform_7, window_bounds = array<i64: 16, 144>}, {pipeline_mode = #tpu.pipeline_mode<synchronous>, transform_indices = @transform_8, window_bounds = array<i64: 16, 144>}, {pipeline_mode = #tpu.pipeline_mode<synchronous>, transform_indices = @transform_9, window_bounds = array<i64: 16, 1>}, {pipeline_mode = #tpu.pipeline_mode<synchronous>, transform_indices = @transform_10, window_bounds = array<i64: 1, 768>}, {pipeline_mode = #tpu.pipeline_mode<synchronous>, transform_indices = @transform_11, window_bounds = array<i64: 1, 256>}, {pipeline_mode = #tpu.pipeline_mode<synchronous>, transform_indices = @transform_12, window_bounds = array<i64: 768, 256>}, {pipeline_mode = #tpu.pipeline_mode<synchronous>, transform_indices = @transform_13, window_bounds = array<i64: 256, 32>}, {pipeline_mode = #tpu.pipeline_mode<synchronous>, transform_indices = @transform_14, window_bounds = array<i64: 256, 16>}, {pipeline_mode = #tpu.pipeline_mode<synchronous>, transform_indices = @transform_15, window_bounds = array<i64: 256, 32>}, {pipeline_mode = #tpu.pipeline_mode<synchronous>, transform_indices = @transform_16, window_bounds = array<i64: 32, 2>}, {pipeline_mode = #tpu.pipeline_mode<synchronous>, transform_indices = @transform_17, window_bounds = array<i64: 32, 256>}, {pipeline_mode = #tpu.pipeline_mode<synchronous>, transform_indices = @transform_18, window_bounds = array<i64: 32, 1>}, {pipeline_mode = #tpu.pipeline_mode<synchronous>, transform_indices = @transform_19, window_bounds = array<i64: 11, 32>}, {pipeline_mode = #tpu.pipeline_mode<synchronous>, transform_indices = @transform_20, window_bounds = array<i64: 11, 1>}, {pipeline_mode = #tpu.pipeline_mode<synchronous>, transform_indices = @transform_21, window_bounds = array<i64: 11, 2>}]} {
    %c0_i32 = arith.constant 0 : i32
    %0 = arith.cmpi eq, %arg0, %c0_i32 : i32
    %1 = arith.extui %0 : i1 to i32
    %c0_i32_0 = arith.constant 0 : i32
    %2 = arith.cmpi ne, %1, %c0_i32_0 : i32
    scf.if %2 {
      %cst_123 = arith.constant 0.000000e+00 : f32
      %119 = vector.broadcast %cst_123 : f32 to vector<72x768xf32>
      %c0_124 = arith.constant 0 : index
      %c0_125 = arith.constant 0 : index
      %120 = vector.load %arg23[%c0_124, %c0_125] : memref<72x768xf32, #tpu.memory_space<vmem>>, vector<72x768xf32>
      tpu.vector_store %arg23[%c0_124, %c0_125], %119 {strides = array<i32>} : memref<72x768xf32, #tpu.memory_space<vmem>>, vector<72x768xf32>,
      %cst_126 = arith.constant 0.000000e+00 : f32
      %121 = vector.broadcast %cst_126 : f32 to vector<144x768xf32>
      %c0_127 = arith.constant 0 : index
      %c0_128 = arith.constant 0 : index
      %122 = vector.load %arg24[%c0_127, %c0_128] : memref<144x768xf32, #tpu.memory_space<vmem>>, vector<144x768xf32>
      tpu.vector_store %arg24[%c0_127, %c0_128], %121 {strides = array<i32>} : memref<144x768xf32, #tpu.memory_space<vmem>>, vector<144x768xf32>,
      %cst_129 = arith.constant 0.000000e+00 : f32
      %123 = vector.broadcast %cst_129 : f32 to vector<144x256xf32>
      %c0_130 = arith.constant 0 : index
      %c0_131 = arith.constant 0 : index
      %124 = vector.load %arg25[%c0_130, %c0_131] : memref<144x256xf32, #tpu.memory_space<vmem>>, vector<144x256xf32>
      tpu.vector_store %arg25[%c0_130, %c0_131], %123 {strides = array<i32>} : memref<144x256xf32, #tpu.memory_space<vmem>>, vector<144x256xf32>,
    } else {
    }
    %c0 = arith.constant 0 : index
    %c0_1 = arith.constant 0 : index
    %3 = vector.load %arg2[%c0, %c0_1] : memref<8x18xf32, #tpu.memory_space<vmem>>, vector<8x18xf32>
    %c0_2 = arith.constant 0 : index
    %c0_3 = arith.constant 0 : index
    %c0_4 = arith.constant 0 : index
    %4 = vector.load %arg1[%c0_2, %c0_3, %c0_4] : memref<1x18x768xf32, #tpu.memory_space<vmem>>, vector<1x18x768xf32>
    %5 = vector.shape_cast %4 : vector<1x18x768xf32> to vector<18x768xf32>
    %cst = arith.constant dense<0.000000e+00> : vector<8x768xf32>
    %6 = tpu.matmul %3, %5, %cst {dimension_numbers = #tpu.dot_dimension_numbers<[1], [0], [0], [1], [0, 0, 1, 1], [], []>} : vector<8x18xf32>, vector<18x768xf32>, vector<8x768xf32> -> vector<8x768xf32>
    %c0_5 = arith.constant 0 : index
    %c0_6 = arith.constant 0 : index
    %7 = vector.load %arg3[%c0_5, %c0_6] : memref<8x72xf32, #tpu.memory_space<vmem>>, vector<8x72xf32>
    %c0_7 = arith.constant 0 : index
    %c0_8 = arith.constant 0 : index
    %8 = vector.load %arg23[%c0_7, %c0_8] : memref<72x768xf32, #tpu.memory_space<vmem>>, vector<72x768xf32>
    %cst_9 = arith.constant dense<0.000000e+00> : vector<8x768xf32>
    %9 = tpu.matmul %7, %8, %cst_9 {dimension_numbers = #tpu.dot_dimension_numbers<[1], [0], [0], [1], [0, 0, 1, 1], [], []>} : vector<8x72xf32>, vector<72x768xf32>, vector<8x768xf32> -> vector<8x768xf32>
    %10 = arith.addf %6, %9 : vector<8x768xf32>
    %c0_10 = arith.constant 0 : index
    %c0_11 = arith.constant 0 : index
    %11 = vector.load %arg4[%c0_10, %c0_11] : memref<8x1xf32, #tpu.memory_space<vmem>>, vector<8x1xf32>
    %12 = vector.broadcast %11 : vector<8x1xf32> to vector<8x768xf32>
    %13 = arith.addf %10, %12 : vector<8x768xf32>
    %14 = math.tanh %13 : vector<8x768xf32>
    %c0_12 = arith.constant 0 : index
    %c0_13 = arith.constant 0 : index
    %15 = vector.load %arg11[%c0_12, %c0_13] : memref<1x768xf32, #tpu.memory_space<vmem>>, vector<1x768xf32>
    %16 = vector.broadcast %15 : vector<1x768xf32> to vector<8x768xf32>
    %17 = arith.mulf %14, %16 : vector<8x768xf32>
    %c19_i32 = arith.constant 19 : i32
    %18 = tpu.dynamic_rotate %17 by %c19_i32 dim 1 : vector<8x768xf32>, i32 -> vector<8x768xf32>
    %c0_14 = arith.constant 0 : index
    %c0_15 = arith.constant 0 : index
    %19 = vector.load %arg23[%c0_14, %c0_15] : memref<72x768xf32, #tpu.memory_space<vmem>>, vector<8x768xf32>
    tpu.vector_store %arg23[%c0_14, %c0_15], %18 {strides = array<i32>} : memref<72x768xf32, #tpu.memory_space<vmem>>, vector<8x768xf32>,
    %c18_i32 = arith.constant 18 : i32
    %20 = tpu.dynamic_rotate %17 by %c18_i32 dim 1 : vector<8x768xf32>, i32 -> vector<8x768xf32>
    %c8 = arith.constant 8 : index
    %c0_16 = arith.constant 0 : index
    %21 = vector.load %arg23[%c8, %c0_16] : memref<72x768xf32, #tpu.memory_space<vmem>>, vector<8x768xf32>
    tpu.vector_store %arg23[%c8, %c0_16], %20 {strides = array<i32>} : memref<72x768xf32, #tpu.memory_space<vmem>>, vector<8x768xf32>,
    %c17_i32 = arith.constant 17 : i32
    %22 = tpu.dynamic_rotate %17 by %c17_i32 dim 1 : vector<8x768xf32>, i32 -> vector<8x768xf32>
    %c16 = arith.constant 16 : index
    %c0_17 = arith.constant 0 : index
    %23 = vector.load %arg23[%c16, %c0_17] : memref<72x768xf32, #tpu.memory_space<vmem>>, vector<8x768xf32>
    tpu.vector_store %arg23[%c16, %c0_17], %22 {strides = array<i32>} : memref<72x768xf32, #tpu.memory_space<vmem>>, vector<8x768xf32>,
    %c1_i32 = arith.constant 1 : i32
    %24 = tpu.dynamic_rotate %17 by %c1_i32 dim 1 : vector<8x768xf32>, i32 -> vector<8x768xf32>
    %c24 = arith.constant 24 : index
    %c0_18 = arith.constant 0 : index
    %25 = vector.load %arg23[%c24, %c0_18] : memref<72x768xf32, #tpu.memory_space<vmem>>, vector<8x768xf32>
    tpu.vector_store %arg23[%c24, %c0_18], %24 {strides = array<i32>} : memref<72x768xf32, #tpu.memory_space<vmem>>, vector<8x768xf32>,
    %c32 = arith.constant 32 : index
    %c0_19 = arith.constant 0 : index
    %26 = vector.load %arg23[%c32, %c0_19] : memref<72x768xf32, #tpu.memory_space<vmem>>, vector<8x768xf32>
    tpu.vector_store %arg23[%c32, %c0_19], %17 {strides = array<i32>} : memref<72x768xf32, #tpu.memory_space<vmem>>, vector<8x768xf32>,
    %c767_i32 = arith.constant 767 : i32
    %27 = tpu.dynamic_rotate %17 by %c767_i32 dim 1 : vector<8x768xf32>, i32 -> vector<8x768xf32>
    %c40 = arith.constant 40 : index
    %c0_20 = arith.constant 0 : index
    %28 = vector.load %arg23[%c40, %c0_20] : memref<72x768xf32, #tpu.memory_space<vmem>>, vector<8x768xf32>
    tpu.vector_store %arg23[%c40, %c0_20], %27 {strides = array<i32>} : memref<72x768xf32, #tpu.memory_space<vmem>>, vector<8x768xf32>,
    %c751_i32 = arith.constant 751 : i32
    %29 = tpu.dynamic_rotate %17 by %c751_i32 dim 1 : vector<8x768xf32>, i32 -> vector<8x768xf32>
    %c48 = arith.constant 48 : index
    %c0_21 = arith.constant 0 : index
    %30 = vector.load %arg23[%c48, %c0_21] : memref<72x768xf32, #tpu.memory_space<vmem>>, vector<8x768xf32>
    tpu.vector_store %arg23[%c48, %c0_21], %29 {strides = array<i32>} : memref<72x768xf32, #tpu.memory_space<vmem>>, vector<8x768xf32>,
    %c750_i32 = arith.constant 750 : i32
    %31 = tpu.dynamic_rotate %17 by %c750_i32 dim 1 : vector<8x768xf32>, i32 -> vector<8x768xf32>
    %c56 = arith.constant 56 : index
    %c0_22 = arith.constant 0 : index
    %32 = vector.load %arg23[%c56, %c0_22] : memref<72x768xf32, #tpu.memory_space<vmem>>, vector<8x768xf32>
    tpu.vector_store %arg23[%c56, %c0_22], %31 {strides = array<i32>} : memref<72x768xf32, #tpu.memory_space<vmem>>, vector<8x768xf32>,
    %c749_i32 = arith.constant 749 : i32
    %33 = tpu.dynamic_rotate %17 by %c749_i32 dim 1 : vector<8x768xf32>, i32 -> vector<8x768xf32>
    %c64 = arith.constant 64 : index
    %c0_23 = arith.constant 0 : index
    %34 = vector.load %arg23[%c64, %c0_23] : memref<72x768xf32, #tpu.memory_space<vmem>>, vector<8x768xf32>
    tpu.vector_store %arg23[%c64, %c0_23], %33 {strides = array<i32>} : memref<72x768xf32, #tpu.memory_space<vmem>>, vector<8x768xf32>,
    %c0_24 = arith.constant 0 : index
    %c0_25 = arith.constant 0 : index
    %35 = vector.load %arg5[%c0_24, %c0_25] : memref<16x72xf32, #tpu.memory_space<vmem>>, vector<16x72xf32>
    %c0_26 = arith.constant 0 : index
    %c0_27 = arith.constant 0 : index
    %36 = vector.load %arg23[%c0_26, %c0_27] : memref<72x768xf32, #tpu.memory_space<vmem>>, vector<72x768xf32>
    %cst_28 = arith.constant dense<0.000000e+00> : vector<16x768xf32>
    %37 = tpu.matmul %35, %36, %cst_28 {dimension_numbers = #tpu.dot_dimension_numbers<[1], [0], [0], [1], [0, 0, 1, 1], [], []>} : vector<16x72xf32>, vector<72x768xf32>, vector<16x768xf32> -> vector<16x768xf32>
    %c0_29 = arith.constant 0 : index
    %c0_30 = arith.constant 0 : index
    %38 = vector.load %arg6[%c0_29, %c0_30] : memref<16x144xf32, #tpu.memory_space<vmem>>, vector<16x144xf32>
    %c0_31 = arith.constant 0 : index
    %c0_32 = arith.constant 0 : index
    %39 = vector.load %arg24[%c0_31, %c0_32] : memref<144x768xf32, #tpu.memory_space<vmem>>, vector<144x768xf32>
    %cst_33 = arith.constant dense<0.000000e+00> : vector<16x768xf32>
    %40 = tpu.matmul %38, %39, %cst_33 {dimension_numbers = #tpu.dot_dimension_numbers<[1], [0], [0], [1], [0, 0, 1, 1], [], []>} : vector<16x144xf32>, vector<144x768xf32>, vector<16x768xf32> -> vector<16x768xf32>
    %41 = arith.addf %37, %40 : vector<16x768xf32>
    %c0_34 = arith.constant 0 : index
    %c0_35 = arith.constant 0 : index
    %42 = vector.load %arg7[%c0_34, %c0_35] : memref<16x1xf32, #tpu.memory_space<vmem>>, vector<16x1xf32>
    %43 = vector.broadcast %42 : vector<16x1xf32> to vector<16x768xf32>
    %44 = arith.addf %41, %43 : vector<16x768xf32>
    %45 = math.tanh %44 : vector<16x768xf32>
    %c0_36 = arith.constant 0 : index
    %c0_37 = arith.constant 0 : index
    %46 = vector.load %arg11[%c0_36, %c0_37] : memref<1x768xf32, #tpu.memory_space<vmem>>, vector<1x768xf32>
    %47 = vector.broadcast %46 : vector<1x768xf32> to vector<16x768xf32>
    %48 = arith.mulf %45, %47 : vector<16x768xf32>
    %c19_i32_38 = arith.constant 19 : i32
    %49 = tpu.dynamic_rotate %48 by %c19_i32_38 dim 1 : vector<16x768xf32>, i32 -> vector<16x768xf32>
    %c0_39 = arith.constant 0 : index
    %c0_40 = arith.constant 0 : index
    %50 = vector.load %arg24[%c0_39, %c0_40] : memref<144x768xf32, #tpu.memory_space<vmem>>, vector<16x768xf32>
    tpu.vector_store %arg24[%c0_39, %c0_40], %49 {strides = array<i32>} : memref<144x768xf32, #tpu.memory_space<vmem>>, vector<16x768xf32>,
    %c18_i32_41 = arith.constant 18 : i32
    %51 = tpu.dynamic_rotate %48 by %c18_i32_41 dim 1 : vector<16x768xf32>, i32 -> vector<16x768xf32>
    %c16_42 = arith.constant 16 : index
    %c0_43 = arith.constant 0 : index
    %52 = vector.load %arg24[%c16_42, %c0_43] : memref<144x768xf32, #tpu.memory_space<vmem>>, vector<16x768xf32>
    tpu.vector_store %arg24[%c16_42, %c0_43], %51 {strides = array<i32>} : memref<144x768xf32, #tpu.memory_space<vmem>>, vector<16x768xf32>,
    %c17_i32_44 = arith.constant 17 : i32
    %53 = tpu.dynamic_rotate %48 by %c17_i32_44 dim 1 : vector<16x768xf32>, i32 -> vector<16x768xf32>
    %c32_45 = arith.constant 32 : index
    %c0_46 = arith.constant 0 : index
    %54 = vector.load %arg24[%c32_45, %c0_46] : memref<144x768xf32, #tpu.memory_space<vmem>>, vector<16x768xf32>
    tpu.vector_store %arg24[%c32_45, %c0_46], %53 {strides = array<i32>} : memref<144x768xf32, #tpu.memory_space<vmem>>, vector<16x768xf32>,
    %c1_i32_47 = arith.constant 1 : i32
    %55 = tpu.dynamic_rotate %48 by %c1_i32_47 dim 1 : vector<16x768xf32>, i32 -> vector<16x768xf32>
    %c48_48 = arith.constant 48 : index
    %c0_49 = arith.constant 0 : index
    %56 = vector.load %arg24[%c48_48, %c0_49] : memref<144x768xf32, #tpu.memory_space<vmem>>, vector<16x768xf32>
    tpu.vector_store %arg24[%c48_48, %c0_49], %55 {strides = array<i32>} : memref<144x768xf32, #tpu.memory_space<vmem>>, vector<16x768xf32>,
    %c64_50 = arith.constant 64 : index
    %c0_51 = arith.constant 0 : index
    %57 = vector.load %arg24[%c64_50, %c0_51] : memref<144x768xf32, #tpu.memory_space<vmem>>, vector<16x768xf32>
    tpu.vector_store %arg24[%c64_50, %c0_51], %48 {strides = array<i32>} : memref<144x768xf32, #tpu.memory_space<vmem>>, vector<16x768xf32>,
    %c767_i32_52 = arith.constant 767 : i32
    %58 = tpu.dynamic_rotate %48 by %c767_i32_52 dim 1 : vector<16x768xf32>, i32 -> vector<16x768xf32>
    %c80 = arith.constant 80 : index
    %c0_53 = arith.constant 0 : index
    %59 = vector.load %arg24[%c80, %c0_53] : memref<144x768xf32, #tpu.memory_space<vmem>>, vector<16x768xf32>
    tpu.vector_store %arg24[%c80, %c0_53], %58 {strides = array<i32>} : memref<144x768xf32, #tpu.memory_space<vmem>>, vector<16x768xf32>,
    %c751_i32_54 = arith.constant 751 : i32
    %60 = tpu.dynamic_rotate %48 by %c751_i32_54 dim 1 : vector<16x768xf32>, i32 -> vector<16x768xf32>
    %c96 = arith.constant 96 : index
    %c0_55 = arith.constant 0 : index
    %61 = vector.load %arg24[%c96, %c0_55] : memref<144x768xf32, #tpu.memory_space<vmem>>, vector<16x768xf32>
    tpu.vector_store %arg24[%c96, %c0_55], %60 {strides = array<i32>} : memref<144x768xf32, #tpu.memory_space<vmem>>, vector<16x768xf32>,
    %c750_i32_56 = arith.constant 750 : i32
    %62 = tpu.dynamic_rotate %48 by %c750_i32_56 dim 1 : vector<16x768xf32>, i32 -> vector<16x768xf32>
    %c112 = arith.constant 112 : index
    %c0_57 = arith.constant 0 : index
    %63 = vector.load %arg24[%c112, %c0_57] : memref<144x768xf32, #tpu.memory_space<vmem>>, vector<16x768xf32>
    tpu.vector_store %arg24[%c112, %c0_57], %62 {strides = array<i32>} : memref<144x768xf32, #tpu.memory_space<vmem>>, vector<16x768xf32>,
    %c749_i32_58 = arith.constant 749 : i32
    %64 = tpu.dynamic_rotate %48 by %c749_i32_58 dim 1 : vector<16x768xf32>, i32 -> vector<16x768xf32>
    %c128 = arith.constant 128 : index
    %c0_59 = arith.constant 0 : index
    %65 = vector.load %arg24[%c128, %c0_59] : memref<144x768xf32, #tpu.memory_space<vmem>>, vector<16x768xf32>
    tpu.vector_store %arg24[%c128, %c0_59], %64 {strides = array<i32>} : memref<144x768xf32, #tpu.memory_space<vmem>>, vector<16x768xf32>,
    %c0_60 = arith.constant 0 : index
    %c0_61 = arith.constant 0 : index
    %66 = vector.load %arg13[%c0_60, %c0_61] : memref<768x256xf32, #tpu.memory_space<vmem>>, vector<768x256xf32>
    %cst_62 = arith.constant dense<0.000000e+00> : vector<16x256xf32>
    %67 = tpu.matmul %48, %66, %cst_62 {dimension_numbers = #tpu.dot_dimension_numbers<[1], [0], [0], [1], [0, 0, 1, 1], [], []>} : vector<16x768xf32>, vector<768x256xf32>, vector<16x256xf32> -> vector<16x256xf32>
    %c11_i32 = arith.constant 11 : i32
    %68 = tpu.dynamic_rotate %67 by %c11_i32 dim 1 : vector<16x256xf32>, i32 -> vector<16x256xf32>
    %c0_63 = arith.constant 0 : index
    %c0_64 = arith.constant 0 : index
    %69 = vector.load %arg26[%c0_63, %c0_64] : memref<144x256xf32, #tpu.memory_space<vmem>>, vector<16x256xf32>
    tpu.vector_store %arg26[%c0_63, %c0_64], %68 {strides = array<i32>} : memref<144x256xf32, #tpu.memory_space<vmem>>, vector<16x256xf32>,
    %c10_i32 = arith.constant 10 : i32
    %70 = tpu.dynamic_rotate %67 by %c10_i32 dim 1 : vector<16x256xf32>, i32 -> vector<16x256xf32>
    %c16_65 = arith.constant 16 : index
    %c0_66 = arith.constant 0 : index
    %71 = vector.load %arg26[%c16_65, %c0_66] : memref<144x256xf32, #tpu.memory_space<vmem>>, vector<16x256xf32>
    tpu.vector_store %arg26[%c16_65, %c0_66], %70 {strides = array<i32>} : memref<144x256xf32, #tpu.memory_space<vmem>>, vector<16x256xf32>,
    %c9_i32 = arith.constant 9 : i32
    %72 = tpu.dynamic_rotate %67 by %c9_i32 dim 1 : vector<16x256xf32>, i32 -> vector<16x256xf32>
    %c32_67 = arith.constant 32 : index
    %c0_68 = arith.constant 0 : index
    %73 = vector.load %arg26[%c32_67, %c0_68] : memref<144x256xf32, #tpu.memory_space<vmem>>, vector<16x256xf32>
    tpu.vector_store %arg26[%c32_67, %c0_68], %72 {strides = array<i32>} : memref<144x256xf32, #tpu.memory_space<vmem>>, vector<16x256xf32>,
    %c1_i32_69 = arith.constant 1 : i32
    %74 = tpu.dynamic_rotate %67 by %c1_i32_69 dim 1 : vector<16x256xf32>, i32 -> vector<16x256xf32>
    %c48_70 = arith.constant 48 : index
    %c0_71 = arith.constant 0 : index
    %75 = vector.load %arg26[%c48_70, %c0_71] : memref<144x256xf32, #tpu.memory_space<vmem>>, vector<16x256xf32>
    tpu.vector_store %arg26[%c48_70, %c0_71], %74 {strides = array<i32>} : memref<144x256xf32, #tpu.memory_space<vmem>>, vector<16x256xf32>,
    %c64_72 = arith.constant 64 : index
    %c0_73 = arith.constant 0 : index
    %76 = vector.load %arg26[%c64_72, %c0_73] : memref<144x256xf32, #tpu.memory_space<vmem>>, vector<16x256xf32>
    tpu.vector_store %arg26[%c64_72, %c0_73], %67 {strides = array<i32>} : memref<144x256xf32, #tpu.memory_space<vmem>>, vector<16x256xf32>,
    %c255_i32 = arith.constant 255 : i32
    %77 = tpu.dynamic_rotate %67 by %c255_i32 dim 1 : vector<16x256xf32>, i32 -> vector<16x256xf32>
    %c80_74 = arith.constant 80 : index
    %c0_75 = arith.constant 0 : index
    %78 = vector.load %arg26[%c80_74, %c0_75] : memref<144x256xf32, #tpu.memory_space<vmem>>, vector<16x256xf32>
    tpu.vector_store %arg26[%c80_74, %c0_75], %77 {strides = array<i32>} : memref<144x256xf32, #tpu.memory_space<vmem>>, vector<16x256xf32>,
    %c247_i32 = arith.constant 247 : i32
    %79 = tpu.dynamic_rotate %67 by %c247_i32 dim 1 : vector<16x256xf32>, i32 -> vector<16x256xf32>
    %c96_76 = arith.constant 96 : index
    %c0_77 = arith.constant 0 : index
    %80 = vector.load %arg26[%c96_76, %c0_77] : memref<144x256xf32, #tpu.memory_space<vmem>>, vector<16x256xf32>
    tpu.vector_store %arg26[%c96_76, %c0_77], %79 {strides = array<i32>} : memref<144x256xf32, #tpu.memory_space<vmem>>, vector<16x256xf32>,
    %c246_i32 = arith.constant 246 : i32
    %81 = tpu.dynamic_rotate %67 by %c246_i32 dim 1 : vector<16x256xf32>, i32 -> vector<16x256xf32>
    %c112_78 = arith.constant 112 : index
    %c0_79 = arith.constant 0 : index
    %82 = vector.load %arg26[%c112_78, %c0_79] : memref<144x256xf32, #tpu.memory_space<vmem>>, vector<16x256xf32>
    tpu.vector_store %arg26[%c112_78, %c0_79], %81 {strides = array<i32>} : memref<144x256xf32, #tpu.memory_space<vmem>>, vector<16x256xf32>,
    %c245_i32 = arith.constant 245 : i32
    %83 = tpu.dynamic_rotate %67 by %c245_i32 dim 1 : vector<16x256xf32>, i32 -> vector<16x256xf32>
    %c128_80 = arith.constant 128 : index
    %c0_81 = arith.constant 0 : index
    %84 = vector.load %arg26[%c128_80, %c0_81] : memref<144x256xf32, #tpu.memory_space<vmem>>, vector<16x256xf32>
    tpu.vector_store %arg26[%c128_80, %c0_81], %83 {strides = array<i32>} : memref<144x256xf32, #tpu.memory_space<vmem>>, vector<16x256xf32>,
    %c0_82 = arith.constant 0 : index
    %c0_83 = arith.constant 0 : index
    %85 = vector.load %arg8[%c0_82, %c0_83] : memref<16x144xf32, #tpu.memory_space<vmem>>, vector<16x144xf32>
    %c0_84 = arith.constant 0 : index
    %c0_85 = arith.constant 0 : index
    %86 = vector.load %arg26[%c0_84, %c0_85] : memref<144x256xf32, #tpu.memory_space<vmem>>, vector<144x256xf32>
    %cst_86 = arith.constant dense<0.000000e+00> : vector<16x256xf32>
    %87 = tpu.matmul %85, %86, %cst_86 {dimension_numbers = #tpu.dot_dimension_numbers<[1], [0], [0], [1], [0, 0, 1, 1], [], []>} : vector<16x144xf32>, vector<144x256xf32>, vector<16x256xf32> -> vector<16x256xf32>
    %c0_87 = arith.constant 0 : index
    %c0_88 = arith.constant 0 : index
    %88 = vector.load %arg9[%c0_87, %c0_88] : memref<16x144xf32, #tpu.memory_space<vmem>>, vector<16x144xf32>
    %c0_89 = arith.constant 0 : index
    %c0_90 = arith.constant 0 : index
    %89 = vector.load %arg25[%c0_89, %c0_90] : memref<144x256xf32, #tpu.memory_space<vmem>>, vector<144x256xf32>
    %cst_91 = arith.constant dense<0.000000e+00> : vector<16x256xf32>
    %90 = tpu.matmul %88, %89, %cst_91 {dimension_numbers = #tpu.dot_dimension_numbers<[1], [0], [0], [1], [0, 0, 1, 1], [], []>} : vector<16x144xf32>, vector<144x256xf32>, vector<16x256xf32> -> vector<16x256xf32>
    %91 = arith.addf %87, %90 : vector<16x256xf32>
    %c0_92 = arith.constant 0 : index
    %c0_93 = arith.constant 0 : index
    %92 = vector.load %arg10[%c0_92, %c0_93] : memref<16x1xf32, #tpu.memory_space<vmem>>, vector<16x1xf32>
    %93 = vector.broadcast %92 : vector<16x1xf32> to vector<16x256xf32>
    %94 = arith.addf %91, %93 : vector<16x256xf32>
    %95 = math.tanh %94 : vector<16x256xf32>
    %c0_94 = arith.constant 0 : index
    %c0_95 = arith.constant 0 : index
    %96 = vector.load %arg12[%c0_94, %c0_95] : memref<1x256xf32, #tpu.memory_space<vmem>>, vector<1x256xf32>
    %97 = vector.broadcast %96 : vector<1x256xf32> to vector<16x256xf32>
    %98 = arith.mulf %95, %97 : vector<16x256xf32>
    %c11_i32_96 = arith.constant 11 : i32
    %99 = tpu.dynamic_rotate %98 by %c11_i32_96 dim 1 : vector<16x256xf32>, i32 -> vector<16x256xf32>
    %c0_97 = arith.constant 0 : index
    %c0_98 = arith.constant 0 : index
    %100 = vector.load %arg25[%c0_97, %c0_98] : memref<144x256xf32, #tpu.memory_space<vmem>>, vector<16x256xf32>
    tpu.vector_store %arg25[%c0_97, %c0_98], %99 {strides = array<i32>} : memref<144x256xf32, #tpu.memory_space<vmem>>, vector<16x256xf32>,
    %c10_i32_99 = arith.constant 10 : i32
    %101 = tpu.dynamic_rotate %98 by %c10_i32_99 dim 1 : vector<16x256xf32>, i32 -> vector<16x256xf32>
    %c16_100 = arith.constant 16 : index
    %c0_101 = arith.constant 0 : index
    %102 = vector.load %arg25[%c16_100, %c0_101] : memref<144x256xf32, #tpu.memory_space<vmem>>, vector<16x256xf32>
    tpu.vector_store %arg25[%c16_100, %c0_101], %101 {strides = array<i32>} : memref<144x256xf32, #tpu.memory_space<vmem>>, vector<16x256xf32>,
    %c9_i32_102 = arith.constant 9 : i32
    %103 = tpu.dynamic_rotate %98 by %c9_i32_102 dim 1 : vector<16x256xf32>, i32 -> vector<16x256xf32>
    %c32_103 = arith.constant 32 : index
    %c0_104 = arith.constant 0 : index
    %104 = vector.load %arg25[%c32_103, %c0_104] : memref<144x256xf32, #tpu.memory_space<vmem>>, vector<16x256xf32>
    tpu.vector_store %arg25[%c32_103, %c0_104], %103 {strides = array<i32>} : memref<144x256xf32, #tpu.memory_space<vmem>>, vector<16x256xf32>,
    %c1_i32_105 = arith.constant 1 : i32
    %105 = tpu.dynamic_rotate %98 by %c1_i32_105 dim 1 : vector<16x256xf32>, i32 -> vector<16x256xf32>
    %c48_106 = arith.constant 48 : index
    %c0_107 = arith.constant 0 : index
    %106 = vector.load %arg25[%c48_106, %c0_107] : memref<144x256xf32, #tpu.memory_space<vmem>>, vector<16x256xf32>
    tpu.vector_store %arg25[%c48_106, %c0_107], %105 {strides = array<i32>} : memref<144x256xf32, #tpu.memory_space<vmem>>, vector<16x256xf32>,
    %c64_108 = arith.constant 64 : index
    %c0_109 = arith.constant 0 : index
    %107 = vector.load %arg25[%c64_108, %c0_109] : memref<144x256xf32, #tpu.memory_space<vmem>>, vector<16x256xf32>
    tpu.vector_store %arg25[%c64_108, %c0_109], %98 {strides = array<i32>} : memref<144x256xf32, #tpu.memory_space<vmem>>, vector<16x256xf32>,
    %c255_i32_110 = arith.constant 255 : i32
    %108 = tpu.dynamic_rotate %98 by %c255_i32_110 dim 1 : vector<16x256xf32>, i32 -> vector<16x256xf32>
    %c80_111 = arith.constant 80 : index
    %c0_112 = arith.constant 0 : index
    %109 = vector.load %arg25[%c80_111, %c0_112] : memref<144x256xf32, #tpu.memory_space<vmem>>, vector<16x256xf32>
    tpu.vector_store %arg25[%c80_111, %c0_112], %108 {strides = array<i32>} : memref<144x256xf32, #tpu.memory_space<vmem>>, vector<16x256xf32>,
    %c247_i32_113 = arith.constant 247 : i32
    %110 = tpu.dynamic_rotate %98 by %c247_i32_113 dim 1 : vector<16x256xf32>, i32 -> vector<16x256xf32>
    %c96_114 = arith.constant 96 : index
    %c0_115 = arith.constant 0 : index
    %111 = vector.load %arg25[%c96_114, %c0_115] : memref<144x256xf32, #tpu.memory_space<vmem>>, vector<16x256xf32>
    tpu.vector_store %arg25[%c96_114, %c0_115], %110 {strides = array<i32>} : memref<144x256xf32, #tpu.memory_space<vmem>>, vector<16x256xf32>,
    %c246_i32_116 = arith.constant 246 : i32
    %112 = tpu.dynamic_rotate %98 by %c246_i32_116 dim 1 : vector<16x256xf32>, i32 -> vector<16x256xf32>
    %c112_117 = arith.constant 112 : index
    %c0_118 = arith.constant 0 : index
    %113 = vector.load %arg25[%c112_117, %c0_118] : memref<144x256xf32, #tpu.memory_space<vmem>>, vector<16x256xf32>
    tpu.vector_store %arg25[%c112_117, %c0_118], %112 {strides = array<i32>} : memref<144x256xf32, #tpu.memory_space<vmem>>, vector<16x256xf32>,
    %c245_i32_119 = arith.constant 245 : i32
    %114 = tpu.dynamic_rotate %98 by %c245_i32_119 dim 1 : vector<16x256xf32>, i32 -> vector<16x256xf32>
    %c128_120 = arith.constant 128 : index
    %c0_121 = arith.constant 0 : index
    %115 = vector.load %arg25[%c128_120, %c0_121] : memref<144x256xf32, #tpu.memory_space<vmem>>, vector<16x256xf32>
    tpu.vector_store %arg25[%c128_120, %c0_121], %114 {strides = array<i32>} : memref<144x256xf32, #tpu.memory_space<vmem>>, vector<16x256xf32>,
    %c7_i32 = arith.constant 7 : i32
    %116 = arith.cmpi eq, %arg0, %c7_i32 : i32
    %117 = arith.extui %116 : i1 to i32
    %c0_i32_122 = arith.constant 0 : i32
    %118 = arith.cmpi ne, %117, %c0_i32_122 : i32
    scf.if %118 {
      %c0_123 = arith.constant 0 : index
      %c0_124 = arith.constant 0 : index
      %119 = vector.load %arg14[%c0_123, %c0_124] : memref<256x32xf32, #tpu.memory_space<vmem>>, vector<256x32xf32>
      %cst_125 = arith.constant dense<0.000000e+00> : vector<16x32xf32>
      %120 = tpu.matmul %98, %119, %cst_125 {dimension_numbers = #tpu.dot_dimension_numbers<[1], [0], [0], [1], [0, 0, 1, 1], [], []>} : vector<16x256xf32>, vector<256x32xf32>, vector<16x32xf32> -> vector<16x32xf32>
      %c0_126 = arith.constant 0 : index
      %c0_127 = arith.constant 0 : index
      %121 = vector.load %arg15[%c0_126, %c0_127] : memref<256x16xf32, #tpu.memory_space<vmem>>, vector<256x16xf32>
      %cst_128 = arith.constant dense<0.000000e+00> : vector<256x32xf32>
      %122 = tpu.matmul %121, %120, %cst_128 {dimension_numbers = #tpu.dot_dimension_numbers<[1], [0], [0], [1], [0, 0, 1, 1], [], []>} : vector<256x16xf32>, vector<16x32xf32>, vector<256x32xf32> -> vector<256x32xf32>
      %c0_129 = arith.constant 0 : index
      %c0_130 = arith.constant 0 : index
      %123 = vector.load %arg16[%c0_129, %c0_130] : memref<256x32xf32, #tpu.memory_space<vmem>>, vector<256x32xf32>
      %124 = arith.mulf %122, %123 : vector<256x32xf32>
      %c0_131 = arith.constant 0 : index
      %c0_132 = arith.constant 0 : index
      %125 = vector.load %arg17[%c0_131, %c0_132] : memref<32x2xf32, #tpu.memory_space<vmem>>, vector<32x2xf32>
      %cst_133 = arith.constant dense<0.000000e+00> : vector<256x2xf32>
      %126 = tpu.matmul %124, %125, %cst_133 {dimension_numbers = #tpu.dot_dimension_numbers<[1], [0], [0], [1], [0, 0, 1, 1], [], []>} : vector<256x32xf32>, vector<32x2xf32>, vector<256x2xf32> -> vector<256x2xf32>
      %c0_134 = arith.constant 0 : index
      %c0_135 = arith.constant 0 : index
      %127 = vector.load %arg18[%c0_134, %c0_135] : memref<32x256xf32, #tpu.memory_space<vmem>>, vector<32x256xf32>
      %cst_136 = arith.constant dense<0.000000e+00> : vector<32x2xf32>
      %128 = tpu.matmul %127, %126, %cst_136 {dimension_numbers = #tpu.dot_dimension_numbers<[1], [0], [0], [1], [0, 0, 1, 1], [], []>} : vector<32x256xf32>, vector<256x2xf32>, vector<32x2xf32> -> vector<32x2xf32>
      %c0_137 = arith.constant 0 : index
      %c0_138 = arith.constant 0 : index
      %129 = vector.load %arg19[%c0_137, %c0_138] : memref<32x1xf32, #tpu.memory_space<vmem>>, vector<32x1xf32>
      %130 = vector.broadcast %129 : vector<32x1xf32> to vector<32x2xf32>
      %131 = arith.addf %128, %130 : vector<32x2xf32>
      %c0_139 = arith.constant 0 : index
      %c0_140 = arith.constant 0 : index
      %132 = vector.load %arg20[%c0_139, %c0_140] : memref<11x32xf32, #tpu.memory_space<vmem>>, vector<11x32xf32>
      %cst_141 = arith.constant dense<0.000000e+00> : vector<11x2xf32>
      %133 = tpu.matmul %132, %131, %cst_141 {dimension_numbers = #tpu.dot_dimension_numbers<[1], [0], [0], [1], [0, 0, 1, 1], [], []>} : vector<11x32xf32>, vector<32x2xf32>, vector<11x2xf32> -> vector<11x2xf32>
      %c0_142 = arith.constant 0 : index
      %c0_143 = arith.constant 0 : index
      %134 = vector.load %arg21[%c0_142, %c0_143] : memref<11x1xf32, #tpu.memory_space<vmem>>, vector<11x1xf32>
      %135 = vector.broadcast %134 : vector<11x1xf32> to vector<11x2xf32>
      %136 = arith.addf %133, %135 : vector<11x2xf32>
      %c0_144 = arith.constant 0 : index
      %c0_145 = arith.constant 0 : index
      %137 = vector.load %arg22[%c0_144, %c0_145] : memref<11x2xf32, #tpu.memory_space<vmem>>, vector<11x2xf32>
      tpu.vector_store %arg22[%c0_144, %c0_145], %136 {strides = array<i32>} : memref<11x2xf32, #tpu.memory_space<vmem>>, vector<11x2xf32>,
    } else {
    }
    return
  }
  func.func @transform_0(%arg0: i32) -> (i32, i32, i32) {
    %c0_i32 = arith.constant 0 : i32
    %c0_i32_0 = arith.constant 0 : i32
    %c0_i32_1 = arith.constant 0 : i32
    return %arg0, %c0_i32, %c0_i32_0 : i32, i32, i32
  }
  func.func @transform_1(%arg0: i32) -> (i32, i32) {
    %c0_i32 = arith.constant 0 : i32
    %c0_i32_0 = arith.constant 0 : i32
    %c0_i32_1 = arith.constant 0 : i32
    return %c0_i32, %c0_i32_0 : i32, i32
  }
  func.func @transform_2(%arg0: i32) -> (i32, i32) {
    %c0_i32 = arith.constant 0 : i32
    %c0_i32_0 = arith.constant 0 : i32
    %c0_i32_1 = arith.constant 0 : i32
    return %c0_i32, %c0_i32_0 : i32, i32
  }
  func.func @transform_3(%arg0: i32) -> (i32, i32) {
    %c0_i32 = arith.constant 0 : i32
    %c0_i32_0 = arith.constant 0 : i32
    %c0_i32_1 = arith.constant 0 : i32
    return %c0_i32, %c0_i32_0 : i32, i32
  }
  func.func @transform_4(%arg0: i32) -> (i32, i32) {
    %c0_i32 = arith.constant 0 : i32
    %c0_i32_0 = arith.constant 0 : i32
    %c0_i32_1 = arith.constant 0 : i32
    return %c0_i32, %c0_i32_0 : i32, i32
  }
  func.func @transform_5(%arg0: i32) -> (i32, i32) {
    %c0_i32 = arith.constant 0 : i32
    %c0_i32_0 = arith.constant 0 : i32
    %c0_i32_1 = arith.constant 0 : i32
    return %c0_i32, %c0_i32_0 : i32, i32
  }
  func.func @transform_6(%arg0: i32) -> (i32, i32) {
    %c0_i32 = arith.constant 0 : i32
    %c0_i32_0 = arith.constant 0 : i32
    %c0_i32_1 = arith.constant 0 : i32
    return %c0_i32, %c0_i32_0 : i32, i32
  }
  func.func @transform_7(%arg0: i32) -> (i32, i32) {
    %c0_i32 = arith.constant 0 : i32
    %c0_i32_0 = arith.constant 0 : i32
    %c0_i32_1 = arith.constant 0 : i32
    return %c0_i32, %c0_i32_0 : i32, i32
  }
  func.func @transform_8(%arg0: i32) -> (i32, i32) {
    %c0_i32 = arith.constant 0 : i32
    %c0_i32_0 = arith.constant 0 : i32
    %c0_i32_1 = arith.constant 0 : i32
    return %c0_i32, %c0_i32_0 : i32, i32
  }
  func.func @transform_9(%arg0: i32) -> (i32, i32) {
    %c0_i32 = arith.constant 0 : i32
    %c0_i32_0 = arith.constant 0 : i32
    %c0_i32_1 = arith.constant 0 : i32
    return %c0_i32, %c0_i32_0 : i32, i32
  }
  func.func @transform_10(%arg0: i32) -> (i32, i32) {
    %c0_i32 = arith.constant 0 : i32
    %c0_i32_0 = arith.constant 0 : i32
    %c0_i32_1 = arith.constant 0 : i32
    return %c0_i32, %c0_i32_0 : i32, i32
  }
  func.func @transform_11(%arg0: i32) -> (i32, i32) {
    %c0_i32 = arith.constant 0 : i32
    %c0_i32_0 = arith.constant 0 : i32
    %c0_i32_1 = arith.constant 0 : i32
    return %c0_i32, %c0_i32_0 : i32, i32
  }
  func.func @transform_12(%arg0: i32) -> (i32, i32) {
    %c0_i32 = arith.constant 0 : i32
    %c0_i32_0 = arith.constant 0 : i32
    %c0_i32_1 = arith.constant 0 : i32
    return %c0_i32, %c0_i32_0 : i32, i32
  }
  func.func @transform_13(%arg0: i32) -> (i32, i32) {
    %c0_i32 = arith.constant 0 : i32
    %c0_i32_0 = arith.constant 0 : i32
    %c0_i32_1 = arith.constant 0 : i32
    return %c0_i32, %c0_i32_0 : i32, i32
  }
  func.func @transform_14(%arg0: i32) -> (i32, i32) {
    %c0_i32 = arith.constant 0 : i32
    %c0_i32_0 = arith.constant 0 : i32
    %c0_i32_1 = arith.constant 0 : i32
    return %c0_i32, %c0_i32_0 : i32, i32
  }
  func.func @transform_15(%arg0: i32) -> (i32, i32) {
    %c0_i32 = arith.constant 0 : i32
    %c0_i32_0 = arith.constant 0 : i32
    %c0_i32_1 = arith.constant 0 : i32
    return %c0_i32, %c0_i32_0 : i32, i32
  }
  func.func @transform_16(%arg0: i32) -> (i32, i32) {
    %c0_i32 = arith.constant 0 : i32
    %c0_i32_0 = arith.constant 0 : i32
    %c0_i32_1 = arith.constant 0 : i32
    return %c0_i32, %c0_i32_0 : i32, i32
  }
  func.func @transform_17(%arg0: i32) -> (i32, i32) {
    %c0_i32 = arith.constant 0 : i32
    %c0_i32_0 = arith.constant 0 : i32
    %c0_i32_1 = arith.constant 0 : i32
    return %c0_i32, %c0_i32_0 : i32, i32
  }
  func.func @transform_18(%arg0: i32) -> (i32, i32) {
    %c0_i32 = arith.constant 0 : i32
    %c0_i32_0 = arith.constant 0 : i32
    %c0_i32_1 = arith.constant 0 : i32
    return %c0_i32, %c0_i32_0 : i32, i32
  }
  func.func @transform_19(%arg0: i32) -> (i32, i32) {
    %c0_i32 = arith.constant 0 : i32
    %c0_i32_0 = arith.constant 0 : i32
    %c0_i32_1 = arith.constant 0 : i32
    return %c0_i32, %c0_i32_0 : i32, i32
  }
  func.func @transform_20(%arg0: i32) -> (i32, i32) {
    %c0_i32 = arith.constant 0 : i32
    %c0_i32_0 = arith.constant 0 : i32
    %c0_i32_1 = arith.constant 0 : i32
    return %c0_i32, %c0_i32_0 : i32, i32
  }
  func.func @transform_21(%arg0: i32) -> (i32, i32) {
    %c0_i32 = arith.constant 0 : i32
    %c0_i32_0 = arith.constant 0 : i32
    %c0_i32_1 = arith.constant 0 : i32
    return %c0_i32, %c0_i32_0 : i32, i32
  }
}

</mosaic_0001>

<bundles_post_ra>
// kernel: conv_rnn_forward.1
= control target key start
LH: loop header
LB: loop body
LE: loop exit
PB: predicated region body
PF: predicated region fallthrough
CT: control target
= control target key end

     0   :  { %s8599_s0 = inlined_call_operand.vmem [shape: f32[8,18,768], index: 0, kind: input, shape index: {}]   ;;  %s8600_s1 = inlined_call_operand.vmem [shape: f32[8,18], index: 1, kind: input, shape index: {}]   ;;  %s8601_s2 = inlined_call_operand.vmem [shape: f32[8,72], index: 2, kind: input, shape index: {}]   ;;  %s8602_s3 = inlined_call_operand.vmem [shape: f32[8,1], index: 3, kind: input, shape index: {}]   ;;  %s8603_s4 = inlined_call_operand.vmem [shape: f32[16,72], index: 4, kind: input, shape index: {}]   ;;  %s8604_s5 = inlined_call_operand.vmem [shape: f32[16,144], index: 5, kind: input, shape index: {}]   ;;  %s8605_s6 = inlined_call_operand.vmem [shape: f32[16,1], index: 6, kind: input, shape index: {}]   ;;  %s8606_s7 = inlined_call_operand.vmem [shape: f32[16,144], index: 7, kind: input, shape index: {}]   ;;  %s8607_s8 = inlined_call_operand.vmem [shape: f32[16,144], index: 8, kind: input, shape index: {}]   ;;  %s8608_s9 = inlined_call_operand.vmem [shape: f32[16,1], index: 9, kind: input, shape index: {}]   ;;  %s8609_s10 = inlined_call_operand.vmem [shape: f32[1,768], index: 10, kind: input, shape index: {}]   ;;  %s8610_s11 = inlined_call_operand.vmem [shape: f32[1,256], index: 11, kind: input, shape index: {}]   ;;  %s8611_s12 = inlined_call_operand.vmem [shape: f32[768,256], index: 12, kind: input, shape index: {}]   ;;  %s8612_s13 = inlined_call_operand.vmem [shape: f32[256,32], index: 13, kind: input, shape index: {}]   ;;  %s8613_s14 = inlined_call_operand.vmem [shape: f32[256,16], index: 14, kind: input, shape index: {}]   ;;  %s8614_s15 = inlined_call_operand.vmem [shape: f32[256,32], index: 15, kind: input, shape index: {}]   ;;  %s8615_s16 = inlined_call_operand.vmem [shape: f32[32,2], index: 16, kind: input, shape index: {}]   ;;  %s8616_s17 = inlined_call_operand.vmem [shape: f32[32,256], index: 17, kind: input, shape index: {}]   ;;  %s8617_s18 = inlined_call_operand.vmem [shape: f32[32,1], index: 18, kind: input, shape index: {}]   ;;  %s8618_s19 = inlined_call_operand.vmem [shape: f32[11,32], index: 19, kind: input, shape index: {}]   ;;  %s8619_s20 = inlined_call_operand.vmem [shape: f32[11,1], index: 20, kind: input, shape index: {}]   ;;  %s8620_s21 = inlined_call_operand.vmem [shape: f32[11,2], index: 21, kind: output, shape index: {}]  }
   0x1   :  { %8645 = sst [smem:[#allocation6_spill]] %s8599_s0 }
   0x2   :  { %8646 = sst [smem:[#allocation7_spill]] %s8600_s1 }
   0x3   :  { %8647 = sst [smem:[#allocation8_spill]] %s8601_s2  ;;  %s6104_s2 = smov 0  }
   0x4   :  { %8648 = sst [smem:[#allocation9_spill]] %s8602_s3 }
   0x5   :  { %8649 = sst [smem:[#allocation10_spill]] %s8603_s4 }
   0x6   :  { %8650 = sst [smem:[#allocation11_spill]] %s8604_s5 }
   0x7 LB: > { %s6110_s25 = sadd.s32 4294967295, %s5974_s2   ;;  %p4830_p0 = scmp.ge.s32.totalorder %s5974_s2, 1  ;;  %s5974_s2 = sphi %s6104_s2, %s31_s2  }
   0x8   : > { %p582_p1 = scmp.lt.s32.totalorder %s5974_s2, 9 }
   0xa   : > { %p583_p2 = pnand %p4830_p0, %p582_p1 }
   0xb   : > { %p637_p3 = scmp.lt.s32.totalorder (!%p583_p2), %s6110_s25, 7  ;;  %s8651_s29 = sld [smem:[#allocation6_spill]] (!%p583_p2) }
   0xc   : > { %586 = sbr.rel (%p583_p2) target bundleno = 2883 (0xb43), region = 104  ;;  %p4832_p4 = scmp.ne.s32.totalorder (!%p583_p2), %s6110_s25, 0 }
  0x13   : > { %s638_s26 = scalar_select %p637_p3, %s6110_s25, 7 }
  0x14   : > { %645 = sbr.rel (%p4832_p4) target bundleno = 120 (0x78), region = 108  ;;  %v5976_v0 = vmov (!%p4832_p4), 0.0  }
  0x15   : > { %s5801_s27 = smul.u32 144, %s638_s26  ;;  %646 = vst [vmem:[#allocation2] sm:$0xff] (!%p4832_p4), %v5976_v0  ;;  %647 = vst [vmem:[#allocation2 + $0x8] sm:$0xff] (!%p4832_p4), %v5976_v0 }
  0x16   : > { %648 = vst [vmem:[#allocation2 + $0x10] sm:$0xff] (!%p4832_p4), %v5976_v0  ;;  %649 = vst [vmem:[#allocation2 + $0x18] sm:$0xff] (!%p4832_p4), %v5976_v0 }
  0x17   : > { %s6119_s0 = scalar_lea.vmem %s8651_s29, %s5801_s27  ;;  %650 = vst [vmem:[#allocation2 + $0x20] sm:$0xff] (!%p4832_p4), %v5976_v0  ;;  %651 = vst [vmem:[#allocation2 + $0x28] sm:$0xff] (!%p4832_p4), %v5976_v0 }
  0x18   : > { %652 = vst [vmem:[#allocation2 + $0x30] sm:$0xff] (!%p4832_p4), %v5976_v0  ;;  %653 = vst [vmem:[#allocation2 + $0x38] sm:$0xff] (!%p4832_p4), %v5976_v0 }
  0x19   : > { %654 = vst [vmem:[#allocation2 + $0x40] sm:$0xff] (!%p4832_p4), %v5976_v0  ;;  %655 = vst [vmem:[#allocation2 + $0x48] sm:$0xff] (!%p4832_p4), %v5976_v0 }
  0x1a   : > { %656 = vst [vmem:[#allocation2 + $0x50] sm:$0xff] (!%p4832_p4), %v5976_v0  ;;  %657 = vst [vmem:[#allocation2 + $0x58] sm:$0xff] (!%p4832_p4), %v5976_v0 }
  0x1b   : > { %658 = vst [vmem:[#allocation2 + $0x60] sm:$0xff] %v5976_v0  ;;  %659 = vst [vmem:[#allocation2 + $0x68] sm:$0xff] %v5976_v0 }
  0x1c   : > { %660 = vst [vmem:[#allocation2 + $0x70] sm:$0xff] %v5976_v0  ;;  %661 = vst [vmem:[#allocation2 + $0x78] sm:$0xff] %v5976_v0 }
  0x1d   : > { %662 = vst [vmem:[#allocation2 + $0x80] sm:$0xff] %v5976_v0  ;;  %663 = vst [vmem:[#allocation2 + $0x88] sm:$0xff] %v5976_v0 }
  0x1e   : > { %664 = vst [vmem:[#allocation2 + $0x90] sm:$0xff] %v5976_v0  ;;  %665 = vst [vmem:[#allocation2 + $0x98] sm:$0xff] %v5976_v0 }
  0x1f   : > { %666 = vst [vmem:[#allocation2 + $0xa0] sm:$0xff] %v5976_v0  ;;  %667 = vst [vmem:[#allocation2 + $0xa8] sm:$0xff] %v5976_v0 }
  0x20   : > { %668 = vst [vmem:[#allocation2 + $0xb0] sm:$0xff] %v5976_v0  ;;  %669 = vst [vmem:[#allocation2 + $0xb8] sm:$0xff] %v5976_v0 }
  0x21   : > { %670 = vst [vmem:[#allocation2 + $0xc0] sm:$0xff] %v5976_v0  ;;  %671 = vst [vmem:[#allocation2 + $0xc8] sm:$0xff] %v5976_v0 }
  0x22   : > { %672 = vst [vmem:[#allocation2 + $0xd0] sm:$0xff] %v5976_v0  ;;  %673 = vst [vmem:[#allocation2 + $0xd8] sm:$0xff] %v5976_v0 }
  0x23   : > { %674 = vst [vmem:[#allocation2 + $0xe0] sm:$0xff] %v5976_v0  ;;  %675 = vst [vmem:[#allocation2 + $0xe8] sm:$0xff] %v5976_v0 }
  0x24   : > { %676 = vst [vmem:[#allocation2 + $0xf0] sm:$0xff] %v5976_v0  ;;  %677 = vst [vmem:[#allocation2 + $0xf8] sm:$0xff] %v5976_v0 }
  0x25   : > { %678 = vst [vmem:[#allocation2 + $0x100] sm:$0xff] %v5976_v0  ;;  %679 = vst [vmem:[#allocation2 + $0x108] sm:$0xff] %v5976_v0 }
  0x26   : > { %680 = vst [vmem:[#allocation2 + $0x110] sm:$0xff] %v5976_v0  ;;  %681 = vst [vmem:[#allocation2 + $0x118] sm:$0xff] %v5976_v0 }
  0x27   : > { %682 = vst [vmem:[#allocation2 + $0x120] sm:$0xff] %v5976_v0  ;;  %683 = vst [vmem:[#allocation2 + $0x128] sm:$0xff] %v5976_v0 }
  0x28   : > { %684 = vst [vmem:[#allocation2 + $0x130] sm:$0xff] %v5976_v0  ;;  %685 = vst [vmem:[#allocation2 + $0x138] sm:$0xff] %v5976_v0 }
  0x29   : > { %686 = vst [vmem:[#allocation2 + $0x140] sm:$0xff] %v5976_v0  ;;  %687 = vst [vmem:[#allocation2 + $0x148] sm:$0xff] %v5976_v0 }
  0x2a   : > { %688 = vst [vmem:[#allocation2 + $0x150] sm:$0xff] %v5976_v0  ;;  %689 = vst [vmem:[#allocation2 + $0x158] sm:$0xff] %v5976_v0 }
  0x2b   : > { %690 = vst [vmem:[#allocation2 + $0x160] sm:$0xff] %v5976_v0  ;;  %691 = vst [vmem:[#allocation2 + $0x168] sm:$0xff] %v5976_v0 }
  0x2c   : > { %692 = vst [vmem:[#allocation2 + $0x170] sm:$0xff] %v5976_v0  ;;  %693 = vst [vmem:[#allocation2 + $0x178] sm:$0xff] %v5976_v0 }
  0x2d   : > { %694 = vst [vmem:[#allocation2 + $0x180] sm:$0xff] %v5976_v0  ;;  %695 = vst [vmem:[#allocation2 + $0x188] sm:$0xff] %v5976_v0 }
  0x2e   : > { %696 = vst [vmem:[#allocation2 + $0x190] sm:$0xff] %v5976_v0  ;;  %697 = vst [vmem:[#allocation2 + $0x198] sm:$0xff] %v5976_v0 }
  0x2f   : > { %698 = vst [vmem:[#allocation2 + $0x1a0] sm:$0xff] %v5976_v0  ;;  %699 = vst [vmem:[#allocation2 + $0x1a8] sm:$0xff] %v5976_v0 }
  0x30   : > { %700 = vst [vmem:[#allocation3] sm:$0xff] %v5976_v0  ;;  %701 = vst [vmem:[#allocation3 + $0x8] sm:$0xff] %v5976_v0 }
  0x31   : > { %702 = vst [vmem:[#allocation3 + $0x10] sm:$0xff] %v5976_v0  ;;  %703 = vst [vmem:[#allocation3 + $0x18] sm:$0xff] %v5976_v0 }
  0x32   : > { %704 = vst [vmem:[#allocation3 + $0x20] sm:$0xff] %v5976_v0  ;;  %705 = vst [vmem:[#allocation3 + $0x28] sm:$0xff] %v5976_v0 }
  0x33   : > { %706 = vst [vmem:[#allocation3 + $0x30] sm:$0xff] %v5976_v0  ;;  %707 = vst [vmem:[#allocation3 + $0x38] sm:$0xff] %v5976_v0 }
  0x34   : > { %708 = vst [vmem:[#allocation3 + $0x40] sm:$0xff] %v5976_v0  ;;  %709 = vst [vmem:[#allocation3 + $0x48] sm:$0xff] %v5976_v0 }
  0x35   : > { %710 = vst [vmem:[#allocation3 + $0x50] sm:$0xff] %v5976_v0  ;;  %711 = vst [vmem:[#allocation3 + $0x58] sm:$0xff] %v5976_v0 }
  0x36   : > { %712 = vst [vmem:[#allocation3 + $0x60] sm:$0xff] %v5976_v0  ;;  %713 = vst [vmem:[#allocation3 + $0x68] sm:$0xff] %v5976_v0 }
  0x37   : > { %714 = vst [vmem:[#allocation3 + $0x70] sm:$0xff] %v5976_v0  ;;  %715 = vst [vmem:[#allocation3 + $0x78] sm:$0xff] %v5976_v0 }
  0x38   : > { %716 = vst [vmem:[#allocation3 + $0x80] sm:$0xff] %v5976_v0  ;;  %717 = vst [vmem:[#allocation3 + $0x88] sm:$0xff] %v5976_v0 }
  0x39   : > { %718 = vst [vmem:[#allocation3 + $0x90] sm:$0xff] %v5976_v0  ;;  %719 = vst [vmem:[#allocation3 + $0x98] sm:$0xff] %v5976_v0 }
  0x3a   : > { %720 = vst [vmem:[#allocation3 + $0xa0] sm:$0xff] %v5976_v0  ;;  %721 = vst [vmem:[#allocation3 + $0xa8] sm:$0xff] %v5976_v0 }
  0x3b   : > { %722 = vst [vmem:[#allocation3 + $0xb0] sm:$0xff] %v5976_v0  ;;  %723 = vst [vmem:[#allocation3 + $0xb8] sm:$0xff] %v5976_v0 }
  0x3c   : > { %724 = vst [vmem:[#allocation3 + $0xc0] sm:$0xff] %v5976_v0  ;;  %725 = vst [vmem:[#allocation3 + $0xc8] sm:$0xff] %v5976_v0 }
  0x3d   : > { %726 = vst [vmem:[#allocation3 + $0xd0] sm:$0xff] %v5976_v0  ;;  %727 = vst [vmem:[#allocation3 + $0xd8] sm:$0xff] %v5976_v0 }
  0x3e   : > { %728 = vst [vmem:[#allocation3 + $0xe0] sm:$0xff] %v5976_v0  ;;  %729 = vst [vmem:[#allocation3 + $0xe8] sm:$0xff] %v5976_v0 }
  0x3f   : > { %730 = vst [vmem:[#allocation3 + $0xf0] sm:$0xff] %v5976_v0  ;;  %731 = vst [vmem:[#allocation3 + $0xf8] sm:$0xff] %v5976_v0 }
  0x40   : > { %732 = vst [vmem:[#allocation3 + $0x100] sm:$0xff] %v5976_v0  ;;  %733 = vst [vmem:[#allocation3 + $0x108] sm:$0xff] %v5976_v0 }
  0x41   : > { %734 = vst [vmem:[#allocation3 + $0x110] sm:$0xff] %v5976_v0  ;;  %735 = vst [vmem:[#allocation3 + $0x118] sm:$0xff] %v5976_v0 }
  0x42   : > { %736 = vst [vmem:[#allocation3 + $0x120] sm:$0xff] %v5976_v0  ;;  %737 = vst [vmem:[#allocation3 + $0x128] sm:$0xff] %v5976_v0 }
  0x43   : > { %738 = vst [vmem:[#allocation3 + $0x130] sm:$0xff] %v5976_v0  ;;  %739 = vst [vmem:[#allocation3 + $0x138] sm:$0xff] %v5976_v0 }
  0x44   : > { %740 = vst [vmem:[#allocation3 + $0x140] sm:$0xff] %v5976_v0  ;;  %741 = vst [vmem:[#allocation3 + $0x148] sm:$0xff] %v5976_v0 }
  0x45   : > { %742 = vst [vmem:[#allocation3 + $0x150] sm:$0xff] %v5976_v0  ;;  %743 = vst [vmem:[#allocation3 + $0x158] sm:$0xff] %v5976_v0 }
  0x46   : > { %744 = vst [vmem:[#allocation3 + $0x160] sm:$0xff] %v5976_v0  ;;  %745 = vst [vmem:[#allocation3 + $0x168] sm:$0xff] %v5976_v0 }
  0x47   : > { %746 = vst [vmem:[#allocation3 + $0x170] sm:$0xff] %v5976_v0  ;;  %747 = vst [vmem:[#allocation3 + $0x178] sm:$0xff] %v5976_v0 }
  0x48   : > { %748 = vst [vmem:[#allocation3 + $0x180] sm:$0xff] %v5976_v0  ;;  %749 = vst [vmem:[#allocation3 + $0x188] sm:$0xff] %v5976_v0 }
  0x49   : > { %750 = vst [vmem:[#allocation3 + $0x190] sm:$0xff] %v5976_v0  ;;  %751 = vst [vmem:[#allocation3 + $0x198] sm:$0xff] %v5976_v0 }
  0x4a   : > { %752 = vst [vmem:[#allocation3 + $0x1a0] sm:$0xff] %v5976_v0  ;;  %753 = vst [vmem:[#allocation3 + $0x1a8] sm:$0xff] %v5976_v0 }
  0x4b   : > { %754 = vst [vmem:[#allocation3 + $0x1b0] sm:$0xff] %v5976_v0  ;;  %755 = vst [vmem:[#allocation3 + $0x1b8] sm:$0xff] %v5976_v0 }
  0x4c   : > { %756 = vst [vmem:[#allocation3 + $0x1c0] sm:$0xff] %v5976_v0  ;;  %757 = vst [vmem:[#allocation3 + $0x1c8] sm:$0xff] %v5976_v0 }
  0x4d   : > { %758 = vst [vmem:[#allocation3 + $0x1d0] sm:$0xff] %v5976_v0  ;;  %759 = vst [vmem:[#allocation3 + $0x1d8] sm:$0xff] %v5976_v0 }
  0x4e   : > { %760 = vst [vmem:[#allocation3 + $0x1e0] sm:$0xff] %v5976_v0  ;;  %761 = vst [vmem:[#allocation3 + $0x1e8] sm:$0xff] %v5976_v0 }
  0x4f   : > { %762 = vst [vmem:[#allocation3 + $0x1f0] sm:$0xff] %v5976_v0  ;;  %763 = vst [vmem:[#allocation3 + $0x1f8] sm:$0xff] %v5976_v0 }
  0x50   : > { %764 = vst [vmem:[#allocation3 + $0x200] sm:$0xff] %v5976_v0  ;;  %765 = vst [vmem:[#allocation3 + $0x208] sm:$0xff] %v5976_v0 }
  0x51   : > { %766 = vst [vmem:[#allocation3 + $0x210] sm:$0xff] %v5976_v0  ;;  %767 = vst [vmem:[#allocation3 + $0x218] sm:$0xff] %v5976_v0 }
  0x52   : > { %768 = vst [vmem:[#allocation3 + $0x220] sm:$0xff] %v5976_v0  ;;  %769 = vst [vmem:[#allocation3 + $0x228] sm:$0xff] %v5976_v0 }
  0x53   : > { %770 = vst [vmem:[#allocation3 + $0x230] sm:$0xff] %v5976_v0  ;;  %771 = vst [vmem:[#allocation3 + $0x238] sm:$0xff] %v5976_v0 }
  0x54   : > { %772 = vst [vmem:[#allocation3 + $0x240] sm:$0xff] %v5976_v0  ;;  %773 = vst [vmem:[#allocation3 + $0x248] sm:$0xff] %v5976_v0 }
  0x55   : > { %774 = vst [vmem:[#allocation3 + $0x250] sm:$0xff] %v5976_v0  ;;  %775 = vst [vmem:[#allocation3 + $0x258] sm:$0xff] %v5976_v0 }
  0x56   : > { %776 = vst [vmem:[#allocation3 + $0x260] sm:$0xff] %v5976_v0  ;;  %777 = vst [vmem:[#allocation3 + $0x268] sm:$0xff] %v5976_v0 }
  0x57   : > { %778 = vst [vmem:[#allocation3 + $0x270] sm:$0xff] %v5976_v0  ;;  %779 = vst [vmem:[#allocation3 + $0x278] sm:$0xff] %v5976_v0 }
  0x58   : > { %780 = vst [vmem:[#allocation3 + $0x280] sm:$0xff] %v5976_v0  ;;  %781 = vst [vmem:[#allocation3 + $0x288] sm:$0xff] %v5976_v0 }
  0x59   : > { %782 = vst [vmem:[#allocation3 + $0x290] sm:$0xff] %v5976_v0  ;;  %783 = vst [vmem:[#allocation3 + $0x298] sm:$0xff] %v5976_v0 }
  0x5a   : > { %784 = vst [vmem:[#allocation3 + $0x2a0] sm:$0xff] %v5976_v0  ;;  %785 = vst [vmem:[#allocation3 + $0x2a8] sm:$0xff] %v5976_v0 }
  0x5b   : > { %786 = vst [vmem:[#allocation3 + $0x2b0] sm:$0xff] %v5976_v0  ;;  %787 = vst [vmem:[#allocation3 + $0x2b8] sm:$0xff] %v5976_v0 }
  0x5c   : > { %788 = vst [vmem:[#allocation3 + $0x2c0] sm:$0xff] %v5976_v0  ;;  %789 = vst [vmem:[#allocation3 + $0x2c8] sm:$0xff] %v5976_v0 }
  0x5d   : > { %790 = vst [vmem:[#allocation3 + $0x2d0] sm:$0xff] %v5976_v0  ;;  %791 = vst [vmem:[#allocation3 + $0x2d8] sm:$0xff] %v5976_v0 }
  0x5e   : > { %792 = vst [vmem:[#allocation3 + $0x2e0] sm:$0xff] %v5976_v0  ;;  %793 = vst [vmem:[#allocation3 + $0x2e8] sm:$0xff] %v5976_v0 }
  0x5f   : > { %794 = vst [vmem:[#allocation3 + $0x2f0] sm:$0xff] %v5976_v0  ;;  %795 = vst [vmem:[#allocation3 + $0x2f8] sm:$0xff] %v5976_v0 }
  0x60   : > { %796 = vst [vmem:[#allocation3 + $0x300] sm:$0xff] %v5976_v0  ;;  %797 = vst [vmem:[#allocation3 + $0x308] sm:$0xff] %v5976_v0 }
  0x61   : > { %798 = vst [vmem:[#allocation3 + $0x310] sm:$0xff] %v5976_v0  ;;  %799 = vst [vmem:[#allocation3 + $0x318] sm:$0xff] %v5976_v0 }
  0x62   : > { %800 = vst [vmem:[#allocation3 + $0x320] sm:$0xff] %v5976_v0  ;;  %801 = vst [vmem:[#allocation3 + $0x328] sm:$0xff] %v5976_v0 }
  0x63   : > { %802 = vst [vmem:[#allocation3 + $0x330] sm:$0xff] %v5976_v0  ;;  %803 = vst [vmem:[#allocation3 + $0x338] sm:$0xff] %v5976_v0 }
  0x64   : > { %804 = vst [vmem:[#allocation3 + $0x340] sm:$0xff] %v5976_v0  ;;  %805 = vst [vmem:[#allocation3 + $0x348] sm:$0xff] %v5976_v0 }
  0x65   : > { %806 = vst [vmem:[#allocation3 + $0x350] sm:$0xff] %v5976_v0  ;;  %807 = vst [vmem:[#allocation3 + $0x358] sm:$0xff] %v5976_v0 }
  0x66   : > { %808 = vst [vmem:[#allocation4] sm:$0xff] %v5976_v0  ;;  %809 = vst [vmem:[#allocation4 + $0x8] sm:$0xff] %v5976_v0 }
  0x67   : > { %810 = vst [vmem:[#allocation4 + $0x10] sm:$0xff] %v5976_v0  ;;  %811 = vst [vmem:[#allocation4 + $0x18] sm:$0xff] %v5976_v0 }
  0x68   : > { %812 = vst [vmem:[#allocation4 + $0x20] sm:$0xff] %v5976_v0  ;;  %813 = vst [vmem:[#allocation4 + $0x28] sm:$0xff] %v5976_v0 }
  0x69   : > { %814 = vst [vmem:[#allocation4 + $0x30] sm:$0xff] %v5976_v0  ;;  %815 = vst [vmem:[#allocation4 + $0x38] sm:$0xff] %v5976_v0 }
  0x6a   : > { %816 = vst [vmem:[#allocation4 + $0x40] sm:$0xff] %v5976_v0  ;;  %817 = vst [vmem:[#allocation4 + $0x48] sm:$0xff] %v5976_v0 }
  0x6b   : > { %818 = vst [vmem:[#allocation4 + $0x50] sm:$0xff] %v5976_v0  ;;  %819 = vst [vmem:[#allocation4 + $0x58] sm:$0xff] %v5976_v0 }
  0x6c   : > { %820 = vst [vmem:[#allocation4 + $0x60] sm:$0xff] %v5976_v0  ;;  %821 = vst [vmem:[#allocation4 + $0x68] sm:$0xff] %v5976_v0 }
  0x6d   : > { %822 = vst [vmem:[#allocation4 + $0x70] sm:$0xff] %v5976_v0  ;;  %823 = vst [vmem:[#allocation4 + $0x78] sm:$0xff] %v5976_v0 }
  0x6e   : > { %824 = vst [vmem:[#allocation4 + $0x80] sm:$0xff] %v5976_v0  ;;  %825 = vst [vmem:[#allocation4 + $0x88] sm:$0xff] %v5976_v0 }
  0x6f   : > { %826 = vst [vmem:[#allocation4 + $0x90] sm:$0xff] %v5976_v0  ;;  %827 = vst [vmem:[#allocation4 + $0x98] sm:$0xff] %v5976_v0 }
  0x70   : > { %828 = vst [vmem:[#allocation4 + $0xa0] sm:$0xff] %v5976_v0  ;;  %829 = vst [vmem:[#allocation4 + $0xa8] sm:$0xff] %v5976_v0 }
  0x71   : > { %830 = vst [vmem:[#allocation4 + $0xb0] sm:$0xff] %v5976_v0  ;;  %831 = vst [vmem:[#allocation4 + $0xb8] sm:$0xff] %v5976_v0 }
  0x72   : > { %832 = vst [vmem:[#allocation4 + $0xc0] sm:$0xff] %v5976_v0  ;;  %833 = vst [vmem:[#allocation4 + $0xc8] sm:$0xff] %v5976_v0 }
  0x73   : > { %834 = vst [vmem:[#allocation4 + $0xd0] sm:$0xff] %v5976_v0  ;;  %835 = vst [vmem:[#allocation4 + $0xd8] sm:$0xff] %v5976_v0 }
  0x74   : > { %836 = vst [vmem:[#allocation4 + $0xe0] sm:$0xff] %v5976_v0  ;;  %837 = vst [vmem:[#allocation4 + $0xe8] sm:$0xff] %v5976_v0 }
  0x75   : > { %838 = vst [vmem:[#allocation4 + $0xf0] sm:$0xff] %v5976_v0  ;;  %839 = vst [vmem:[#allocation4 + $0xf8] sm:$0xff] %v5976_v0 }
  0x76   : > { %840 = vst [vmem:[#allocation4 + $0x100] sm:$0xff] %v5976_v0  ;;  %841 = vst [vmem:[#allocation4 + $0x108] sm:$0xff] %v5976_v0 }
  0x77   : > { %842 = vst [vmem:[#allocation4 + $0x110] sm:$0xff] %v5976_v0  ;;  %843 = vst [vmem:[#allocation4 + $0x118] sm:$0xff] %v5976_v0 }
  0x78 PF: > { %v5977_v8 = vmov 0.0   ;;  %v5978_v14 = vmov 0   ;;  %v883_v16 = vld [vmem:[#allocation2 + $0x98] sm:$0xff]  ;;  %v885_v18 = vld [vmem:[#allocation2 + $0xa8] sm:$0xff]  ;;  %v882_v22 = vld [vmem:[#allocation2 + $0x90] sm:$0xff]  ;;  %s8652_s5 = sld [smem:[#allocation8_spill]] }
  0x79   : > { %v865_v1 = vld [vmem:[#allocation2 + $0x8] sm:$0xff]  ;;  %v864_v6 = vld [vmem:[#allocation2] sm:$0xff]  ;;  %986 = vmatprep.mubr.f32.mxu0 %v5977_v8  ;;  %1057 = vmatprep.mubr.f32.mxu1 %v5977_v8  ;;  %v879_v17 = vld [vmem:[#allocation2 + $0x78] sm:$0xff]  ;;  %vm918_vm0 = vcmask 588800   ;;  %vm1139_vm1 = vcmask 1041408   ;;  %s8653_s1 = sld [smem:[#allocation9_spill]] }
  0x7a   : > { %v867_v3 = vld [vmem:[#allocation2 + $0x18] sm:$0xff]  ;;  %v866_v11 = vld [vmem:[#allocation2 + $0x10] sm:$0xff]  ;;  %5828 = vset.pattern.permute.xlu0 %v5978_v14  ;;  %5829 = vset.pattern.permute.xlu1 %v5978_v14  ;;  %v5227_v20 = vpack.c.bf16 %v885_v18, %v879_v17  ;;  %v884_v25 = vld [vmem:[#allocation2 + $0xa0] sm:$0xff]  ;;  %s8654_s27 = sld [smem:[#allocation7_spill]]  ;;  %vm1135_vm2 = vcmask 146432   ;;  %s8655_s29 = sld [smem:[#allocation11_spill]] }
  0x7b   : > { %v878_v23 = vld [vmem:[#allocation2 + $0x70] sm:$0xff]  ;;  %v889_v26 = vld [vmem:[#allocation2 + $0xc8] sm:$0xff]  ;;  %v895_v27 = vld [vmem:[#allocation2 + $0xf8] sm:$0xff]  ;;  %vm1803_vm3 = vcmask 130048   ;;  %s8631_s26 = smov 18   ;;  %s8629_s3 = smov 17  }
  0x7c   : > { %v871_v2 = vld [vmem:[#allocation2 + $0x38] sm:$0xff]  ;;  %v870_v7 = vld [vmem:[#allocation2 + $0x30] sm:$0xff]  ;;  %v5229_v28 = vpack.c.bf16 %v884_v25, %v878_v23  ;;  %v5215_v29 = vpack.c.bf16 %v895_v27, %v889_v26  ;;  %v897_v31 = vld [vmem:[#allocation2 + $0x108] sm:$0xff]  ;;  %s5982_s28 = smov 1   ;;  %s8627_s4 = smov 111  }
  0x7d   : > { %v5207_v4 = vpack.c.bf16 %v871_v2, %v865_v1  ;;  %v873_v5 = vld [vmem:[#allocation2 + $0x48] sm:$0xff]  ;;  %v5209_v10 = vpack.c.bf16 %v870_v7, %v864_v6  ;;  %v872_v12 = vld [vmem:[#allocation2 + $0x40] sm:$0xff]  ;;  %v891_v30 = vld [vmem:[#allocation2 + $0xd8] sm:$0xff]  ;;  %s8625_s30 = smov 110   ;;  %s8641_s22 = smov 10  }
  0x7e   : > { %v5223_v9 = vpack.c.bf16 %v873_v5, %v867_v3  ;;  %v5225_v15 = vpack.c.bf16 %v872_v12, %v866_v11  ;;  %v888_v32 = vld [vmem:[#allocation2 + $0xc0] sm:$0xff]  ;;  %v5231_v33 = vpack.c.bf16 %v897_v31, %v891_v30  ;;  %v894_v34 = vld [vmem:[#allocation2 + $0xf0] sm:$0xff]  ;;  %v901_v38 = vld [vmem:[#allocation2 + $0x128] sm:$0xff]  ;;  %s8657_s23 = smov 127   ;;  %s8639_s24 = smov 119  }
  0x7f   : > { %v877_v13 = vld [vmem:[#allocation2 + $0x68] sm:$0xff]  ;;  %5208 = vmatprep.subr.bf16.mxu0 %v5207_v4  ;;  %v876_v21 = vld [vmem:[#allocation2 + $0x60] sm:$0xff]  ;;  %v890_v35 = vld [vmem:[#allocation2 + $0xd0] sm:$0xff]  ;;  %v5217_v37 = vpack.c.bf16 %v894_v34, %v888_v32  ;;  %p4861_p5 = scmp.ne.s32.totalorder %s6110_s25, 7 }
  0x80   : > { %5224 = vmatprep.subr.bf16.mxu1 %v5223_v9  ;;  %5210 = vmatpush1.bf16.msra.mxu0 %v5209_v10  ;;  %v5211_v19 = vpack.c.bf16 %v883_v16, %v877_v13  ;;  %v5213_v24 = vpack.c.bf16 %v882_v22, %v876_v21  ;;  %v896_v36 = vld [vmem:[#allocation2 + $0x100] sm:$0xff]  ;;  %v907_v39 = vld [vmem:[#allocation2 + $0x158] sm:$0xff]  ;;  %v909_v43 = vld [vmem:[#allocation2 + $0x168] sm:$0xff] }
  0x81   : > { %5226 = vmatpush1.bf16.msra.mxu1 %v5225_v15  ;;  %v903_v40 = vld [vmem:[#allocation2 + $0x138] sm:$0xff]  ;;  %v5233_v41 = vpack.c.bf16 %v896_v36, %v890_v35  ;;  %v5219_v42 = vpack.c.bf16 %v907_v39, %v901_v38  ;;  %v900_v44 = vld [vmem:[#allocation2 + $0x120] sm:$0xff]  ;;  %v906_v45 = vld [vmem:[#allocation2 + $0x150] sm:$0xff] }
  0x82   : > { %5212 = vmatprep.subr.bf16.mxu0 %v5211_v19  ;;  %5228 = vmatprep.subr.bf16.mxu1 %v5227_v20  ;;  %v5235_v46 = vpack.c.bf16 %v909_v43, %v903_v40  ;;  %v902_v47 = vld [vmem:[#allocation2 + $0x130] sm:$0xff]  ;;  %v908_v48 = vld [vmem:[#allocation2 + $0x160] sm:$0xff]  ;;  %v5221_v49 = vpack.c.bf16 %v906_v45, %v900_v44  ;;  %v913_v51 = vld [vmem:[#allocation2 + $0x188] sm:$0xff] }
  0x83   : > { %v5237_v50 = vpack.c.bf16 %v908_v48, %v902_v47  ;;  %v915_v52 = vld [vmem:[#allocation2 + $0x198] sm:$0xff]  ;;  %v869_v53 = vld [vmem:[#allocation2 + $0x28] sm:$0xff]  ;;  %v912_v55 = vld [vmem:[#allocation2 + $0x180] sm:$0xff] }
  0x84   : > { %5214 = vmatpush1.bf16.msra.mxu0 %v5213_v24  ;;  %v875_v54 = vld [vmem:[#allocation2 + $0x58] sm:$0xff]  ;;  %v846_v56 = vld [vmem:[%s6119_s0 + $0x8] sm:$0xff]  ;;  %v868_v58 = vld [vmem:[#allocation2 + $0x20] sm:$0xff] }
  0x85   : > { %5230 = vmatpush1.bf16.msra.mxu1 %v5229_v28  ;;  %5216 = vmatprep.subr.bf16.mxu0 %v5215_v29  ;;  %v852_v57 = vld [vmem:[%s6119_s0 + $0x38] sm:$0xff]  ;;  %v874_v59 = vld [vmem:[#allocation2 + $0x50] sm:$0xff]  ;;  %v845_v60 = vld [vmem:[%s6119_s0] sm:$0xff]  ;;  %v5239_v61 = vpack.c.bf16 %v875_v54, %v869_v53 }
  0x86   : > { %5232 = vmatprep.subr.bf16.mxu1 %v5231_v33  ;;  %v851_v62 = vld [vmem:[%s6119_s0 + $0x30] sm:$0xff]  ;;  %v881_v63 = vld [vmem:[#allocation2 + $0x88] sm:$0xff]  ;;  %v887_v0 = vld [vmem:[#allocation2 + $0xb8] sm:$0xff]  ;;  %v5255_v2 = vpack.c.bf16 %v852_v57, %v846_v56  ;;  %v5241_v4 = vpack.c.bf16 %v874_v59, %v868_v58 }
  0x87   : > { %v914_v1 = vld [vmem:[#allocation2 + $0x190] sm:$0xff]  ;;  %v6329_v3 = vld [vmem:[%s8652_s5] sm:$0xff]  ;;  %v5257_v5 = vpack.c.bf16 %v851_v62, %v845_v60  ;;  %v5243_v6 = vpack.c.bf16 %v887_v0, %v881_v63  ;;  %v893_v10 = vld [vmem:[#allocation2 + $0xe8] sm:$0xff]  ;;  %s8623_s5 = smov 109  }
  0x88   : > { %5218 = vmatpush1.bf16.msra.mxu0 %v5217_v37  ;;  %v880_v7 = vld [vmem:[#allocation2 + $0x80] sm:$0xff]  ;;  %v886_v9 = vld [vmem:[#allocation2 + $0xb0] sm:$0xff]  ;;  %v899_v11 = vld [vmem:[#allocation2 + $0x118] sm:$0xff] }
  0x89   : > { %5234 = vmatpush1.bf16.msra.mxu1 %v5233_v41  ;;  %5220 = vmatprep.subr.bf16.mxu0 %v5219_v42  ;;  %v858_v12 = vld [vmem:[%s6119_s0 + $0x68] sm:$0x3]  ;;  %v848_v13 = vld [vmem:[%s6119_s0 + $0x18] sm:$0xff]  ;;  %v5245_v15 = vpack.c.bf16 %v886_v9, %v880_v7  ;;  %v847_v16 = vld [vmem:[%s6119_s0 + $0x10] sm:$0xff]  ;;  %v5247_v18 = vpack.c.bf16 %v899_v11, %v893_v10 }
  0x8a   : > { %5236 = vmatprep.subr.bf16.mxu1 %v5235_v46  ;;  %v854_v14 = vld [vmem:[%s6119_s0 + $0x48] sm:$0xff]  ;;  %v853_v17 = vld [vmem:[%s6119_s0 + $0x40] sm:$0xff]  ;;  %v898_v20 = vld [vmem:[#allocation2 + $0x110] sm:$0xff] }
  0x8b   : > { %v892_v19 = vld [vmem:[#allocation2 + $0xe0] sm:$0xff]  ;;  %v5259_v23 = vpack.c.bf16 %v854_v14, %v848_v13  ;;  %v905_v24 = vld [vmem:[#allocation2 + $0x148] sm:$0xff]  ;;  %v911_v25 = vld [vmem:[#allocation2 + $0x178] sm:$0xff]  ;;  %v5261_v27 = vpack.c.bf16 %v853_v17, %v847_v16 }
  0x8c   : > { %5222 = vmatpush1.bf16.msra.mxu0 %v5221_v49  ;;  %v1371_v21 = vld [vmem:[%s8653_s1] sm:$0xff]  ;;  %v5249_v28 = vpack.c.bf16 %v898_v20, %v892_v19  ;;  %v860_v29 = vld [vmem:[%s6119_s0 + $0x78] sm:$0x3]  ;;  %v5251_v30 = vpack.c.bf16 %v911_v25, %v905_v24  ;;  %v910_v32 = vld [vmem:[#allocation2 + $0x170] sm:$0xff]  ;;  %s8656_s1 = sld [smem:[#allocation10_spill]] }
  0x8d   : > { %5238 = vmatpush1.bf16.msra.mxu1 %v5237_v50  ;;  %938 = vmatprep.subr.mxu0 %v913_v51  ;;  %v857_v22 = vld [vmem:[%s6119_s0 + $0x60] sm:$0x3]  ;;  %v859_v33 = vld [vmem:[%s6119_s0 + $0x70] sm:$0x3]  ;;  %v917_v35 = vld [vmem:[#allocation2 + $0x1a8] sm:$0xff] }
  0x8e   : > { %1009 = vmatprep.subr.mxu1 %v915_v52  ;;  %v844_v26 = vld [vmem:[%s8654_s27] sm:$0xff]  ;;  %1374 = vperm.xlu0 %5828, %v1371_v21   ;;  %v850_v36 = vld [vmem:[%s6119_s0 + $0x28] sm:$0xff]  ;;  %v856_v37 = vld [vmem:[%s6119_s0 + $0x58] sm:$0xff]  ;;  %s8633_s27 = smov 19  }
  0x8f   : > { %v904_v31 = vld [vmem:[#allocation2 + $0x140] sm:$0xff]  ;;  %v855_v39 = vld [vmem:[%s6119_s0 + $0x50] sm:$0xff]  ;;  %v5263_v41 = vpack.c.bf16 %v856_v37, %v850_v36  ;;  %v862_v43 = vld [vmem:[%s6119_s0 + $0x88] sm:$0x3] }
  0x90   : > { %939 = vmatpush1.msra.mxu0 %v912_v55  ;;  %v5253_v34 = vpack.c.bf16 %v910_v32, %v904_v31  ;;  %v849_v38 = vld [vmem:[%s6119_s0 + $0x20] sm:$0xff]  ;;  %v1696_v45 = vld [vmem:[#allocation3 + $0x8] sm:$0xff]  ;;  %v1702_v46 = vld [vmem:[#allocation3 + $0x38] sm:$0xff] }
  0x91   : > { %1010 = vmatpush1.msra.mxu1 %v914_v1  ;;  %5240 = vmatprep.subr.bf16.mxu0 %v5239_v61  ;;  %v916_v40 = vld [vmem:[#allocation2 + $0x1a0] sm:$0xff]  ;;  %v5265_v42 = vpack.c.bf16 %v855_v39, %v849_v38  ;;  %v5267_v47 = vpack.c.bf16 %v1702_v46, %v1696_v45  ;;  %v1695_v48 = vld [vmem:[#allocation3] sm:$0xff]  ;;  %v1708_v51 = vld [vmem:[#allocation3 + $0x68] sm:$0xff] }
  0x92   : > { %5256 = vmatprep.subr.bf16.mxu1 %v5255_v2  ;;  %4833 = vmatmul.mubr.msk.f32.vlgmr.msra.gmra.mrb[0].mxu0 %vm918_vm0, %v6329_v3  ;;  %v861_v44 = vld [vmem:[%s6119_s0 + $0x80] sm:$0x3]  ;;  %v1714_v52 = vld [vmem:[#allocation3 + $0x98] sm:$0xff]  ;;  %v1707_v54 = vld [vmem:[#allocation3 + $0x60] sm:$0xff]  ;;  %s8635_s0 = smov 127  }
  0x93   : > { %4834 = vmatmul.mubr.msk.f32.vlgmr.msra.gmra.mrb[0].mxu1 %vm918_vm0, %v6329_v3  ;;  %5242 = vmatpush1.bf16.msra.mxu0 %v5241_v4  ;;  %v1701_v49 = vld [vmem:[#allocation3 + $0x30] sm:$0xff]  ;;  %v5271_v53 = vpack.c.bf16 %v1714_v52, %v1708_v51  ;;  %v1720_v57 = vld [vmem:[#allocation3 + $0xc8] sm:$0xff]  ;;  %v1726_v58 = vld [vmem:[#allocation3 + $0xf8] sm:$0xff] }
  0x94   : > { %5258 = vmatpush1.bf16.msra.mxu1 %v5257_v5  ;;  %5244 = vmatprep.subr.bf16.mxu0 %v5243_v6  ;;  %v5269_v50 = vpack.c.bf16 %v1701_v49, %v1695_v48  ;;  %v1713_v55 = vld [vmem:[#allocation3 + $0x90] sm:$0xff]  ;;  %v5275_v59 = vpack.c.bf16 %v1726_v58, %v1720_v57  ;;  %v1719_v60 = vld [vmem:[#allocation3 + $0xc0] sm:$0xff]  ;;  %v1732_v63 = vld [vmem:[#allocation3 + $0x128] sm:$0xff] }
  0x95   : > { %4836 = vmatprep.subr.msk.mxu1 %vm1139_vm1, %v858_v12  ;;  %1222 = vmatprep.mubr.f32.mxu1 %v5977_v8  ;;  %v5273_v56 = vpack.c.bf16 %v1713_v55, %v1707_v54  ;;  %v1725_v61 = vld [vmem:[#allocation3 + $0xf0] sm:$0xff]  ;;  %v1738_v0 = vld [vmem:[#allocation3 + $0x158] sm:$0xff]  ;;  %v1731_v2 = vld [vmem:[#allocation3 + $0x120] sm:$0xff] }
  0x96   : > { %1128 = vmatprep.mubr.f32.mxu0 %v5977_v8  ;;  %v5277_v62 = vpack.c.bf16 %v1725_v61, %v1719_v60  ;;  %v5279_v1 = vpack.c.bf16 %v1738_v0, %v1732_v63  ;;  %v1744_v5 = vld [vmem:[#allocation3 + $0x188] sm:$0xff]  ;;  %v1750_v6 = vld [vmem:[#allocation3 + $0x1b8] sm:$0xff]  ;;  %v1743_v9 = vld [vmem:[#allocation3 + $0x180] sm:$0xff] }
  0x97   : > { %5246 = vmatpush1.bf16.msra.mxu0 %v5245_v15  ;;  %v5283_v7 = vpack.c.bf16 %v1750_v6, %v1744_v5  ;;  %v1749_v10 = vld [vmem:[#allocation3 + $0x1b0] sm:$0xff]  ;;  %v1756_v12 = vld [vmem:[#allocation3 + $0x1e8] sm:$0xff]  ;;  %v1762_v13 = vld [vmem:[#allocation3 + $0x218] sm:$0xff] }
  0x98   : > { %4837 = vmatpush1.msk.msra.mxu1 %vm1139_vm1, %v857_v22  ;;  %5248 = vmatprep.subr.bf16.mxu0 %v5247_v18  ;;  %v5285_v11 = vpack.c.bf16 %v1749_v10, %v1743_v9  ;;  %v5287_v14 = vpack.c.bf16 %v1762_v13, %v1756_v12  ;;  %v1755_v15 = vld [vmem:[#allocation3 + $0x1e0] sm:$0xff]  ;;  %v1761_v16 = vld [vmem:[#allocation3 + $0x210] sm:$0xff]  ;;  %v1768_v18 = vld [vmem:[#allocation3 + $0x248] sm:$0xff] }
  0x99   : > { %4838 = vmatmul.mubr.msk.f32.vlgmr.msra.gmra.mrb[2].mxu1 %vm1135_vm2, %v844_v26  ;;  %5260 = vmatprep.subr.bf16.mxu1 %v5259_v23  ;;  %v5289_v17 = vpack.c.bf16 %v1761_v16, %v1755_v15  ;;  %v1774_v19 = vld [vmem:[#allocation3 + $0x278] sm:$0xff]  ;;  %v1767_v21 = vld [vmem:[#allocation3 + $0x240] sm:$0xff]  ;;  %v1773_v22 = vld [vmem:[#allocation3 + $0x270] sm:$0xff] }
  0x9a   : > { %5262 = vmatpush1.bf16.msra.mxu1 %v5261_v27  ;;  %1293 = vmatprep.mubr.f32.mxu1 %v5977_v8  ;;  %v5291_v20 = vpack.c.bf16 %v1774_v19, %v1768_v18  ;;  %v5293_v23 = vpack.c.bf16 %v1773_v22, %v1767_v21  ;;  %v1780_v24 = vld [vmem:[#allocation3 + $0x2a8] sm:$0xff]  ;;  %v1786_v25 = vld [vmem:[#allocation3 + $0x2d8] sm:$0xff]  ;;  %v1779_v27 = vld [vmem:[#allocation3 + $0x2a0] sm:$0xff] }
  0x9b   : > { %5250 = vmatpush1.bf16.msra.mxu0 %v5249_v28  ;;  %4839 = vmatprep.subr.msk.mxu1 %vm1139_vm1, %v860_v29  ;;  %v1785_v28 = vld [vmem:[#allocation3 + $0x2d0] sm:$0xff]  ;;  %v1798_v31 = vld [vmem:[#allocation3 + $0x338] sm:$0xff]  ;;  %v1704_v37 = vld [vmem:[#allocation3 + $0x48] sm:$0xff] }
  0x9c   : > { %5252 = vmatprep.subr.bf16.mxu0 %v5251_v30  ;;  %v5297_v29 = vpack.c.bf16 %v1785_v28, %v1779_v27  ;;  %v1792_v30 = vld [vmem:[#allocation3 + $0x308] sm:$0xff]  ;;  %v1698_v36 = vld [vmem:[#allocation3 + $0x18] sm:$0xff]  ;;  %v1697_v39 = vld [vmem:[#allocation3 + $0x10] sm:$0xff] }
  0x9d   : > { %v5299_v32 = vpack.c.bf16 %v1798_v31, %v1792_v30  ;;  %v5303_v38 = vpack.c.bf16 %v1704_v37, %v1698_v36  ;;  %v1716_v45 = vld [vmem:[#allocation3 + $0xa8] sm:$0xff]  ;;  %v1715_v48 = vld [vmem:[#allocation3 + $0xa0] sm:$0xff] }
  0x9e   : > { %4840 = vmatpush1.msk.msra.mxu1 %vm1139_vm1, %v859_v33  ;;  %v1791_v33 = vld [vmem:[#allocation3 + $0x300] sm:$0xff]  ;;  %v1728_v51 = vld [vmem:[#allocation3 + $0x108] sm:$0xff] }
  0x9f   : > { %4841 = vmatmul.mubr.msk.f32.vlgmr.msra.gmra.mrb[0].mxu1 %vm1135_vm2, %v844_v26  ;;  %5254 = vmatpush1.bf16.msra.mxu0 %v5253_v34  ;;  %v1797_v34 = vld [vmem:[#allocation3 + $0x330] sm:$0xff]  ;;  %v1727_v54 = vld [vmem:[#allocation3 + $0x100] sm:$0xff]  ;;  %v1740_v57 = vld [vmem:[#allocation3 + $0x168] sm:$0xff] }
  0xa0   : > { %1080 = vmatprep.subr.mxu0 %v917_v35  ;;  %5268 = vmatprep.subr.bf16.mxu1 %v5267_v47  ;;  %v5301_v35 = vpack.c.bf16 %v1797_v34, %v1791_v33  ;;  %v1709_v47 = vld [vmem:[#allocation3 + $0x70] sm:$0xff]  ;;  %v1739_v60 = vld [vmem:[#allocation3 + $0x160] sm:$0xff]  ;;  %v1752_v63 = vld [vmem:[#allocation3 + $0x1c8] sm:$0xff] }
  0xa1   : > { %5270 = vmatpush1.bf16.msra.mxu1 %v5269_v50  ;;  %v5309_v49 = vpack.c.bf16 %v1715_v48, %v1709_v47  ;;  %v1722_v50 = vld [vmem:[#allocation3 + $0xd8] sm:$0xff]  ;;  %v1764_v5 = vld [vmem:[#allocation3 + $0x228] sm:$0xff]  ;;  %v1763_v9 = vld [vmem:[#allocation3 + $0x220] sm:$0xff] }
  0xa2   : > { %5272 = vmatprep.subr.bf16.mxu1 %v5271_v53  ;;  %v5311_v52 = vpack.c.bf16 %v1728_v51, %v1722_v50  ;;  %v1721_v53 = vld [vmem:[#allocation3 + $0xd0] sm:$0xff]  ;;  %v1776_v12 = vld [vmem:[#allocation3 + $0x288] sm:$0xff]  ;;  %v1775_v15 = vld [vmem:[#allocation3 + $0x280] sm:$0xff] }
  0xa3   : > { %1081 = vmatpush1.msra.mxu0 %v916_v40  ;;  %v1703_v40 = vld [vmem:[#allocation3 + $0x40] sm:$0xff]  ;;  %v5313_v55 = vpack.c.bf16 %v1727_v54, %v1721_v53  ;;  %v1788_v18 = vld [vmem:[#allocation3 + $0x2e8] sm:$0xff]  ;;  %v1730_v48 = vld [vmem:[#allocation3 + $0x118] sm:$0xff] }
  0xa4   : > { %4835 = vmatmul.mubr.msk.f32.vlgmr.msra.gmra.mrb[2].mxu0 %vm918_vm0, %v6329_v3  ;;  %5264 = vmatprep.subr.bf16.mxu0 %v5263_v41  ;;  %v1737_v3 = vld [vmem:[#allocation3 + $0x150] sm:$0xff]  ;;  %v6374_v41 = vld [vmem:[%s8655_s29 + $0x8] sm:$0xff]  ;;  %v1787_v21 = vld [vmem:[#allocation3 + $0x2e0] sm:$0xff] }
  0xa5   : > { %5266 = vmatpush1.bf16.msra.mxu0 %v5265_v42  ;;  %1364 = vmatprep.mubr.f32.mxu0 %v5977_v8  ;;  %v5281_v4 = vpack.c.bf16 %v1737_v3, %v1731_v2  ;;  %v5305_v42 = vpack.c.bf16 %v1703_v40, %v1697_v39  ;;  %v1751_v2 = vld [vmem:[#allocation3 + $0x1c0] sm:$0xff]  ;;  %v6387_v28 = vld [vmem:[%s8655_s29 + $0x18] sm:$0xff]  ;;  %v1729_v51 = vld [vmem:[#allocation3 + $0x110] sm:$0xff] }
  0xa6   : > { %4842 = vmatprep.subr.msk.mxu0 %vm1139_vm1, %v862_v43  ;;  %5274 = vmatpush1.bf16.msra.mxu1 %v5273_v56  ;;  %v6381_v43 = vld [vmem:[%s8655_s29] sm:$0xff]  ;;  %v1734_v56 = vld [vmem:[#allocation3 + $0x138] sm:$0xff]  ;;  %v1799_v27 = vld [vmem:[#allocation3 + $0x340] sm:$0xff] }
  0xa7   : > { %5276 = vmatprep.subr.bf16.mxu1 %v5275_v59  ;;  %4845 = vmatprep.mubr.msk.f32.mxu1 %vm1803_vm3, %v6374_v41  ;;  %v5315_v58 = vpack.c.bf16 %v1740_v57, %v1734_v56  ;;  %v1733_v59 = vld [vmem:[#allocation3 + $0x130] sm:$0xff]  ;;  %v6394_v30 = vld [vmem:[%s8655_s29 + $0x10] sm:$0xff]  ;;  %v1700_v31 = vld [vmem:[#allocation3 + $0x28] sm:$0xff]  ;;  %v1391_v57 = vlaneseq }
  0xa8   : > { %v5317_v61 = vpack.c.bf16 %v1739_v60, %v1733_v59  ;;  %v1699_v34 = vld [vmem:[#allocation3 + $0x20] sm:$0xff]  ;;  %v1712_v36 = vld [vmem:[#allocation3 + $0x88] sm:$0xff]  ;;  %v1742_v54 = vld [vmem:[#allocation3 + $0x178] sm:$0xff] }
  0xa9   : > { %4843 = vmatpush1.msk.msra.mxu0 %vm1139_vm1, %v861_v44  ;;  %v1710_v44 = vld [vmem:[#allocation3 + $0x78] sm:$0xff]  ;;  %v1711_v40 = vld [vmem:[#allocation3 + $0x80] sm:$0xff]  ;;  %v1724_v47 = vld [vmem:[#allocation3 + $0xe8] sm:$0xff] }
  0xaa   : > { %5278 = vmatpush1.bf16.msra.mxu1 %v5277_v62  ;;  %v5307_v46 = vpack.c.bf16 %v1716_v45, %v1710_v44  ;;  %v1746_v62 = vld [vmem:[#allocation3 + $0x198] sm:$0xff]  ;;  %v1723_v50 = vld [vmem:[#allocation3 + $0xe0] sm:$0xff]  ;;  %v1736_v53 = vld [vmem:[#allocation3 + $0x148] sm:$0xff] }
  0xab   : > { %5280 = vmatprep.subr.bf16.mxu1 %v5279_v1  ;;  %v5319_v0 = vpack.c.bf16 %v1752_v63, %v1746_v62  ;;  %v1745_v1 = vld [vmem:[#allocation3 + $0x190] sm:$0xff]  ;;  %v1735_v59 = vld [vmem:[#allocation3 + $0x140] sm:$0xff] }
  0xac   : > { %4844 = vmatmul.mubr.msk.f32.vlgmr.msra.gmra.mrb[2].mxu0 %vm1135_vm2, %v844_v26  ;;  %v5295_v26 = vpack.c.bf16 %v1786_v25, %v1780_v24  ;;  %v5321_v3 = vpack.c.bf16 %v1751_v2, %v1745_v1  ;;  %v1800_v24 = vld [vmem:[#allocation3 + $0x348] sm:$0xff]  ;;  %v1741_v60 = vld [vmem:[#allocation3 + $0x170] sm:$0xff]  ;;  %v1754_v2 = vld [vmem:[#allocation3 + $0x1d8] sm:$0xff]  ;;  %vm4261_vm2 = vcmask (!%p4861_p5), 261120  }
  0xad   : > { %2188 = vmatprep.mubr.f32.mxu0 %v5977_v8  ;;  %v5353_v63 = vpack.c.bf16 %v1741_v60, %v1735_v59  ;;  %v1795_v60 = vld [vmem:[#allocation3 + $0x320] sm:$0xff] }
  0xae   : > { %5282 = vmatpush1.bf16.msra.mxu1 %v5281_v4  ;;  %v1758_v4 = vld [vmem:[#allocation3 + $0x1f8] sm:$0xff] }
  0xaf   : > { %5284 = vmatprep.subr.bf16.mxu1 %v5283_v7  ;;  %v5323_v6 = vpack.c.bf16 %v1764_v5, %v1758_v4  ;;  %v1757_v7 = vld [vmem:[#allocation3 + $0x1f0] sm:$0xff]  ;;  %v6410_v4 = vshrl.u32 %v1391_v57, 7 }
  0xb0   : > { %v5325_v10 = vpack.c.bf16 %v1763_v9, %v1757_v7  ;;  %v1753_v7 = vld [vmem:[#allocation3 + $0x1d0] sm:$0xff] }
  0xb2   : > { %5286 = vmatpush1.bf16.msra.mxu1 %v5285_v11  ;;  %v1770_v11 = vld [vmem:[#allocation3 + $0x258] sm:$0xff] }
  0xb3   : > { %5288 = vmatprep.subr.bf16.mxu1 %v5287_v14  ;;  %v5327_v13 = vpack.c.bf16 %v1776_v12, %v1770_v11  ;;  %v1769_v14 = vld [vmem:[#allocation3 + $0x250] sm:$0xff] }
  0xb4   : > { %v5329_v16 = vpack.c.bf16 %v1775_v15, %v1769_v14  ;;  %v1766_v14 = vld [vmem:[#allocation3 + $0x238] sm:$0xff]  ;;  %v6414_v15 = vsub.s32 0, %v6410_v4 }
  0xb6   : > { %5290 = vmatpush1.bf16.msra.mxu1 %v5289_v17  ;;  %v1782_v17 = vld [vmem:[#allocation3 + $0x2b8] sm:$0xff] }
  0xb7   : > { %5292 = vmatprep.subr.bf16.mxu1 %v5291_v20  ;;  %v5331_v19 = vpack.c.bf16 %v1788_v18, %v1782_v17  ;;  %v1781_v20 = vld [vmem:[#allocation3 + $0x2b0] sm:$0xff]  ;;  %v1759_v18 = vld [vmem:[#allocation3 + $0x200] sm:$0xff] }
  0xb8   : > { %v5333_v22 = vpack.c.bf16 %v1787_v21, %v1781_v20  ;;  %v6420_v20 = vld [vmem:[%s8609_s10] sm:$0x3f]  ;;  %v6423_v21 = vsub.s32 1, %v6410_v4 }
  0xba   : > { %5294 = vmatpush1.bf16.msra.mxu1 %v5293_v23  ;;  %v1794_v23 = vld [vmem:[#allocation3 + $0x318] sm:$0xff] }
  0xbb   : > { %5296 = vmatprep.subr.bf16.mxu1 %v5295_v26  ;;  %v5335_v25 = vpack.c.bf16 %v1800_v24, %v1794_v23  ;;  %v1793_v26 = vld [vmem:[#allocation3 + $0x310] sm:$0xff]  ;;  %v1772_v23 = vld [vmem:[#allocation3 + $0x268] sm:$0xff]  ;;  %v1778_v24 = vld [vmem:[#allocation3 + $0x298] sm:$0xff] }
  0xbe   : > { %5298 = vmatpush1.bf16.msra.mxu1 %v5297_v29  ;;  %v5337_v29 = vpack.c.bf16 %v1799_v27, %v1793_v26  ;;  %v1401_v26 = vsub.s32 2, %v6410_v4  ;;  %v5363_v27 = vpack.c.bf16 %v1778_v24, %v1772_v23 }
  0xbf   : > { %5300 = vmatprep.subr.bf16.mxu1 %v5299_v32  ;;  %v1706_v32 = vld [vmem:[#allocation3 + $0x58] sm:$0xff] }
  0xc0   : > { %v5339_v33 = vpack.c.bf16 %v1706_v32, %v1700_v31  ;;  %v1777_v31 = vld [vmem:[#allocation3 + $0x290] sm:$0xff]  ;;  %v1398_v32 = vrot.slane %v6420_v20, %v6423_v21 }
  0xc2   : > { %5302 = vmatpush1.bf16.msra.mxu1 %v5301_v35  ;;  %v1705_v35 = vld [vmem:[#allocation3 + $0x50] sm:$0xff] }
  0xc3   : > { %5304 = vmatprep.subr.bf16.mxu1 %v5303_v38  ;;  %v5341_v37 = vpack.c.bf16 %v1705_v35, %v1699_v34  ;;  %v1718_v38 = vld [vmem:[#allocation3 + $0xb8] sm:$0xff] }
  0xc4   : > { %v5343_v39 = vpack.c.bf16 %v1718_v38, %v1712_v36  ;;  %v1784_v36 = vld [vmem:[#allocation3 + $0x2c8] sm:$0xff] }
  0xc5   : > { %1875 = vmatmul.mubr.f32.vlgmr.msra.gmra.mrb[4].mxu1 %v6381_v43 }
  0xc6   : > { %5306 = vmatpush1.bf16.msra.mxu1 %v5305_v42  ;;  %4846 = vmatprep.mubr.msk.f32.mxu1 %vm1803_vm3, %v6387_v28  ;;  %v1717_v42 = vld [vmem:[#allocation3 + $0xb0] sm:$0xff] }
  0xc7   : > { %5308 = vmatprep.subr.bf16.mxu1 %v5307_v46  ;;  %v5345_v44 = vpack.c.bf16 %v1717_v42, %v1711_v40 }
  0xc9   : > { %1881 = vmatmul.mubr.f32.gmra.mrb[6].mxu1 %v6394_v30 }
  0xca   : > { %5310 = vmatpush1.bf16.msra.mxu1 %v5309_v49  ;;  %4847 = vmatprep.mubr.msk.f32.mxu1 %vm1803_vm3, %v6374_v41  ;;  %v5347_v49 = vpack.c.bf16 %v1730_v48, %v1724_v47 }
  0xcb   : > { %5312 = vmatprep.subr.bf16.mxu1 %v5311_v52  ;;  %v5349_v52 = vpack.c.bf16 %v1729_v51, %v1723_v50  ;;  %v1796_v51 = vld [vmem:[#allocation3 + $0x328] sm:$0xff] }
  0xce   : > { %5314 = vmatpush1.bf16.msra.mxu1 %v5313_v55 }
  0xcf   : > { %5316 = vmatprep.subr.bf16.mxu1 %v5315_v58  ;;  %v5351_v58 = vpack.c.bf16 %v1742_v54, %v1736_v53 }
  0xd2   : > { %5318 = vmatpush1.bf16.msra.mxu1 %v5317_v61 }
  0xd3   : > { %5320 = vmatprep.subr.bf16.mxu1 %v5319_v0 }
  0xd6   : > { %5322 = vmatpush1.bf16.msra.mxu1 %v5321_v3 }
  0xd7   : > { %5324 = vmatprep.subr.bf16.mxu1 %v5323_v6  ;;  %v1747_v6 = vld [vmem:[#allocation3 + $0x1a0] sm:$0xff] }
  0xd8   : > { %v5357_v9 = vpack.c.bf16 %v1753_v7, %v1747_v6  ;;  %v2278_v6 = vld [vmem:[%s8605_s6] sm:$0xff]  ;;  %v6551_v7 = vand.u32 127, %v1391_v57 }
  0xda   : > { %5326 = vmatpush1.bf16.msra.mxu1 %v5325_v10  ;;  %vm1466_vm4 = vcmp.lt.s32.totalorder %v6551_v7, 18  ;;  %vm1491_vm5 = vcmp.lt.s32.totalorder %v6551_v7, 17  ;;  %vm1516_vm6 = vcmp.lt.s32.totalorder %v6551_v7, 1  ;;  %vm1441_vm7 = vcmp.lt.s32.totalorder %v6551_v7, 19 }
  0xdb   : > { %5328 = vmatprep.subr.bf16.mxu1 %v5327_v13  ;;  %v1760_v13 = vld [vmem:[#allocation3 + $0x208] sm:$0xff]  ;;  %vm1547_vm8 = vcmp.lt.s32.totalorder %v6551_v7, 127  ;;  %vm1572_vm9 = vcmp.lt.s32.totalorder %v6551_v7, 111  ;;  %vm1597_vm10 = vcmp.lt.s32.totalorder %v6551_v7, 110  ;;  %vm1622_vm11 = vcmp.lt.s32.totalorder %v6551_v7, 109 }
  0xdc   : > { %v5359_v17 = vpack.c.bf16 %v1766_v14, %v1760_v13  ;;  %vm3185_vm12 = vcmp.lt.s32.totalorder %v6551_v7, 11  ;;  %vm3202_vm13 = vcmp.lt.s32.totalorder %v6551_v7, 10  ;;  %vm3219_vm14 = vcmp.lt.s32.totalorder %v6551_v7, 9 }
  0xdd   : > { %vm3272_vm15 = vcmp.lt.s32.totalorder %v6551_v7, 119  ;;  %vm3306_vm1 = vcmp.lt.s32.totalorder %v6551_v7, 117 }
  0xde   : > { %5330 = vmatpush1.bf16.msra.mxu1 %v5329_v16 }
  0xdf   : > { %5332 = vmatprep.subr.bf16.mxu1 %v5331_v19  ;;  %v1765_v19 = vld [vmem:[#allocation3 + $0x230] sm:$0xff] }
  0xe2   : > { %5334 = vmatpush1.bf16.msra.mxu1 %v5333_v22  ;;  %v5361_v22 = vpack.c.bf16 %v1765_v19, %v1759_v18 }
  0xe3   : > { %5336 = vmatprep.subr.bf16.mxu1 %v5335_v25  ;;  %v1394_v25 = vrot.slane %v6420_v20, %v6414_v15 }
  0xe6   : > { %5338 = vmatpush1.bf16.msra.mxu1 %v5337_v29  ;;  %v1771_v29 = vld [vmem:[#allocation3 + $0x260] sm:$0xff] }
  0xe7   : > { %5340 = vmatprep.subr.bf16.mxu1 %v5339_v33  ;;  %v1405_v33 = vsub.s32 3, %v6410_v4  ;;  %v5365_v34 = vpack.c.bf16 %v1777_v31, %v1771_v29 }
  0xe9   : > { %1952 = vmatmul.mubr.f32.vlgmr.msra.gmra.mrb[8].mxu1 %v6381_v43  ;;  %v1406_v47 = vrot.slane %v6420_v20, %v1405_v33 }
  0xea   : > { %5342 = vmatpush1.bf16.msra.mxu1 %v5341_v37  ;;  %4848 = vmatprep.mubr.msk.f32.mxu1 %vm1803_vm3, %v6387_v28  ;;  %v1790_v37 = vld [vmem:[#allocation3 + $0x2f8] sm:$0xff] }
  0xeb   : > { %5344 = vmatprep.subr.bf16.mxu1 %v5343_v39  ;;  %v1402_v39 = vrot.slane %v6420_v20, %v1401_v26  ;;  %v5367_v42 = vpack.c.bf16 %v1790_v37, %v1784_v36 }
  0xed   : > { %1958 = vmatmul.mubr.f32.gmra.mrb[10].mxu1 %v6394_v30 }
  0xee   : > { %5346 = vmatpush1.bf16.msra.mxu1 %v5345_v44  ;;  %4849 = vmatprep.mubr.msk.f32.mxu1 %vm1803_vm3, %v6374_v41  ;;  %v1748_v41 = vld [vmem:[#allocation3 + $0x1a8] sm:$0xff]  ;;  %v1783_v44 = vld [vmem:[#allocation3 + $0x2c0] sm:$0xff] }
  0xef   : > { %5348 = vmatprep.subr.bf16.mxu1 %v5347_v49  ;;  %v5355_v5 = vpack.c.bf16 %v1754_v2, %v1748_v41 }
  0xf2   : > { %5350 = vmatpush1.bf16.msra.mxu1 %v5349_v52  ;;  %v1802_v52 = vld [vmem:[#allocation3 + $0x358] sm:$0xff] }
  0xf3   : > { %5352 = vmatprep.subr.bf16.mxu1 %v5351_v58  ;;  %v5371_v59 = vpack.c.bf16 %v1802_v52, %v1796_v51 }
  0xf6   : > { %5354 = vmatpush1.bf16.msra.mxu1 %v5353_v63 }
  0xf7   : > { %5356 = vmatprep.subr.bf16.mxu1 %v5355_v5 }
  0xfa   : > { %5358 = vmatpush1.bf16.msra.mxu1 %v5357_v9 }
  0xfb   : > { %5360 = vmatprep.subr.bf16.mxu1 %v5359_v17 }
  0xfe   : > { %5362 = vmatpush1.bf16.msra.mxu1 %v5361_v22 }
  0xff   : > { %5364 = vmatprep.subr.bf16.mxu1 %v5363_v27 }
 0x102   : > { %5366 = vmatpush1.bf16.msra.mxu1 %v5365_v34 }
 0x103   : > { %5368 = vmatprep.subr.bf16.mxu1 %v5367_v42 }
 0x10d   : > { %v6405_v56 = vpop.permute.xlu0 %1374 }
 0x165   : > { %v988_v45 = vpop.f32.mrb[0].mxu0 }
 0x166   : > { %v990_v46 = vpop.f32.mrb[1].mxu0 }
 0x16c   : > { %v1224_v55 = vpop.f32.mrb[2].mxu1 }
 0x16d   : > { %v1225_v61 = vadd.f32 %v1224_v55, %v988_v45  ;;  %v1226_v62 = vpop.f32.mrb[3].mxu1  ;;  %v1789_v45 = vld [vmem:[#allocation3 + $0x2f0] sm:$0xff] }
 0x16e   : > { %v1227_v0 = vadd.f32 %v1226_v62, %v990_v46  ;;  %v5369_v48 = vpack.c.bf16 %v1789_v45, %v1783_v44 }
 0x16f   : > { %v1377_v1 = vadd.f32 %v6405_v56, %v1225_v61  ;;  %v1801_v61 = vld [vmem:[#allocation3 + $0x350] sm:$0xff] }
 0x170   : > { %v1378_v3 = vadd.f32 %v6405_v56, %v1227_v0  ;;  %5370 = vmatpush1.bf16.msra.mxu1 %v5369_v48  ;;  %v5373_v0 = vpack.c.bf16 %v1801_v61, %v1795_v60 }
 0x171   : > { %5910 = vtanh.f32 %v1377_v1  ;;  %5372 = vmatprep.subr.bf16.mxu1 %v5371_v59  ;;  %v1409_v1 = vsub.s32 4, %v6410_v4 }
 0x172   : > { %5912 = vtanh.f32 %v1378_v3  ;;  %v1295_v10 = vpop.f32.mrb[0].mxu1 }
 0x173   : > { %v1379_v11 = vadd.f32 %v6405_v56, %v1295_v10  ;;  %v1297_v12 = vpop.f32.mrb[1].mxu1  ;;  %v1410_v41 = vrot.slane %v6420_v20, %v1409_v1 }
 0x174   : > { %v1380_v16 = vadd.f32 %v6405_v56, %v1297_v12  ;;  %5374 = vmatpush1.bf16.msra.mxu1 %v5373_v0 }
 0x175   : > { %5914 = vtanh.f32 %v1379_v11 }
 0x176   : > { %5916 = vtanh.f32 %v1380_v16 }
 0x177   : > { %2029 = vmatmul.mubr.f32.vlgmr.msra.gmra.mrb[12].mxu1 %v6381_v43 }
 0x178   : > { %4850 = vmatprep.mubr.msk.f32.mxu1 %vm1803_vm3, %v6387_v28 }
 0x17b   : > { %v5911_v35 = vpop.eup %5910  ;;  %2035 = vmatmul.mubr.f32.gmra.mrb[14].mxu1 %v6394_v30  ;;  %v2279_v30 = vld [vmem:[%s8605_s6 + $0x8] sm:$0xff] }
 0x17c   : > { %v5913_v38 = vpop.eup %5912  ;;  %v6434_v40 = vmul.f32 %v5911_v35, %v1394_v25  ;;  %2111 = vmatprep.mubr.f32.mxu1 %v5977_v8 }
 0x17d   : > { %v6436_v46 = vmul.f32 %v5913_v38, %v1398_v32 }
 0x17e   : > { %1529 = vst [vmem:[#allocation2 + $0xc0] sm:$0xff] %v6434_v40  ;;  %1454 = vrot.lane.b32.xlu1 %v6434_v40, %s8631_s26  ;;  %1427 = vrot.lane.b32.xlu0 %v6434_v40, %s8633_s27 }
 0x17f   : > { %v5915_v49 = vpop.eup %5914  ;;  %1530 = vst [vmem:[#allocation2 + $0xc8] sm:$0xff] %v6436_v46  ;;  %v1366_v50 = vpop.f32.mrb[2].mxu0 }
 0x180   : > { %v5917_v53 = vpop.eup %5916  ;;  %v6447_v54 = vmul.f32 %v5915_v49, %v1402_v39  ;;  %v1381_v55 = vadd.f32 %v6405_v56, %v1366_v50  ;;  %v1368_v58 = vpop.f32.mrb[3].mxu0 }
 0x181   : > { %v6450_v62 = vmul.f32 %v5917_v53, %v1406_v47  ;;  %v1382_v63 = vadd.f32 %v6405_v56, %v1368_v58  ;;  %v1413_v56 = vsub.s32 5, %v6410_v4  ;;  %v2877_v4 = vld [vmem:[%s8611_s12 + $0x3d8] sm:$0xff] }
 0x182   : > { %1531 = vst [vmem:[#allocation2 + $0xd0] sm:$0xff] %v6447_v54  ;;  %5918 = vtanh.f32 %v1381_v55  ;;  %1479 = vrot.lane.b32.xlu1 %v6434_v40, %s8629_s3  ;;  %1456 = vrot.lane.b32.xlu0 %v6436_v46, %s8631_s26 }
 0x183   : > { %1532 = vst [vmem:[#allocation2 + $0xd8] sm:$0xff] %v6450_v62  ;;  %5920 = vtanh.f32 %v1382_v63  ;;  %v1414_v2 = vrot.slane %v6420_v20, %v1413_v56 }
 0x186   : > { %1504 = vrot.lane.b32.xlu1 %v6434_v40, %s5982_s28  ;;  %1481 = vrot.lane.b32.xlu0 %v6436_v46, %s8629_s3 }
 0x18a   : > { %1535 = vrot.lane.b32.xlu1 %v6434_v40, %s8635_s0  ;;  %1506 = vrot.lane.b32.xlu0 %v6436_v46, %s5982_s28 }
 0x18c   : > { %v5919_v43 = vpop.eup %5918 }
 0x18d   : > { %v5921_v28 = vpop.eup %5920  ;;  %v1425_v3 = vmul.f32 %v5919_v43, %v1410_v41 }
 0x18e   : > { %v1426_v5 = vmul.f32 %v5921_v28, %v1414_v2  ;;  %1429 = vrot.lane.b32.xlu1 %v6436_v46, %s8633_s27  ;;  %1562 = vrot.lane.b32.xlu0 %v6436_v46, %s8627_s4  ;;  %v6646_v28 = vld [vmem:[%s8656_s1] sm:$0xff] }
 0x18f   : > { %1533 = vst [vmem:[#allocation2 + $0xe0] sm:$0xff] %v1425_v3 }
 0x190   : > { %1534 = vst [vmem:[#allocation2 + $0xe8] sm:$0xff] %v1426_v5 }
 0x192   : > { %1537 = vrot.lane.b32.xlu1 %v6436_v46, %s8635_s0  ;;  %1539 = vrot.lane.b32.xlu0 %v6447_v54, %s8635_s0 }
 0x196   : > { %1564 = vrot.lane.b32.xlu1 %v6447_v54, %s8627_s4  ;;  %1464 = vrot.lane.b32.xlu0 %v1426_v5, %s8631_s26 }
 0x19a   : > { %1437 = vrot.lane.b32.xlu1 %v1426_v5, %s8633_s27  ;;  %1514 = vrot.lane.b32.xlu0 %v1426_v5, %s5982_s28 }
 0x19e   : > { %1489 = vrot.lane.b32.xlu1 %v1426_v5, %s8629_s3  ;;  %1587 = vrot.lane.b32.xlu0 %v6436_v46, %s8625_s30 }
 0x1a2   : > { %1589 = vrot.lane.b32.xlu1 %v6447_v54, %s8625_s30  ;;  %1560 = vrot.lane.b32.xlu0 %v6434_v40, %s8627_s4 }
 0x1a6   : > { %1585 = vrot.lane.b32.xlu1 %v6434_v40, %s8625_s30  ;;  %1612 = vrot.lane.b32.xlu0 %v6436_v46, %s8623_s5 }
 0x1aa   : > { %1614 = vrot.lane.b32.xlu1 %v6447_v54, %s8623_s5  ;;  %1610 = vrot.lane.b32.xlu0 %v6434_v40, %s8623_s5 }
 0x1ae   : > { %1431 = vrot.lane.b32.xlu1 %v6447_v54, %s8633_s27  ;;  %1433 = vrot.lane.b32.xlu0 %v6450_v62, %s8633_s27 }
 0x1b2   : > { %1458 = vrot.lane.b32.xlu1 %v6447_v54, %s8631_s26  ;;  %1460 = vrot.lane.b32.xlu0 %v6450_v62, %s8631_s26 }
 0x1b6   : > { %1483 = vrot.lane.b32.xlu1 %v6447_v54, %s8629_s3  ;;  %1485 = vrot.lane.b32.xlu0 %v6450_v62, %s8629_s3 }
 0x1ba   : > { %1508 = vrot.lane.b32.xlu1 %v6447_v54, %s5982_s28  ;;  %1510 = vrot.lane.b32.xlu0 %v6450_v62, %s5982_s28 }
 0x1be   : > { %1541 = vrot.lane.b32.xlu1 %v6450_v62, %s8635_s0  ;;  %1543 = vrot.lane.b32.xlu0 %v1425_v3, %s8635_s0 }
 0x1c2   : > { %1566 = vrot.lane.b32.xlu1 %v6450_v62, %s8627_s4  ;;  %1568 = vrot.lane.b32.xlu0 %v1425_v3, %s8627_s4 }
 0x1c6   : > { %1591 = vrot.lane.b32.xlu1 %v6450_v62, %s8625_s30  ;;  %1593 = vrot.lane.b32.xlu0 %v1425_v3, %s8625_s30 }
 0x1ca   : > { %1616 = vrot.lane.b32.xlu1 %v6450_v62, %s8623_s5  ;;  %1618 = vrot.lane.b32.xlu0 %v1425_v3, %s8623_s5 }
 0x1ce   : > { %1435 = vrot.lane.b32.xlu1 %v1425_v3, %s8633_s27  ;;  %1462 = vrot.lane.b32.xlu0 %v1425_v3, %s8631_s26  ;;  %s8658_s27 = smov 19  }
 0x1d2   : > { %1487 = vrot.lane.b32.xlu1 %v1425_v3, %s8629_s3  ;;  %1512 = vrot.lane.b32.xlu0 %v1425_v3, %s5982_s28  ;;  %s8664_s3 = smov 10  }
 0x1d6   : > { %1545 = vrot.lane.b32.xlu1 %v1426_v5, %s8635_s0  ;;  %1570 = vrot.lane.b32.xlu0 %v1426_v5, %s8627_s4  ;;  %s5991_s4 = smov 118   ;;  %s8661_s0 = smov 111  }
 0x1da   : > { %1595 = vrot.lane.b32.xlu1 %v1426_v5, %s8625_s30  ;;  %1620 = vrot.lane.b32.xlu0 %v1426_v5, %s8623_s5  ;;  %s5987_s30 = smov 11   ;;  %s8637_s5 = smov 9  }
 0x1de   : > { %2287 = vperm.xlu0 %5828, %v2279_v30   ;;  %2282 = vperm.xlu1 %5829, %v2278_v6  }
 0x1f0   : > { %v1455_v9 = vpop.permute.xlu1 %1454  ;;  %v1428_v10 = vpop.permute.xlu0 %1427 }
 0x1f4   : > { %v1480_v11 = vpop.permute.xlu1 %1479  ;;  %v6554_v12 = vpop.permute.xlu0 %1456 }
 0x1f5   : > { %v1471_v13 = vsel %vm1466_vm4, %v1455_v9, %v6554_v12 }
 0x1f6   : > { %1474 = vst [vmem:[#allocation2 + $0x38] sm:$0xff] %v1471_v13 }
 0x1f8   : > { %v1505_v14 = vpop.permute.xlu1 %1504  ;;  %v6560_v16 = vpop.permute.xlu0 %1481 }
 0x1f9   : > { %v1496_v57 = vsel %vm1491_vm5, %v1480_v11, %v6560_v16 }
 0x1fa   : > { %1499 = vst [vmem:[#allocation2 + $0x68] sm:$0xff] %v1496_v57 }
 0x1fc   : > { %v6566_v17 = vpop.permute.xlu1 %1535  ;;  %v6568_v18 = vpop.permute.xlu0 %1506 }
 0x1fd   : > { %v1521_v19 = vsel %vm1516_vm6, %v1505_v14, %v6568_v18 }
 0x1fe   : > { %1524 = vst [vmem:[#allocation2 + $0x98] sm:$0xff] %v1521_v19  ;;  %v5379_v45 = vpack.c.bf16 %v1521_v19, %v1496_v57 }
 0x200   : > { %v6574_v20 = vpop.permute.xlu1 %1429  ;;  %v1563_v22 = vpop.permute.xlu0 %1562 }
 0x201   : > { %v1446_v23 = vsel %vm1441_vm7, %v1428_v10, %v6574_v20 }
 0x202   : > { %1449 = vst [vmem:[#allocation2 + $0x8] sm:$0xff] %v1446_v23  ;;  %v5375_v24 = vpack.c.bf16 %v1471_v13, %v1446_v23 }
 0x204   : > { %v1538_v25 = vpop.permute.xlu1 %1537  ;;  %v6580_v27 = vpop.permute.xlu0 %1539  ;;  %5376 = vmatprep.subr.bf16.mxu1 %v5375_v24 }
 0x205   : > { %v1552_v29 = vsel %vm1547_vm8, %v6566_v17, %v1538_v25  ;;  %v1551_v31 = vsel %vm1547_vm8, %v1538_v25, %v6580_v27 }
 0x206   : > { %1554 = vst [vmem:[#allocation2 + $0xf0] sm:$0xff] %v1552_v29  ;;  %1555 = vst [vmem:[#allocation2 + $0xf8] sm:$0xff] %v1551_v31  ;;  %v5383_v51 = vpack.c.bf16 %v1551_v31, %v6436_v46  ;;  %v5385_v59 = vpack.c.bf16 %v1552_v29, %v6434_v40 }
 0x208   : > { %v6589_v32 = vpop.permute.xlu1 %1564  ;;  %v6591_v34 = vpop.permute.xlu0 %1464 }
 0x209   : > { %v1576_v35 = vsel %vm1572_vm9, %v1563_v22, %v6589_v32  ;;  %v1472_v36 = vsel %vm1466_vm4, %v6591_v34, %v1455_v9  ;;  %v6662_v9 = vld [vmem:[%s8656_s1 + $0x8] sm:$0xff] }
 0x20a   : > { %1580 = vst [vmem:[#allocation2 + $0x128] sm:$0xff] %v1576_v35  ;;  %1473 = vst [vmem:[#allocation2 + $0x30] sm:$0xff] %v1472_v36 }
 0x20c   : > { %v6599_v37 = vpop.permute.xlu1 %1437  ;;  %v6601_v38 = vpop.permute.xlu0 %1514 }
 0x20d   : > { %v1447_v39 = vsel %vm1441_vm7, %v6599_v37, %v1428_v10  ;;  %v1522_v42 = vsel %vm1516_vm6, %v6601_v38, %v1505_v14 }
 0x20e   : > { %1448 = vst [vmem:[#allocation2] sm:$0xff] %v1447_v39  ;;  %1523 = vst [vmem:[#allocation2 + $0x90] sm:$0xff] %v1522_v42  ;;  %v5377_v44 = vpack.c.bf16 %v1472_v36, %v1447_v39 }
 0x210   : > { %v6609_v47 = vpop.permute.xlu1 %1489  ;;  %v1588_v48 = vpop.permute.xlu0 %1587  ;;  %5378 = vmatpush1.bf16.msra.mxu1 %v5377_v44 }
 0x211   : > { %v1497_v49 = vsel %vm1491_vm5, %v6609_v47, %v1480_v11  ;;  %5380 = vmatprep.subr.bf16.mxu1 %v5379_v45 }
 0x212   : > { %1498 = vst [vmem:[#allocation2 + $0x60] sm:$0xff] %v1497_v49  ;;  %v5381_v50 = vpack.c.bf16 %v1522_v42, %v1497_v49 }
 0x214   : > { %v6616_v52 = vpop.permute.xlu1 %1589  ;;  %v6618_v53 = vpop.permute.xlu0 %1560  ;;  %5382 = vmatpush1.bf16.msra.mxu1 %v5381_v50 }
 0x215   : > { %v1601_v55 = vsel %vm1597_vm10, %v1588_v48, %v6616_v52  ;;  %v1577_v58 = vsel %vm1572_vm9, %v6618_v53, %v1563_v22  ;;  %5384 = vmatprep.subr.bf16.mxu1 %v5383_v51  ;;  %v6709_v51 = vpop.f32.mrb[8].mxu1 }
 0x216   : > { %1605 = vst [vmem:[#allocation2 + $0x158] sm:$0xff] %v1601_v55  ;;  %1579 = vst [vmem:[#allocation2 + $0x120] sm:$0xff] %v1577_v58  ;;  %v5387_v60 = vpack.c.bf16 %v1601_v55, %v1576_v35 }
 0x218   : > { %v6627_v46 = vpop.permute.xlu1 %1585  ;;  %v1613_v61 = vpop.permute.xlu0 %1612  ;;  %5386 = vmatpush1.bf16.msra.mxu1 %v5385_v59 }
 0x219   : > { %v1602_v63 = vsel %vm1597_vm10, %v6627_v46, %v1588_v48  ;;  %5388 = vmatprep.subr.bf16.mxu1 %v5387_v60 }
 0x21a   : > { %1604 = vst [vmem:[#allocation2 + $0x150] sm:$0xff] %v1602_v63  ;;  %v5389_v0 = vpack.c.bf16 %v1602_v63, %v1577_v58  ;;  %v2755_v63 = vld [vmem:[%s8611_s12 + $0x8] sm:$0xff] }
 0x21c   : > { %v6633_v41 = vpop.permute.xlu1 %1614  ;;  %v6635_v2 = vpop.permute.xlu0 %1610  ;;  %5390 = vmatpush1.bf16.msra.mxu1 %v5389_v0  ;;  %v2757_v0 = vld [vmem:[%s8611_s12 + $0x18] sm:$0xff] }
 0x21d   : > { %v1626_v40 = vsel %vm1622_vm11, %v1613_v61, %v6633_v41  ;;  %v1627_v43 = vsel %vm1622_vm11, %v6635_v2, %v1613_v61 }
 0x21e   : > { %1630 = vst [vmem:[#allocation2 + $0x188] sm:$0xff] %v1626_v40  ;;  %1629 = vst [vmem:[#allocation2 + $0x180] sm:$0xff] %v1627_v43  ;;  %2063 = vmatprep.subr.mxu1 %v1626_v40 }
 0x220   : > { %v1432_v3 = vpop.permute.xlu1 %1431  ;;  %v6648_v5 = vpop.permute.xlu0 %1433  ;;  %2064 = vmatpush1.msra.mxu1 %v1627_v43 }
 0x221   : > { %v1445_v30 = vsel %vm1441_vm7, %v6574_v20, %v1432_v3  ;;  %v1444_v6 = vsel %vm1441_vm7, %v1432_v3, %v6648_v5  ;;  %4851 = vmatmul.mubr.msk.f32.vlgmr.msra.gmra.mrb[4].mxu1 %vm918_vm0, %v6646_v28  ;;  %v2754_v3 = vld [vmem:[%s8611_s12] sm:$0xff] }
 0x222   : > { %1450 = vst [vmem:[#allocation2 + $0x10] sm:$0xff] %v1445_v30  ;;  %1451 = vst [vmem:[#allocation2 + $0x18] sm:$0xff] %v1444_v6  ;;  %2117 = vmatprep.mubr.f32.mxu1 %v5977_v8 }
 0x224   : > { %v1459_v10 = vpop.permute.xlu1 %1458  ;;  %v6664_v11 = vpop.permute.xlu0 %1460 }
 0x225   : > { %v1470_v13 = vsel %vm1466_vm4, %v6554_v12, %v1459_v10  ;;  %v1469_v14 = vsel %vm1466_vm4, %v1459_v10, %v6664_v11  ;;  %4852 = vmatmul.mubr.msk.f32.gmra.mrb[6].mxu1 %vm918_vm0, %v6662_v9 }
 0x226   : > { %1475 = vst [vmem:[#allocation2 + $0x40] sm:$0xff] %v1470_v13  ;;  %1476 = vst [vmem:[#allocation2 + $0x48] sm:$0xff] %v1469_v14  ;;  %v5391_v57 = vpack.c.bf16 %v1469_v14, %v1444_v6  ;;  %v5393_v19 = vpack.c.bf16 %v1470_v13, %v1445_v30  ;;  %2265 = vmatprep.mubr.f32.mxu1 %v5977_v8  ;;  %v2756_v30 = vld [vmem:[%s8611_s12 + $0x10] sm:$0xff]  ;;  %v2759_v13 = vld [vmem:[%s8611_s12 + $0x28] sm:$0xff] }
 0x227   : > { %v2761_v14 = vld [vmem:[%s8611_s12 + $0x38] sm:$0xff] }
 0x228   : > { %v1484_v20 = vpop.permute.xlu1 %1483  ;;  %v6675_v22 = vpop.permute.xlu0 %1485  ;;  %5392 = vmatprep.subr.bf16.mxu0 %v5391_v57  ;;  %v5423_v57 = vpack.c.bf16 %v2757_v0, %v2755_v63  ;;  %v1665_v63 = vld [vmem:[#allocation2 + $0xe0] sm:$0xff] }
 0x229   : > { %v1495_v12 = vsel %vm1491_vm5, %v6560_v16, %v1484_v20  ;;  %v1494_v23 = vsel %vm1491_vm5, %v1484_v20, %v6675_v22  ;;  %5394 = vmatpush1.bf16.msra.mxu0 %v5393_v19  ;;  %v5425_v19 = vpack.c.bf16 %v2756_v30, %v2754_v3  ;;  %v2768_v3 = vld [vmem:[%s8611_s12 + $0x70] sm:$0xff] }
 0x22a   : > { %1500 = vst [vmem:[#allocation2 + $0x70] sm:$0xff] %v1495_v12  ;;  %1501 = vst [vmem:[#allocation2 + $0x78] sm:$0xff] %v1494_v23 }
 0x22c   : > { %v1509_v24 = vpop.permute.xlu1 %1508  ;;  %v6683_v25 = vpop.permute.xlu0 %1510 }
 0x22d   : > { %v1520_v29 = vsel %vm1516_vm6, %v6568_v18, %v1509_v24  ;;  %v1519_v31 = vsel %vm1516_vm6, %v1509_v24, %v6683_v25  ;;  %v2760_v24 = vld [vmem:[%s8611_s12 + $0x30] sm:$0xff] }
 0x22e   : > { %1525 = vst [vmem:[#allocation2 + $0xa0] sm:$0xff] %v1520_v29  ;;  %1526 = vst [vmem:[#allocation2 + $0xa8] sm:$0xff] %v1519_v31  ;;  %v5395_v16 = vpack.c.bf16 %v1519_v31, %v1494_v23  ;;  %v5397_v35 = vpack.c.bf16 %v1520_v29, %v1495_v12  ;;  %v5427_v12 = vpack.c.bf16 %v2761_v14, %v2759_v13  ;;  %v2758_v23 = vld [vmem:[%s8611_s12 + $0x20] sm:$0xff]  ;;  %v1666_v14 = vld [vmem:[#allocation2 + $0xe8] sm:$0xff] }
 0x230   : > { %v1542_v36 = vpop.permute.xlu1 %1541  ;;  %v6691_v39 = vpop.permute.xlu0 %1543  ;;  %5396 = vmatprep.subr.bf16.mxu0 %v5395_v16 }
 0x231   : > { %v1550_v42 = vsel %vm1547_vm8, %v6580_v27, %v1542_v36  ;;  %v1549_v18 = vsel %vm1547_vm8, %v1542_v36, %v6691_v39  ;;  %5398 = vmatpush1.bf16.msra.mxu0 %v5397_v35  ;;  %v2763_v36 = vld [vmem:[%s8611_s12 + $0x48] sm:$0xff] }
 0x232   : > { %1556 = vst [vmem:[#allocation2 + $0x100] sm:$0xff] %v1550_v42  ;;  %1557 = vst [vmem:[#allocation2 + $0x108] sm:$0xff] %v1549_v18  ;;  %v5399_v44 = vpack.c.bf16 %v1549_v18, %v6450_v62  ;;  %v5401_v45 = vpack.c.bf16 %v1550_v42, %v6447_v54  ;;  %v6711_v62 = vpop.f32.mrb[9].mxu1 }
 0x233   : > { %v6721_v61 = vpop.f32.mrb[10].mxu1 }
 0x234   : > { %v1567_v48 = vpop.permute.xlu1 %1566  ;;  %v6701_v49 = vpop.permute.xlu0 %1568  ;;  %5400 = vmatprep.subr.bf16.mxu0 %v5399_v44 }
 0x235   : > { %v1575_v50 = vsel %vm1572_vm9, %v6589_v32, %v1567_v48  ;;  %v1574_v27 = vsel %vm1572_vm9, %v1567_v48, %v6701_v49  ;;  %5402 = vmatpush1.bf16.msra.mxu0 %v5401_v45  ;;  %v6729_v40 = vpop.f32.mrb[11].mxu1  ;;  %v2762_v45 = vld [vmem:[%s8611_s12 + $0x40] sm:$0xff]  ;;  %v2764_v48 = vld [vmem:[%s8611_s12 + $0x50] sm:$0xff] }
 0x236   : > { %1581 = vst [vmem:[#allocation2 + $0x130] sm:$0xff] %v1575_v50  ;;  %1582 = vst [vmem:[#allocation2 + $0x138] sm:$0xff] %v1574_v27 }
 0x238   : > { %v1592_v54 = vpop.permute.xlu1 %1591  ;;  %v6713_v55 = vpop.permute.xlu0 %1593 }
 0x239   : > { %v1600_v58 = vsel %vm1597_vm10, %v6616_v52, %v1592_v54  ;;  %v1599_v32 = vsel %vm1597_vm10, %v1592_v54, %v6713_v55 }
 0x23a   : > { %1606 = vst [vmem:[#allocation2 + $0x160] sm:$0xff] %v1600_v58  ;;  %1607 = vst [vmem:[#allocation2 + $0x168] sm:$0xff] %v1599_v32  ;;  %v5403_v59 = vpack.c.bf16 %v1599_v32, %v1574_v27  ;;  %v5405_v60 = vpack.c.bf16 %v1600_v58, %v1575_v50  ;;  %v2767_v32 = vld [vmem:[%s8611_s12 + $0x68] sm:$0xff] }
 0x23c   : > { %v1617_v52 = vpop.permute.xlu1 %1616  ;;  %v6731_v43 = vpop.permute.xlu0 %1618  ;;  %5404 = vmatprep.subr.bf16.mxu0 %v5403_v59 }
 0x23d   : > { %v1625_v6 = vsel %vm1622_vm11, %v6633_v41, %v1617_v52  ;;  %v1624_v10 = vsel %vm1622_vm11, %v1617_v52, %v6731_v43  ;;  %5406 = vmatpush1.bf16.msra.mxu0 %v5405_v60  ;;  %v2766_v52 = vld [vmem:[%s8611_s12 + $0x60] sm:$0xff] }
 0x23e   : > { %1631 = vst [vmem:[#allocation2 + $0x190] sm:$0xff] %v1625_v6  ;;  %1632 = vst [vmem:[#allocation2 + $0x198] sm:$0xff] %v1624_v10  ;;  %2140 = vmatprep.subr.mxu0 %v1624_v10 }
 0x240   : > { %v1436_v20 = vpop.permute.xlu1 %1435  ;;  %v1463_v41 = vpop.permute.xlu0 %1462 }
 0x241   : > { %v1442_v29 = vsel %vm1441_vm7, %v1436_v20, %v6599_v37  ;;  %v1443_v31 = vsel %vm1441_vm7, %v6648_v5, %v1436_v20  ;;  %v1467_v16 = vsel %vm1466_vm4, %v1463_v41, %v6591_v34  ;;  %v1468_v35 = vsel %vm1466_vm4, %v6664_v11, %v1463_v41  ;;  %2141 = vmatpush1.msra.mxu0 %v1625_v6  ;;  %v2765_v37 = vld [vmem:[%s8611_s12 + $0x58] sm:$0xff] }
 0x242   : > { %1452 = vst [vmem:[#allocation2 + $0x20] sm:$0xff] %v1443_v31  ;;  %1453 = vst [vmem:[#allocation2 + $0x28] sm:$0xff] %v1442_v29  ;;  %4853 = vmatmul.mubr.msk.f32.vlgmr.msra.gmra.mrb[4].mxu0 %vm918_vm0, %v6646_v28  ;;  %v5407_v34 = vpack.c.bf16 %v1467_v16, %v1442_v29  ;;  %v5409_v5 = vpack.c.bf16 %v1468_v35, %v1443_v31  ;;  %5424 = vmatprep.subr.bf16.mxu0 %v5423_v57  ;;  %v2771_v57 = vld [vmem:[%s8611_s12 + $0x88] sm:$0xff] }
 0x243   : > { %1477 = vst [vmem:[#allocation2 + $0x50] sm:$0xff] %v1468_v35  ;;  %1478 = vst [vmem:[#allocation2 + $0x58] sm:$0xff] %v1467_v16  ;;  %2194 = vmatprep.mubr.f32.mxu0 %v5977_v8  ;;  %5426 = vmatpush1.bf16.msra.mxu0 %v5425_v19  ;;  %v5429_v11 = vpack.c.bf16 %v2760_v24, %v2758_v23  ;;  %v5431_v44 = vpack.c.bf16 %v2765_v37, %v2763_v36  ;;  %v2772_v23 = vld [vmem:[%s8611_s12 + $0x90] sm:$0xff]  ;;  %v2775_v35 = vld [vmem:[%s8611_s12 + $0xa8] sm:$0xff] }
 0x244   : > { %v1488_v42 = vpop.permute.xlu1 %1487  ;;  %v1513_v18 = vpop.permute.xlu0 %1512  ;;  %5408 = vmatprep.subr.bf16.mxu1 %v5407_v34  ;;  %5428 = vmatprep.subr.bf16.mxu0 %v5427_v12  ;;  %v5437_v19 = vpack.c.bf16 %v2768_v3, %v2766_v52  ;;  %v2770_v12 = vld [vmem:[%s8611_s12 + $0x80] sm:$0xff]  ;;  %v2776_v34 = vld [vmem:[%s8611_s12 + $0xb0] sm:$0xff]  ;;  %v2795_v3 = vld [vmem:[%s8611_s12 + $0x148] sm:$0xff] }
 0x245   : > { %v1492_v50 = vsel %vm1491_vm5, %v1488_v42, %v6609_v47  ;;  %v1493_v27 = vsel %vm1491_vm5, %v6675_v22, %v1488_v42  ;;  %v1517_v54 = vsel %vm1516_vm6, %v1513_v18, %v6601_v38  ;;  %v1518_v58 = vsel %vm1516_vm6, %v6683_v25, %v1513_v18  ;;  %5410 = vmatpush1.bf16.msra.mxu1 %v5409_v5  ;;  %v2769_v47 = vld [vmem:[%s8611_s12 + $0x78] sm:$0xff]  ;;  %v2774_v37 = vld [vmem:[%s8611_s12 + $0xa0] sm:$0xff]  ;;  %v2779_v5 = vld [vmem:[%s8611_s12 + $0xc8] sm:$0xff] }
 0x246   : > { %1502 = vst [vmem:[#allocation2 + $0x80] sm:$0xff] %v1493_v27  ;;  %1503 = vst [vmem:[#allocation2 + $0x88] sm:$0xff] %v1492_v50  ;;  %4854 = vmatmul.mubr.msk.f32.gmra.mrb[6].mxu0 %vm918_vm0, %v6662_v9  ;;  %v5411_v38 = vpack.c.bf16 %v1517_v54, %v1492_v50  ;;  %v5413_v22 = vpack.c.bf16 %v1518_v58, %v1493_v27  ;;  %v5433_v25 = vpack.c.bf16 %v2764_v48, %v2762_v45  ;;  %v2780_v45 = vld [vmem:[%s8611_s12 + $0xd0] sm:$0xff]  ;;  %v2783_v48 = vld [vmem:[%s8611_s12 + $0xe8] sm:$0xff] }
 0x247   : > { %1527 = vst [vmem:[#allocation2 + $0xb0] sm:$0xff] %v1518_v58  ;;  %1528 = vst [vmem:[#allocation2 + $0xb8] sm:$0xff] %v1517_v54  ;;  %5430 = vmatpush1.bf16.msra.mxu0 %v5429_v11  ;;  %v5435_v0 = vpack.c.bf16 %v2769_v47, %v2767_v32  ;;  %v2781_v11 = vld [vmem:[%s8611_s12 + $0xd8] sm:$0xff]  ;;  %v5445_v42 = vpack.c.bf16 %v2776_v34, %v2774_v37  ;;  %v2782_v58 = vld [vmem:[%s8611_s12 + $0xe0] sm:$0xff] }
 0x248   : > { %v1546_v59 = vpop.permute.xlu1 %1545  ;;  %v1571_v60 = vpop.permute.xlu0 %1570  ;;  %5412 = vmatprep.subr.bf16.mxu1 %v5411_v38  ;;  %5432 = vmatprep.subr.bf16.mxu0 %v5431_v44  ;;  %v5447_v18 = vpack.c.bf16 %v2781_v11, %v2779_v5  ;;  %v2778_v44 = vld [vmem:[%s8611_s12 + $0xc0] sm:$0xff]  ;;  %v2785_v50 = vld [vmem:[%s8611_s12 + $0xf8] sm:$0xff]  ;;  %v2784_v32 = vld [vmem:[%s8611_s12 + $0xf0] sm:$0xff] }
 0x249   : > { %v1548_v30 = vsel %vm1547_vm8, %v6691_v39, %v1546_v59  ;;  %v1553_v6 = vsel %vm1547_vm8, %v1546_v59, %v6566_v17  ;;  %v1573_v10 = vsel %vm1572_vm9, %v6701_v49, %v1571_v60  ;;  %v1578_v13 = vsel %vm1572_vm9, %v1571_v60, %v6618_v53  ;;  %5414 = vmatpush1.bf16.msra.mxu1 %v5413_v22  ;;  %v2773_v39 = vld [vmem:[%s8611_s12 + $0x98] sm:$0xff]  ;;  %v2787_v47 = vld [vmem:[%s8611_s12 + $0x108] sm:$0xff]  ;;  %v2786_v22 = vld [vmem:[%s8611_s12 + $0x100] sm:$0xff] }
 0x24a   : > { %1558 = vst [vmem:[#allocation2 + $0x110] sm:$0xff] %v1548_v30  ;;  %1559 = vst [vmem:[#allocation2 + $0x118] sm:$0xff] %v1553_v6  ;;  %v5415_v17 = vpack.c.bf16 %v1553_v6, %v1666_v14  ;;  %v5417_v49 = vpack.c.bf16 %v1548_v30, %v1665_v63  ;;  %v5439_v41 = vpack.c.bf16 %v2773_v39, %v2771_v57  ;;  %v2791_v59 = vld [vmem:[%s8611_s12 + $0x128] sm:$0xff]  ;;  %v2792_v52 = vld [vmem:[%s8611_s12 + $0x130] sm:$0xff] }
 0x24b   : > { %1583 = vst [vmem:[#allocation2 + $0x140] sm:$0xff] %v1573_v10  ;;  %1584 = vst [vmem:[#allocation2 + $0x148] sm:$0xff] %v1578_v13  ;;  %5434 = vmatpush1.bf16.msra.mxu0 %v5433_v25  ;;  %v5449_v27 = vpack.c.bf16 %v2780_v45, %v2778_v44  ;;  %v5451_v54 = vpack.c.bf16 %v2785_v50, %v2783_v48  ;;  %v2788_v25 = vld [vmem:[%s8611_s12 + $0x110] sm:$0xff]  ;;  %v2797_v30 = vld [vmem:[%s8611_s12 + $0x158] sm:$0xff] }
 0x24c   : > { %v1596_v20 = vpop.permute.xlu1 %1595  ;;  %v1621_v53 = vpop.permute.xlu0 %1620  ;;  %5416 = vmatprep.subr.bf16.mxu1 %v5415_v17  ;;  %5436 = vmatprep.subr.bf16.mxu0 %v5435_v0  ;;  %v5457_v60 = vpack.c.bf16 %v2788_v25, %v2786_v22  ;;  %v2790_v0 = vld [vmem:[%s8611_s12 + $0x120] sm:$0xff]  ;;  %v2796_v14 = vld [vmem:[%s8611_s12 + $0x150] sm:$0xff]  ;;  %v2799_v57 = vld [vmem:[%s8611_s12 + $0x168] sm:$0xff] }
 0x24d   : > { %v1598_v24 = vsel %vm1597_vm10, %v6713_v55, %v1596_v20  ;;  %v1603_v29 = vsel %vm1597_vm10, %v1596_v20, %v6627_v46  ;;  %v1623_v31 = vsel %vm1622_vm11, %v6731_v43, %v1621_v53  ;;  %v1628_v16 = vsel %vm1622_vm11, %v1621_v53, %v6635_v2  ;;  %5418 = vmatpush1.bf16.msra.mxu1 %v5417_v49  ;;  %v2777_v55 = vld [vmem:[%s8611_s12 + $0xb8] sm:$0xff]  ;;  %v2800_v20 = vld [vmem:[%s8611_s12 + $0x170] sm:$0xff]  ;;  %v2810_v5 = vld [vmem:[%s8611_s12 + $0x1c0] sm:$0xff] }
 0x24e   : > { %1608 = vst [vmem:[#allocation2 + $0x170] sm:$0xff] %v1598_v24  ;;  %1609 = vst [vmem:[#allocation2 + $0x178] sm:$0xff] %v1603_v29  ;;  %v5419_v46 = vpack.c.bf16 %v1603_v29, %v1578_v13  ;;  %v5421_v36 = vpack.c.bf16 %v1598_v24, %v1573_v10  ;;  %v5441_v43 = vpack.c.bf16 %v2772_v23, %v2770_v12  ;;  %v2794_v13 = vld [vmem:[%s8611_s12 + $0x140] sm:$0xff]  ;;  %v2801_v39 = vld [vmem:[%s8611_s12 + $0x178] sm:$0xff] }
 0x24f   : > { %1633 = vst [vmem:[#allocation2 + $0x1a0] sm:$0xff] %v1623_v31  ;;  %1634 = vst [vmem:[#allocation2 + $0x1a8] sm:$0xff] %v1628_v16  ;;  %5438 = vmatpush1.bf16.msra.mxu0 %v5437_v19  ;;  %v5443_v2 = vpack.c.bf16 %v2777_v55, %v2775_v35  ;;  %v5461_v6 = vpack.c.bf16 %v2792_v52, %v2790_v0  ;;  %v5463_v10 = vpack.c.bf16 %v2797_v30, %v2795_v3  ;;  %v2798_v19 = vld [vmem:[%s8611_s12 + $0x160] sm:$0xff]  ;;  %v2805_v12 = vld [vmem:[%s8611_s12 + $0x198] sm:$0xff] }
 0x250   : > { %5420 = vmatprep.subr.bf16.mxu1 %v5419_v46  ;;  %5440 = vmatprep.subr.bf16.mxu0 %v5439_v41  ;;  %v5465_v17 = vpack.c.bf16 %v2796_v14, %v2794_v13  ;;  %v5467_v49 = vpack.c.bf16 %v2801_v39, %v2799_v57  ;;  %v5469_v53 = vpack.c.bf16 %v2800_v20, %v2798_v19  ;;  %v2803_v41 = vld [vmem:[%s8611_s12 + $0x188] sm:$0xff]  ;;  %v2802_v24 = vld [vmem:[%s8611_s12 + $0x180] sm:$0xff]  ;;  %v2804_v29 = vld [vmem:[%s8611_s12 + $0x190] sm:$0xff] }
 0x251   : > { %5422 = vmatpush1.bf16.msra.mxu1 %v5421_v36  ;;  %v5471_v23 = vpack.c.bf16 %v2805_v12, %v2803_v41  ;;  %v2809_v35 = vld [vmem:[%s8611_s12 + $0x1b8] sm:$0xff]  ;;  %v2806_v46 = vld [vmem:[%s8611_s12 + $0x1a0] sm:$0xff]  ;;  %v2808_v36 = vld [vmem:[%s8611_s12 + $0x1b0] sm:$0xff] }
 0x252   : > { %2217 = vmatprep.subr.mxu1 %v1628_v16  ;;  %v2807_v16 = vld [vmem:[%s8611_s12 + $0x1a8] sm:$0xff]  ;;  %v2813_v37 = vld [vmem:[%s8611_s12 + $0x1d8] sm:$0xff]  ;;  %v2812_v11 = vld [vmem:[%s8611_s12 + $0x1d0] sm:$0xff] }
 0x253   : > { %5442 = vmatpush1.bf16.msra.mxu0 %v5441_v43  ;;  %v5475_v55 = vpack.c.bf16 %v2809_v35, %v2807_v16  ;;  %v5477_v43 = vpack.c.bf16 %v2808_v36, %v2806_v46  ;;  %v2817_v44 = vld [vmem:[%s8611_s12 + $0x1f8] sm:$0xff]  ;;  %v2814_v48 = vld [vmem:[%s8611_s12 + $0x1e0] sm:$0xff]  ;;  %v2816_v50 = vld [vmem:[%s8611_s12 + $0x1f0] sm:$0xff] }
 0x254   : > { %5444 = vmatprep.subr.bf16.mxu0 %v5443_v2  ;;  %v2811_v2 = vld [vmem:[%s8611_s12 + $0x1c8] sm:$0xff]  ;;  %v7000_v0 = vld [vmem:[%s8609_s10] sm:$0x3f]  ;;  %v2825_v14 = vld [vmem:[%s8611_s12 + $0x238] sm:$0xff] }
 0x255   : > { %2218 = vmatpush1.msra.mxu1 %v1623_v31  ;;  %v5473_v31 = vpack.c.bf16 %v2804_v29, %v2802_v24  ;;  %v5479_v34 = vpack.c.bf16 %v2813_v37, %v2811_v2  ;;  %v2319_v52 = vrot.slane %v7000_v0, %v6414_v15  ;;  %v2323_v3 = vrot.slane %v7000_v0, %v6423_v21  ;;  %v2818_v30 = vld [vmem:[%s8611_s12 + $0x200] sm:$0xff]  ;;  %v2823_v13 = vld [vmem:[%s8611_s12 + $0x228] sm:$0xff]  ;;  %v2828_v46 = vld [vmem:[%s8611_s12 + $0x250] sm:$0xff] }
 0x256   : > { %4855 = vmatmul.mubr.msk.f32.vlgmr.msra.gmra.mrb[12].mxu1 %vm918_vm0, %v6646_v28  ;;  %v5453_v28 = vpack.c.bf16 %v2784_v32, %v2782_v58  ;;  %v2821_v58 = vld [vmem:[%s8611_s12 + $0x218] sm:$0xff]  ;;  %v5491_v19 = vpack.c.bf16 %v2825_v14, %v2823_v13  ;;  %v2822_v20 = vld [vmem:[%s8611_s12 + $0x220] sm:$0xff]  ;;  %v2827_v12 = vld [vmem:[%s8611_s12 + $0x248] sm:$0xff] }
 0x257   : > { %2271 = vmatprep.mubr.f32.mxu1 %v5977_v8  ;;  %5446 = vmatpush1.bf16.msra.mxu0 %v5445_v42  ;;  %v2789_v8 = vld [vmem:[%s8611_s12 + $0x118] sm:$0xff]  ;;  %v5481_v42 = vpack.c.bf16 %v2812_v11, %v2810_v5  ;;  %v2831_v36 = vld [vmem:[%s8611_s12 + $0x268] sm:$0xff]  ;;  %v2832_v5 = vld [vmem:[%s8611_s12 + $0x270] sm:$0xff] }
 0x258   : > { %5448 = vmatprep.subr.bf16.mxu0 %v5447_v18  ;;  %v5455_v38 = vpack.c.bf16 %v2789_v8, %v2787_v47  ;;  %v2815_v18 = vld [vmem:[%s8611_s12 + $0x1e8] sm:$0xff]  ;;  %v2849_v13 = vld [vmem:[%s8611_s12 + $0x2f8] sm:$0xff] }
 0x259   : > { %v5483_v45 = vpack.c.bf16 %v2817_v44, %v2815_v18  ;;  %v2835_v11 = vld [vmem:[%s8611_s12 + $0x288] sm:$0xff] }
 0x25a   : > { %4856 = vmatmul.mubr.msk.f32.gmra.mrb[14].mxu1 %vm918_vm0, %v6662_v9  ;;  %v2793_v9 = vld [vmem:[%s8611_s12 + $0x138] sm:$0xff]  ;;  %vm3289_vm0 = vcmp.lt.s32.totalorder %v6551_v7, 118 }
 0x25b   : > { %5450 = vmatpush1.bf16.msra.mxu0 %v5449_v27  ;;  %v5459_v63 = vpack.c.bf16 %v2793_v9, %v2791_v59  ;;  %v5485_v27 = vpack.c.bf16 %v2816_v50, %v2814_v48  ;;  %v2836_v48 = vld [vmem:[%s8611_s12 + $0x290] sm:$0xff]  ;;  %v2839_v50 = vld [vmem:[%s8611_s12 + $0x2a8] sm:$0xff] }
 0x25c   : > { %5452 = vmatprep.subr.bf16.mxu0 %v5451_v54  ;;  %v2819_v54 = vld [vmem:[%s8611_s12 + $0x208] sm:$0xff] }
 0x25d   : > { %v5487_v32 = vpack.c.bf16 %v2821_v58, %v2819_v54  ;;  %v6989_v47 = vpop.permute.xlu1 %2282  ;;  %v6993_v25 = vpop.permute.xlu0 %2287 }
 0x25f   : > { %5454 = vmatpush1.bf16.msra.mxu0 %v5453_v28 }
 0x260   : > { %5456 = vmatprep.subr.bf16.mxu0 %v5455_v38 }
 0x263   : > { %5458 = vmatpush1.bf16.msra.mxu0 %v5457_v60 }
 0x264   : > { %5460 = vmatprep.subr.bf16.mxu0 %v5459_v63 }
 0x267   : > { %5462 = vmatpush1.bf16.msra.mxu0 %v5461_v6  ;;  %v2820_v6 = vld [vmem:[%s8611_s12 + $0x210] sm:$0xff] }
 0x268   : > { %5464 = vmatprep.subr.bf16.mxu0 %v5463_v10 }
 0x26b   : > { %5466 = vmatpush1.bf16.msra.mxu0 %v5465_v17 }
 0x26c   : > { %5468 = vmatprep.subr.bf16.mxu0 %v5467_v49  ;;  %v5489_v49 = vpack.c.bf16 %v2820_v6, %v2818_v30  ;;  %v2842_v30 = vld [vmem:[%s8611_s12 + $0x2c0] sm:$0xff]  ;;  %v2844_v6 = vld [vmem:[%s8611_s12 + $0x2d0] sm:$0xff] }
 0x26f   : > { %5470 = vmatpush1.bf16.msra.mxu0 %v5469_v53  ;;  %v2824_v53 = vld [vmem:[%s8611_s12 + $0x230] sm:$0xff] }
 0x270   : > { %5472 = vmatprep.subr.bf16.mxu0 %v5471_v23  ;;  %v2829_v23 = vld [vmem:[%s8611_s12 + $0x258] sm:$0xff]  ;;  %v5493_v16 = vpack.c.bf16 %v2824_v53, %v2822_v20 }
 0x271   : > { %v5495_v35 = vpack.c.bf16 %v2829_v23, %v2827_v12  ;;  %v2848_v12 = vld [vmem:[%s8611_s12 + $0x2f0] sm:$0xff]  ;;  %v2853_v23 = vld [vmem:[%s8611_s12 + $0x318] sm:$0xff] }
 0x273   : > { %5474 = vmatpush1.bf16.msra.mxu0 %v5473_v31 }
 0x274   : > { %5476 = vmatprep.subr.bf16.mxu0 %v5475_v55  ;;  %v2826_v55 = vld [vmem:[%s8611_s12 + $0x240] sm:$0xff] }
 0x275   : > { %v5497_v2 = vpack.c.bf16 %v2828_v46, %v2826_v55  ;;  %v2852_v55 = vld [vmem:[%s8611_s12 + $0x310] sm:$0xff]  ;;  %v2327_v46 = vrot.slane %v7000_v0, %v1401_v26  ;;  %v2854_v26 = vld [vmem:[%s8611_s12 + $0x320] sm:$0xff] }
 0x277   : > { %5478 = vmatpush1.bf16.msra.mxu0 %v5477_v43  ;;  %v2833_v43 = vld [vmem:[%s8611_s12 + $0x278] sm:$0xff] }
 0x278   : > { %5480 = vmatprep.subr.bf16.mxu0 %v5479_v34  ;;  %v5499_v37 = vpack.c.bf16 %v2833_v43, %v2831_v36  ;;  %v2830_v34 = vld [vmem:[%s8611_s12 + $0x260] sm:$0xff]  ;;  %v2855_v36 = vld [vmem:[%s8611_s12 + $0x328] sm:$0xff]  ;;  %v2857_v43 = vld [vmem:[%s8611_s12 + $0x338] sm:$0xff] }
 0x279   : > { %v5501_v18 = vpack.c.bf16 %v2832_v5, %v2830_v34  ;;  %v5523_v5 = vpack.c.bf16 %v2857_v43, %v2855_v36  ;;  %v2874_v36 = vld [vmem:[%s8611_s12 + $0x3c0] sm:$0xff]  ;;  %v2876_v43 = vld [vmem:[%s8611_s12 + $0x3d0] sm:$0xff] }
 0x27b   : > { %5482 = vmatpush1.bf16.msra.mxu0 %v5481_v42  ;;  %v2837_v42 = vld [vmem:[%s8611_s12 + $0x298] sm:$0xff] }
 0x27c   : > { %5484 = vmatprep.subr.bf16.mxu0 %v5483_v45  ;;  %v5503_v44 = vpack.c.bf16 %v2837_v42, %v2835_v11  ;;  %v2834_v45 = vld [vmem:[%s8611_s12 + $0x280] sm:$0xff]  ;;  %v2856_v11 = vld [vmem:[%s8611_s12 + $0x330] sm:$0xff] }
 0x27d   : > { %v5505_v54 = vpack.c.bf16 %v2836_v48, %v2834_v45  ;;  %v5525_v48 = vpack.c.bf16 %v2856_v11, %v2854_v26  ;;  %v5545_v11 = vpack.c.bf16 %v2876_v43, %v2874_v36  ;;  %v2906_v43 = vld [vmem:[%s8611_s12 + $0x4c0] sm:$0xff] }
 0x27f   : > { %5486 = vmatpush1.bf16.msra.mxu0 %v5485_v27  ;;  %v2841_v27 = vld [vmem:[%s8611_s12 + $0x2b8] sm:$0xff] }
 0x280   : > { %5488 = vmatprep.subr.bf16.mxu0 %v5487_v32  ;;  %v5507_v58 = vpack.c.bf16 %v2841_v27, %v2839_v50  ;;  %v2838_v32 = vld [vmem:[%s8611_s12 + $0x2a0] sm:$0xff] }
 0x2f4   : > { %v2113_v8 = vpop.f32.mrb[4].mxu1 }
 0x2f5   : > { %v2290_v28 = vadd.f32 %v6989_v47, %v2113_v8  ;;  %v2115_v38 = vpop.f32.mrb[5].mxu1  ;;  %v2840_v8 = vld [vmem:[%s8611_s12 + $0x2b0] sm:$0xff] }
 0x2f6   : > { %v2291_v22 = vadd.f32 %v6989_v47, %v2115_v38  ;;  %v2843_v38 = vld [vmem:[%s8611_s12 + $0x2c8] sm:$0xff] }
 0x2f7   : > { %5922 = vtanh.f32 %v2290_v28 }
 0x2f8   : > { %5924 = vtanh.f32 %v2291_v22  ;;  %v2119_v59 = vpop.f32.mrb[6].mxu1  ;;  %v2845_v22 = vld [vmem:[%s8611_s12 + $0x2d8] sm:$0xff] }
 0x2f9   : > { %v2296_v9 = vadd.f32 %v6993_v25, %v2119_v59  ;;  %v2121_v60 = vpop.f32.mrb[7].mxu1 }
 0x2fa   : > { %v2297_v63 = vadd.f32 %v6993_v25, %v2121_v60 }
 0x2fb   : > { %5926 = vtanh.f32 %v2296_v9 }
 0x2fc   : > { %5928 = vtanh.f32 %v2297_v63  ;;  %v5509_v63 = vpack.c.bf16 %v2840_v8, %v2838_v32 }
 0x301   : > { %v5923_v10 = vpop.eup %5922 }
 0x302   : > { %v5925_v57 = vpop.eup %5924  ;;  %v7018_v39 = vmul.f32 %v5923_v10, %v2319_v52 }
 0x303   : > { %v7020_v17 = vmul.f32 %v5925_v57, %v2323_v3 }
 0x304   : > { %2550 = vst [vmem:[#allocation3 + $0x180] sm:$0xff] %v7018_v39 }
 0x305   : > { %v5927_v41 = vpop.eup %5926  ;;  %2551 = vst [vmem:[#allocation3 + $0x188] sm:$0xff] %v7020_v17  ;;  %3010 = vmatprep.mubr.f32.mxu0 %v7020_v17 }
 0x306   : > { %v5929_v24 = vpop.eup %5928  ;;  %v7037_v29 = vmul.f32 %v5927_v41, %v2319_v52  ;;  %3011 = vmatmul.mubr.f32.vlgmr.msra.gmra.mrb[8].mxu0 %v7018_v39  ;;  %v2846_v41 = vld [vmem:[%s8611_s12 + $0x2e0] sm:$0xff] }
 0x307   : > { %v7040_v31 = vmul.f32 %v5929_v24, %v2323_v3  ;;  %5490 = vmatpush1.bf16.msra.mxu0 %v5489_v49  ;;  %v5511_v3 = vpack.c.bf16 %v2845_v22, %v2843_v38  ;;  %v5517_v24 = vpack.c.bf16 %v2848_v12, %v2846_v41  ;;  %v2863_v38 = vld [vmem:[%s8611_s12 + $0x368] sm:$0xff]  ;;  %v2865_v22 = vld [vmem:[%s8611_s12 + $0x378] sm:$0xff]  ;;  %v2335_v41 = vrot.slane %v7000_v0, %v1409_v1 }
 0x308   : > { %2556 = vst [vmem:[#allocation3 + $0x1b0] sm:$0xff] %v7037_v29  ;;  %5492 = vmatprep.subr.bf16.mxu0 %v5491_v19  ;;  %v5513_v19 = vpack.c.bf16 %v2844_v6, %v2842_v30  ;;  %v2862_v30 = vld [vmem:[%s8611_s12 + $0x360] sm:$0xff]  ;;  %v2864_v6 = vld [vmem:[%s8611_s12 + $0x370] sm:$0xff]  ;;  %v2875_v1 = vld [vmem:[%s8611_s12 + $0x3c8] sm:$0xff] }
 0x309   : > { %2557 = vst [vmem:[#allocation3 + $0x1b8] sm:$0xff] %v7040_v31  ;;  %3016 = vmatprep.mubr.f32.mxu0 %v7040_v31 }
 0x30a   : > { %3017 = vmatmul.mubr.f32.gmra.mrb[10].mxu0 %v7037_v29 }
 0x30b   : > { %5494 = vmatpush1.bf16.msra.mxu0 %v5493_v16 }
 0x30c   : > { %5496 = vmatprep.subr.bf16.mxu0 %v5495_v35  ;;  %v2850_v35 = vld [vmem:[%s8611_s12 + $0x300] sm:$0xff] }
 0x30f   : > { %5498 = vmatpush1.bf16.msra.mxu0 %v5497_v2  ;;  %v2331_v2 = vrot.slane %v7000_v0, %v1405_v33  ;;  %v2859_v33 = vld [vmem:[%s8611_s12 + $0x348] sm:$0xff] }
 0x310   : > { %5500 = vmatprep.subr.bf16.mxu0 %v5499_v37  ;;  %v5521_v37 = vpack.c.bf16 %v2852_v55, %v2850_v35 }
 0x313   : > { %5502 = vmatpush1.bf16.msra.mxu0 %v5501_v18 }
 0x314   : > { %5504 = vmatprep.subr.bf16.mxu0 %v5503_v44  ;;  %v2861_v44 = vld [vmem:[%s8611_s12 + $0x358] sm:$0xff] }
 0x315   : > { %v2190_v28 = vpop.f32.mrb[4].mxu0  ;;  %v5527_v27 = vpack.c.bf16 %v2861_v44, %v2859_v33  ;;  %v2878_v44 = vld [vmem:[%s8611_s12 + $0x3e0] sm:$0xff] }
 0x316   : > { %v2191_v59 = vadd.f32 %v2190_v28, %v6709_v51  ;;  %v2192_v9 = vpop.f32.mrb[5].mxu0 }
 0x317   : > { %v2193_v60 = vadd.f32 %v2192_v9, %v6711_v62  ;;  %5506 = vmatpush1.bf16.msra.mxu0 %v5505_v54  ;;  %v2847_v62 = vld [vmem:[%s8611_s12 + $0x2e8] sm:$0xff]  ;;  %v2858_v54 = vld [vmem:[%s8611_s12 + $0x340] sm:$0xff] }
 0x318   : > { %v2292_v52 = vadd.f32 %v6989_v47, %v2191_v59  ;;  %5508 = vmatprep.subr.bf16.mxu0 %v5507_v58  ;;  %v5515_v53 = vpack.c.bf16 %v2849_v13, %v2847_v62  ;;  %v2860_v58 = vld [vmem:[%s8611_s12 + $0x350] sm:$0xff] }
 0x319   : > { %v2293_v10 = vadd.f32 %v6989_v47, %v2193_v60  ;;  %v2196_v51 = vpop.f32.mrb[6].mxu0 }
 0x31a   : > { %5930 = vtanh.f32 %v2292_v52  ;;  %v2197_v14 = vadd.f32 %v2196_v51, %v6721_v61  ;;  %v2198_v57 = vpop.f32.mrb[7].mxu0  ;;  %v5529_v52 = vpack.c.bf16 %v2860_v58, %v2858_v54  ;;  %v2869_v51 = vld [vmem:[%s8611_s12 + $0x398] sm:$0xff] }
 0x31b   : > { %5932 = vtanh.f32 %v2293_v10  ;;  %v2199_v49 = vadd.f32 %v2198_v57, %v6729_v40  ;;  %5510 = vmatpush1.bf16.msra.mxu0 %v5509_v63  ;;  %v2851_v40 = vld [vmem:[%s8611_s12 + $0x308] sm:$0xff]  ;;  %v5533_v57 = vpack.c.bf16 %v2864_v6, %v2862_v30  ;;  %v2893_v30 = vld [vmem:[%s8611_s12 + $0x458] sm:$0xff] }
 0x31c   : > { %v2298_v20 = vadd.f32 %v6993_v25, %v2197_v14  ;;  %5512 = vmatprep.subr.bf16.mxu0 %v5511_v3  ;;  %v5519_v16 = vpack.c.bf16 %v2853_v23, %v2851_v40  ;;  %v5531_v3 = vpack.c.bf16 %v2865_v22, %v2863_v38  ;;  %v2870_v23 = vld [vmem:[%s8611_s12 + $0x3a0] sm:$0xff]  ;;  %v2887_v38 = vld [vmem:[%s8611_s12 + $0x428] sm:$0xff]  ;;  %v2889_v22 = vld [vmem:[%s8611_s12 + $0x438] sm:$0xff] }
 0x31d   : > { %v2299_v61 = vadd.f32 %v6993_v25, %v2199_v49 }
 0x31e   : > { %5934 = vtanh.f32 %v2298_v20  ;;  %v2868_v20 = vld [vmem:[%s8611_s12 + $0x390] sm:$0xff] }
 0x31f   : > { %5936 = vtanh.f32 %v2299_v61  ;;  %5514 = vmatpush1.bf16.msra.mxu0 %v5513_v19  ;;  %v2866_v19 = vld [vmem:[%s8611_s12 + $0x380] sm:$0xff]  ;;  %v2339_v61 = vrot.slane %v7000_v0, %v1413_v56 }
 0x320   : > { %5516 = vmatprep.subr.bf16.mxu0 %v5515_v53  ;;  %v2871_v53 = vld [vmem:[%s8611_s12 + $0x3a8] sm:$0xff]  ;;  %v5537_v12 = vpack.c.bf16 %v2868_v20, %v2866_v19  ;;  %v2896_v19 = vld [vmem:[%s8611_s12 + $0x470] sm:$0xff] }
 0x321   : > { %v2899_v20 = vld [vmem:[%s8611_s12 + $0x488] sm:$0xff] }
 0x323   : > { %5518 = vmatpush1.bf16.msra.mxu0 %v5517_v24  ;;  %v2872_v24 = vld [vmem:[%s8611_s12 + $0x3b0] sm:$0xff] }
 0x324   : > { %v5931_v34 = vpop.eup %5930  ;;  %5520 = vmatprep.subr.bf16.mxu0 %v5519_v16  ;;  %v5541_v35 = vpack.c.bf16 %v2872_v24, %v2870_v23  ;;  %v2905_v23 = vld [vmem:[%s8611_s12 + $0x4b8] sm:$0xff] }
 0x325   : > { %v5933_v42 = vpop.eup %5932  ;;  %v7150_v18 = vmul.f32 %v5931_v34, %v2327_v46 }
 0x326   : > { %v7158_v45 = vmul.f32 %v5933_v42, %v2331_v2 }
 0x327   : > { %2552 = vst [vmem:[#allocation3 + $0x190] sm:$0xff] %v7150_v18  ;;  %5522 = vmatpush1.bf16.msra.mxu0 %v5521_v37  ;;  %v2881_v37 = vld [vmem:[%s8611_s12 + $0x3f8] sm:$0xff] }
 0x328   : > { %v5935_v50 = vpop.eup %5934  ;;  %2553 = vst [vmem:[#allocation3 + $0x198] sm:$0xff] %v7158_v45  ;;  %3087 = vmatprep.mubr.f32.mxu0 %v7158_v45  ;;  %5524 = vmatprep.subr.bf16.mxu0 %v5523_v5 }
 0x329   : > { %v5937_v32 = vpop.eup %5936  ;;  %v7169_v8 = vmul.f32 %v5935_v50, %v2327_v46  ;;  %v2267_v28 = vpop.f32.mrb[12].mxu1  ;;  %v5543_v46 = vpack.c.bf16 %v2877_v4, %v2875_v1  ;;  %v2883_v50 = vld [vmem:[%s8611_s12 + $0x408] sm:$0xff]  ;;  %v2902_v4 = vld [vmem:[%s8611_s12 + $0x4a0] sm:$0xff] }
 0x32a   : > { %v7177_v59 = vmul.f32 %v5937_v32, %v2331_v2  ;;  %v2294_v9 = vadd.f32 %v6989_v47, %v2267_v28  ;;  %v2269_v60 = vpop.f32.mrb[13].mxu1  ;;  %v2879_v2 = vld [vmem:[%s8611_s12 + $0x3e8] sm:$0xff]  ;;  %v2882_v32 = vld [vmem:[%s8611_s12 + $0x400] sm:$0xff]  ;;  %v2884_v28 = vld [vmem:[%s8611_s12 + $0x410] sm:$0xff] }
 0x32b   : > { %2558 = vst [vmem:[#allocation3 + $0x1c0] sm:$0xff] %v7169_v8  ;;  %v2295_v63 = vadd.f32 %v6989_v47, %v2269_v60  ;;  %5526 = vmatpush1.bf16.msra.mxu0 %v5525_v48  ;;  %v2867_v47 = vld [vmem:[%s8611_s12 + $0x388] sm:$0xff]  ;;  %v5547_v33 = vpack.c.bf16 %v2881_v37, %v2879_v2  ;;  %v2880_v48 = vld [vmem:[%s8611_s12 + $0x3f0] sm:$0xff]  ;;  %v5555_v60 = vpack.c.bf16 %v2889_v22, %v2887_v38  ;;  %v2921_v38 = vld [vmem:[%s8611_s12 + $0x538] sm:$0xff] }
 0x32c   : > { %2559 = vst [vmem:[#allocation3 + $0x1c8] sm:$0xff] %v7177_v59  ;;  %5938 = vtanh.f32 %v2294_v9  ;;  %5528 = vmatprep.subr.bf16.mxu0 %v5527_v27  ;;  %v5535_v49 = vpack.c.bf16 %v2869_v51, %v2867_v47  ;;  %v2885_v27 = vld [vmem:[%s8611_s12 + $0x418] sm:$0xff]  ;;  %v5549_v54 = vpack.c.bf16 %v2880_v48, %v2878_v44  ;;  %v5553_v9 = vpack.c.bf16 %v2884_v28, %v2882_v32  ;;  %v2890_v47 = vld [vmem:[%s8611_s12 + $0x440] sm:$0xff]  ;;  %v2892_v51 = vld [vmem:[%s8611_s12 + $0x450] sm:$0xff] }
 0x32d   : > { %5940 = vtanh.f32 %v2295_v63  ;;  %v2273_v10 = vpop.f32.mrb[14].mxu1  ;;  %v5551_v58 = vpack.c.bf16 %v2885_v27, %v2883_v50  ;;  %v2886_v63 = vld [vmem:[%s8611_s12 + $0x420] sm:$0xff]  ;;  %v2908_v2 = vld [vmem:[%s8611_s12 + $0x4d0] sm:$0xff]  ;;  %v2911_v37 = vld [vmem:[%s8611_s12 + $0x4e8] sm:$0xff] }
 0x32e   : > { %v2300_v62 = vadd.f32 %v6993_v25, %v2273_v10  ;;  %v2275_v13 = vpop.f32.mrb[15].mxu1  ;;  %v2912_v44 = vld [vmem:[%s8611_s12 + $0x4f0] sm:$0xff]  ;;  %v2915_v48 = vld [vmem:[%s8611_s12 + $0x508] sm:$0xff]  ;;  %v2917_v50 = vld [vmem:[%s8611_s12 + $0x518] sm:$0xff] }
 0x32f   : > { %v2301_v14 = vadd.f32 %v6993_v25, %v2275_v13  ;;  %5530 = vmatpush1.bf16.msra.mxu0 %v5529_v52  ;;  %v2873_v25 = vld [vmem:[%s8611_s12 + $0x3b8] sm:$0xff]  ;;  %v2888_v52 = vld [vmem:[%s8611_s12 + $0x430] sm:$0xff]  ;;  %v2919_v28 = vld [vmem:[%s8611_s12 + $0x528] sm:$0xff] }
 0x330   : > { %5942 = vtanh.f32 %v2300_v62  ;;  %5532 = vmatprep.subr.bf16.mxu0 %v5531_v3  ;;  %v5539_v40 = vpack.c.bf16 %v2873_v25, %v2871_v53  ;;  %v2891_v3 = vld [vmem:[%s8611_s12 + $0x448] sm:$0xff]  ;;  %v5557_v6 = vpack.c.bf16 %v2888_v52, %v2886_v63  ;;  %v2897_v13 = vld [vmem:[%s8611_s12 + $0x478] sm:$0xff]  ;;  %v2916_v32 = vld [vmem:[%s8611_s12 + $0x510] sm:$0xff] }
 0x331   : > { %5944 = vtanh.f32 %v2301_v14  ;;  %v5559_v10 = vpack.c.bf16 %v2893_v30, %v2891_v3  ;;  %v2895_v62 = vld [vmem:[%s8611_s12 + $0x468] sm:$0xff]  ;;  %v5561_v14 = vpack.c.bf16 %v2892_v51, %v2890_v47  ;;  %v2901_v53 = vld [vmem:[%s8611_s12 + $0x498] sm:$0xff]  ;;  %v2920_v63 = vld [vmem:[%s8611_s12 + $0x530] sm:$0xff] }
 0x332   : > { %v2923_v52 = vld [vmem:[%s8611_s12 + $0x548] sm:$0xff]  ;;  %v2925_v3 = vld [vmem:[%s8611_s12 + $0x558] sm:$0xff]  ;;  %v2924_v47 = vld [vmem:[%s8611_s12 + $0x550] sm:$0xff] }
 0x333   : > { %5534 = vmatpush1.bf16.msra.mxu0 %v5533_v57  ;;  %v5563_v57 = vpack.c.bf16 %v2897_v13, %v2895_v62  ;;  %v2927_v51 = vld [vmem:[%s8611_s12 + $0x568] sm:$0xff]  ;;  %v2929_v62 = vld [vmem:[%s8611_s12 + $0x578] sm:$0xff] }
 0x334   : > { %5536 = vmatprep.subr.bf16.mxu0 %v5535_v49  ;;  %v2894_v49 = vld [vmem:[%s8611_s12 + $0x460] sm:$0xff] }
 0x335   : > { %v5565_v25 = vpack.c.bf16 %v2896_v19, %v2894_v49  ;;  %v2928_v49 = vld [vmem:[%s8611_s12 + $0x570] sm:$0xff]  ;;  %v2931_v19 = vld [vmem:[%s8611_s12 + $0x588] sm:$0xff] }
 0x336   : > { %v5939_v16 = vpop.eup %5938 }
 0x337   : > { %v5941_v56 = vpop.eup %5940  ;;  %v7227_v0 = vmul.f32 %v5939_v16, %v2335_v41  ;;  %5538 = vmatpush1.bf16.msra.mxu0 %v5537_v12  ;;  %v2898_v12 = vld [vmem:[%s8611_s12 + $0x480] sm:$0xff]  ;;  %v2904_v16 = vld [vmem:[%s8611_s12 + $0x4b0] sm:$0xff] }
 0x338   : > { %v7229_v55 = vmul.f32 %v5941_v56, %v2339_v61  ;;  %5540 = vmatprep.subr.bf16.mxu0 %v5539_v40  ;;  %v2903_v40 = vld [vmem:[%s8611_s12 + $0x4a8] sm:$0xff] }
 0x339   : > { %2554 = vst [vmem:[#allocation3 + $0x1a0] sm:$0xff] %v7227_v0  ;;  %v5571_v1 = vpack.c.bf16 %v2905_v23, %v2903_v40  ;;  %v2907_v56 = vld [vmem:[%s8611_s12 + $0x4c8] sm:$0xff]  ;;  %v2937_v40 = vld [vmem:[%s8611_s12 + $0x5b8] sm:$0xff] }
 0x33a   : > { %v5943_v34 = vpop.eup %5942  ;;  %2555 = vst [vmem:[#allocation3 + $0x1a8] sm:$0xff] %v7229_v55 }
 0x33b   : > { %v5945_v5 = vpop.eup %5944  ;;  %v7245_v26 = vmul.f32 %v5943_v34, %v2335_v41  ;;  %5542 = vmatpush1.bf16.msra.mxu0 %v5541_v35  ;;  %v5567_v41 = vpack.c.bf16 %v2901_v53, %v2899_v20  ;;  %v2909_v35 = vld [vmem:[%s8611_s12 + $0x4d8] sm:$0xff] }
 0x33c   : > { %v7247_v42 = vmul.f32 %v5945_v5, %v2339_v61  ;;  %5544 = vmatprep.subr.bf16.mxu0 %v5543_v46  ;;  %v2900_v61 = vld [vmem:[%s8611_s12 + $0x490] sm:$0xff]  ;;  %v5573_v46 = vpack.c.bf16 %v2904_v16, %v2902_v4  ;;  %v5575_v36 = vpack.c.bf16 %v2909_v35, %v2907_v56  ;;  %v2913_v34 = vld [vmem:[%s8611_s12 + $0x4f8] sm:$0xff]  ;;  %v5577_v5 = vpack.c.bf16 %v2908_v2, %v2906_v43  ;;  %v2939_v16 = vld [vmem:[%s8611_s12 + $0x5c8] sm:$0xff] }
 0x33d   : > { %2560 = vst [vmem:[#allocation3 + $0x1d0] sm:$0xff] %v7245_v26  ;;  %v5569_v24 = vpack.c.bf16 %v2900_v61, %v2898_v12  ;;  %v2933_v20 = vld [vmem:[%s8611_s12 + $0x598] sm:$0xff]  ;;  %v2932_v12 = vld [vmem:[%s8611_s12 + $0x590] sm:$0xff]  ;;  %v2935_v61 = vld [vmem:[%s8611_s12 + $0x5a8] sm:$0xff] }
 0x33e   : > { %2561 = vst [vmem:[#allocation3 + $0x1d8] sm:$0xff] %v7247_v42  ;;  %v2936_v4 = vld [vmem:[%s8611_s12 + $0x5b0] sm:$0xff]  ;;  %v2941_v56 = vld [vmem:[%s8611_s12 + $0x5d8] sm:$0xff]  ;;  %v2943_v2 = vld [vmem:[%s8611_s12 + $0x5e8] sm:$0xff] }
 0x33f   : > { %5546 = vmatpush1.bf16.msra.mxu0 %v5545_v11  ;;  %v5579_v11 = vpack.c.bf16 %v2913_v34, %v2911_v37  ;;  %v2940_v43 = vld [vmem:[%s8611_s12 + $0x5d0] sm:$0xff]  ;;  %v2945_v37 = vld [vmem:[%s8611_s12 + $0x5f8] sm:$0xff] }
 0x340   : > { %5548 = vmatprep.subr.bf16.mxu0 %v5547_v33  ;;  %v2910_v33 = vld [vmem:[%s8611_s12 + $0x4e0] sm:$0xff] }
 0x341   : > { %v5581_v27 = vpack.c.bf16 %v2912_v44, %v2910_v33  ;;  %v2944_v33 = vld [vmem:[%s8611_s12 + $0x5f0] sm:$0xff] }
 0x343   : > { %5550 = vmatpush1.bf16.msra.mxu0 %v5549_v54  ;;  %v5583_v54 = vpack.c.bf16 %v2917_v50, %v2915_v48  ;;  %v3360_v48 = vld [vmem:[#allocation4 + $0x8] sm:$0xff]  ;;  %v3362_v50 = vld [vmem:[#allocation4 + $0x18] sm:$0xff] }
 0x344   : > { %5552 = vmatprep.subr.bf16.mxu0 %v5551_v58  ;;  %v2914_v58 = vld [vmem:[%s8611_s12 + $0x500] sm:$0xff] }
 0x345   : > { %v5585_v22 = vpack.c.bf16 %v2916_v32, %v2914_v58  ;;  %v3361_v58 = vld [vmem:[#allocation4 + $0x10] sm:$0xff] }
 0x346   : > { %3088 = vmatmul.mubr.f32.vlgmr.msra.gmra.mrb[8].mxu0 %v7150_v18 }
 0x347   : > { %3093 = vmatprep.mubr.f32.mxu0 %v7177_v59  ;;  %5554 = vmatpush1.bf16.msra.mxu0 %v5553_v9  ;;  %v5587_v9 = vpack.c.bf16 %v2921_v38, %v2919_v28  ;;  %v3364_v28 = vld [vmem:[#allocation4 + $0x28] sm:$0xff]  ;;  %v3366_v38 = vld [vmem:[#allocation4 + $0x38] sm:$0xff] }
 0x348   : > { %5556 = vmatprep.subr.bf16.mxu0 %v5555_v60  ;;  %v2918_v60 = vld [vmem:[%s8611_s12 + $0x520] sm:$0xff] }
 0x349   : > { %v5589_v30 = vpack.c.bf16 %v2920_v63, %v2918_v60  ;;  %v3365_v60 = vld [vmem:[#allocation4 + $0x30] sm:$0xff] }
 0x34a   : > { %3094 = vmatmul.mubr.f32.gmra.mrb[10].mxu0 %v7169_v8 }
 0x34b   : > { %5558 = vmatpush1.bf16.msra.mxu0 %v5557_v6  ;;  %3164 = vmatprep.mubr.f32.mxu0 %v7229_v55  ;;  %v5591_v6 = vpack.c.bf16 %v2925_v3, %v2923_v52  ;;  %v3368_v52 = vld [vmem:[#allocation4 + $0x48] sm:$0xff]  ;;  %v3370_v3 = vld [vmem:[#allocation4 + $0x58] sm:$0xff] }
 0x34c   : > { %5560 = vmatprep.subr.bf16.mxu0 %v5559_v10  ;;  %v2922_v10 = vld [vmem:[%s8611_s12 + $0x540] sm:$0xff] }
 0x34d   : > { %v5593_v13 = vpack.c.bf16 %v2924_v47, %v2922_v10  ;;  %v3369_v10 = vld [vmem:[#allocation4 + $0x50] sm:$0xff] }
 0x34f   : > { %5562 = vmatpush1.bf16.msra.mxu0 %v5561_v14  ;;  %v5595_v14 = vpack.c.bf16 %v2929_v62, %v2927_v51  ;;  %v3372_v51 = vld [vmem:[#allocation4 + $0x68] sm:$0xff]  ;;  %v3374_v62 = vld [vmem:[#allocation4 + $0x78] sm:$0xff] }
 0x350   : > { %5564 = vmatprep.subr.bf16.mxu0 %v5563_v57  ;;  %v2926_v57 = vld [vmem:[%s8611_s12 + $0x560] sm:$0xff] }
 0x351   : > { %v5597_v53 = vpack.c.bf16 %v2928_v49, %v2926_v57  ;;  %v3373_v57 = vld [vmem:[#allocation4 + $0x70] sm:$0xff] }
 0x353   : > { %5566 = vmatpush1.bf16.msra.mxu0 %v5565_v25  ;;  %v5599_v25 = vpack.c.bf16 %v2933_v20, %v2931_v19  ;;  %v3376_v19 = vld [vmem:[#allocation4 + $0x88] sm:$0xff]  ;;  %v3378_v20 = vld [vmem:[#allocation4 + $0x98] sm:$0xff] }
 0x354   : > { %5568 = vmatprep.subr.bf16.mxu0 %v5567_v41  ;;  %v2930_v41 = vld [vmem:[%s8611_s12 + $0x580] sm:$0xff] }
 0x355   : > { %v5601_v23 = vpack.c.bf16 %v2932_v12, %v2930_v41  ;;  %v3377_v41 = vld [vmem:[#allocation4 + $0x90] sm:$0xff] }
 0x357   : > { %5570 = vmatpush1.bf16.msra.mxu0 %v5569_v24  ;;  %v5603_v24 = vpack.c.bf16 %v2937_v40, %v2935_v61  ;;  %v3380_v61 = vld [vmem:[#allocation4 + $0xa8] sm:$0xff]  ;;  %v3382_v40 = vld [vmem:[#allocation4 + $0xb8] sm:$0xff] }
 0x358   : > { %5572 = vmatprep.subr.bf16.mxu0 %v5571_v1  ;;  %v2934_v1 = vld [vmem:[%s8611_s12 + $0x5a0] sm:$0xff] }
 0x359   : > { %v5605_v35 = vpack.c.bf16 %v2936_v4, %v2934_v1  ;;  %v3381_v1 = vld [vmem:[#allocation4 + $0xb0] sm:$0xff] }
 0x35b   : > { %5574 = vmatpush1.bf16.msra.mxu0 %v5573_v46  ;;  %v5607_v46 = vpack.c.bf16 %v2941_v56, %v2939_v16  ;;  %v3384_v16 = vld [vmem:[#allocation4 + $0xc8] sm:$0xff]  ;;  %v3386_v56 = vld [vmem:[#allocation4 + $0xd8] sm:$0xff] }
 0x35c   : > { %5576 = vmatprep.subr.bf16.mxu0 %v5575_v36  ;;  %v2938_v36 = vld [vmem:[%s8611_s12 + $0x5c0] sm:$0xff] }
 0x35d   : > { %v5609_v34 = vpack.c.bf16 %v2940_v43, %v2938_v36  ;;  %v3385_v36 = vld [vmem:[#allocation4 + $0xd0] sm:$0xff] }
 0x35f   : > { %5578 = vmatpush1.bf16.msra.mxu0 %v5577_v5  ;;  %v5611_v5 = vpack.c.bf16 %v2945_v37, %v2943_v2  ;;  %v3388_v2 = vld [vmem:[#allocation4 + $0xe8] sm:$0xff]  ;;  %v3390_v37 = vld [vmem:[#allocation4 + $0xf8] sm:$0xff] }
 0x360   : > { %5580 = vmatprep.subr.bf16.mxu0 %v5579_v11  ;;  %v2942_v11 = vld [vmem:[%s8611_s12 + $0x5e0] sm:$0xff] }
 0x361   : > { %v5613_v44 = vpack.c.bf16 %v2944_v33, %v2942_v11  ;;  %v3389_v11 = vld [vmem:[#allocation4 + $0xf0] sm:$0xff] }
 0x363   : > { %5582 = vmatpush1.bf16.msra.mxu0 %v5581_v27  ;;  %v5615_v27 = vpack.c.bf16 %v3362_v50, %v3360_v48  ;;  %v3394_v48 = vld [vmem:[#allocation4 + $0x118] sm:$0xff] }
 0x364   : > { %5584 = vmatprep.subr.bf16.mxu0 %v5583_v54  ;;  %v3359_v54 = vld [vmem:[#allocation4] sm:$0xff] }
 0x365   : > { %v5617_v32 = vpack.c.bf16 %v3361_v58, %v3359_v54  ;;  %5616 = vmatprep.subr.bf16.mxu1 %v5615_v27  ;;  %v3391_v27 = vld [vmem:[#allocation4 + $0x100] sm:$0xff]  ;;  %v3393_v54 = vld [vmem:[#allocation4 + $0x110] sm:$0xff] }
 0x366   : > { %v5649_v58 = vpack.c.bf16 %v3393_v54, %v3391_v27 }
 0x367   : > { %5586 = vmatpush1.bf16.msra.mxu0 %v5585_v22  ;;  %5618 = vmatpush1.bf16.msra.mxu1 %v5617_v32  ;;  %v5619_v22 = vpack.c.bf16 %v3366_v38, %v3364_v28  ;;  %v3356_v38 = vld [vmem:[%s8607_s8 + $0x8] sm:$0xff] }
 0x368   : > { %5588 = vmatprep.subr.bf16.mxu0 %v5587_v9  ;;  %v3363_v9 = vld [vmem:[#allocation4 + $0x20] sm:$0xff]  ;;  %4857 = vmatprep.mubr.msk.f32.mxu1 %vm1803_vm3, %v3356_v38 }
 0x369   : > { %v5621_v63 = vpack.c.bf16 %v3365_v60, %v3363_v9  ;;  %5620 = vmatprep.subr.bf16.mxu1 %v5619_v22  ;;  %v3355_v22 = vld [vmem:[%s8607_s8] sm:$0xff] }
 0x36b   : > { %5590 = vmatpush1.bf16.msra.mxu0 %v5589_v30  ;;  %5622 = vmatpush1.bf16.msra.mxu1 %v5621_v63  ;;  %v5623_v30 = vpack.c.bf16 %v3370_v3, %v3368_v52 }
 0x36c   : > { %5592 = vmatprep.subr.bf16.mxu0 %v5591_v6  ;;  %v3367_v6 = vld [vmem:[#allocation4 + $0x40] sm:$0xff] }
 0x36d   : > { %v5625_v47 = vpack.c.bf16 %v3369_v10, %v3367_v6  ;;  %5624 = vmatprep.subr.bf16.mxu1 %v5623_v30  ;;  %v3358_v6 = vld [vmem:[%s8607_s8 + $0x18] sm:$0xff]  ;;  %v3357_v10 = vld [vmem:[%s8607_s8 + $0x10] sm:$0xff] }
 0x36f   : > { %5594 = vmatpush1.bf16.msra.mxu0 %v5593_v13  ;;  %5626 = vmatpush1.bf16.msra.mxu1 %v5625_v47  ;;  %v5627_v13 = vpack.c.bf16 %v3374_v62, %v3372_v51  ;;  %v3316_v47 = vld [vmem:[%s8606_s7 + $0x8] sm:$0xff] }
 0x370   : > { %5596 = vmatprep.subr.bf16.mxu0 %v5595_v14  ;;  %v3371_v14 = vld [vmem:[#allocation4 + $0x60] sm:$0xff] }
 0x371   : > { %v5629_v49 = vpack.c.bf16 %v3373_v57, %v3371_v14  ;;  %5628 = vmatprep.subr.bf16.mxu1 %v5627_v13 }
 0x373   : > { %5598 = vmatpush1.bf16.msra.mxu0 %v5597_v53  ;;  %5630 = vmatpush1.bf16.msra.mxu1 %v5629_v49  ;;  %v5631_v53 = vpack.c.bf16 %v3378_v20, %v3376_v19 }
 0x374   : > { %5600 = vmatprep.subr.bf16.mxu0 %v5599_v25  ;;  %v3375_v25 = vld [vmem:[#allocation4 + $0x80] sm:$0xff] }
 0x375   : > { %v5633_v12 = vpack.c.bf16 %v3377_v41, %v3375_v25  ;;  %5632 = vmatprep.subr.bf16.mxu1 %v5631_v53 }
 0x377   : > { %5602 = vmatpush1.bf16.msra.mxu0 %v5601_v23  ;;  %5634 = vmatpush1.bf16.msra.mxu1 %v5633_v12  ;;  %v5635_v23 = vpack.c.bf16 %v3382_v40, %v3380_v61 }
 0x378   : > { %5604 = vmatprep.subr.bf16.mxu0 %v5603_v24  ;;  %v3379_v24 = vld [vmem:[#allocation4 + $0xa0] sm:$0xff] }
 0x379   : > { %v5637_v4 = vpack.c.bf16 %v3381_v1, %v3379_v24  ;;  %5636 = vmatprep.subr.bf16.mxu1 %v5635_v23 }
 0x37b   : > { %5606 = vmatpush1.bf16.msra.mxu0 %v5605_v35  ;;  %5638 = vmatpush1.bf16.msra.mxu1 %v5637_v4  ;;  %v5639_v35 = vpack.c.bf16 %v3386_v56, %v3384_v16 }
 0x37c   : > { %5608 = vmatprep.subr.bf16.mxu0 %v5607_v46  ;;  %v3383_v46 = vld [vmem:[#allocation4 + $0xc0] sm:$0xff] }
 0x37d   : > { %v5641_v43 = vpack.c.bf16 %v3385_v36, %v3383_v46  ;;  %5640 = vmatprep.subr.bf16.mxu1 %v5639_v35 }
 0x37f   : > { %5610 = vmatpush1.bf16.msra.mxu0 %v5609_v34  ;;  %5642 = vmatpush1.bf16.msra.mxu1 %v5641_v43  ;;  %v5643_v34 = vpack.c.bf16 %v3390_v37, %v3388_v2 }
 0x380   : > { %5612 = vmatprep.subr.bf16.mxu0 %v5611_v5  ;;  %v3387_v5 = vld [vmem:[#allocation4 + $0xe0] sm:$0xff] }
 0x381   : > { %v5645_v33 = vpack.c.bf16 %v3389_v11, %v3387_v5  ;;  %5644 = vmatprep.subr.bf16.mxu1 %v5643_v34 }
 0x383   : > { %5614 = vmatpush1.bf16.msra.mxu0 %v5613_v44  ;;  %5646 = vmatpush1.bf16.msra.mxu1 %v5645_v33  ;;  %v3392_v44 = vld [vmem:[#allocation4 + $0x108] sm:$0xff] }
 0x384   : > { %v5647_v50 = vpack.c.bf16 %v3394_v48, %v3392_v44 }
 0x386   : > { %3165 = vmatmul.mubr.f32.vlgmr.msra.gmra.mrb[8].mxu0 %v7227_v0  ;;  %5648 = vmatprep.subr.bf16.mxu1 %v5647_v50 }
 0x387   : > { %3170 = vmatprep.mubr.f32.mxu0 %v7247_v42  ;;  %5650 = vmatpush1.bf16.msra.mxu1 %v5649_v58 }
 0x38a   : > { %3171 = vmatmul.mubr.f32.gmra.mrb[10].mxu0 %v7245_v26  ;;  %3466 = vmatmul.mubr.f32.vlgmr.msra.gmra.mrb[16].mxu1 %v3355_v22 }
 0x38b   : > { %4858 = vmatprep.mubr.msk.f32.mxu1 %vm1803_vm3, %v3358_v6 }
 0x38e   : > { %3472 = vmatmul.mubr.f32.gmra.mrb[18].mxu1 %v3357_v10 }
 0x38f   : > { %4859 = vmatprep.mubr.msk.f32.mxu1 %vm1803_vm3, %v3316_v47 }
 0x459   : > { %v7456_v32 = vpop.f32.mrb[8].mxu0 }
 0x45a   : > { %v7458_v28 = vpop.f32.mrb[9].mxu0 }
 0x45d   : > { %v7467_v9 = vpop.f32.mrb[10].mxu0 }
 0x45e   : > { %v7469_v60 = vpop.f32.mrb[11].mxu0  ;;  %v5830_v63 = vpack.i.bf16 %v7467_v9, %v7456_v32  ;;  %v5669_v30 = vpack.c.bf16 %v7467_v9, %v7456_v32 }
 0x45f   : > { %v5850_v52 = vpack.i.bf16 %v7469_v60, %v7458_v28  ;;  %v5667_v3 = vpack.c.bf16 %v7469_v60, %v7458_v28 }
 0x460   : > { %5831 = vrot.lane.b32.xlu1 %v5830_v63, %s5987_s30 }
 0x461   : > { %5851 = vrot.lane.b32.xlu0 %v5850_v52, %s5987_s30 }
 0x464   : > { %5836 = vrot.lane.b32.xlu1 %v5830_v63, %s8641_s22 }
 0x465   : > { %5856 = vrot.lane.b32.xlu0 %v5850_v52, %s8641_s22  ;;  %s8659_s22 = smov 18  }
 0x468   : > { %5841 = vrot.lane.b32.xlu1 %v5830_v63, %s8637_s5 }
 0x469   : > { %5861 = vrot.lane.b32.xlu0 %v5850_v52, %s8637_s5  ;;  %s8643_s5 = smov 117  }
 0x46c   : > { %5846 = vrot.lane.b32.xlu1 %v5830_v63, %s5982_s28 }
 0x46d   : > { %5866 = vrot.lane.b32.xlu0 %v5850_v52, %s5982_s28 }
 0x470   : > { %5871 = vrot.lane.b32.xlu1 %v5830_v63, %s8657_s23 }
 0x471   : > { %5891 = vrot.lane.b32.xlu0 %v5850_v52, %s8657_s23 }
 0x474   : > { %5876 = vrot.lane.b32.xlu1 %v5830_v63, %s8639_s24 }
 0x475   : > { %5896 = vrot.lane.b32.xlu0 %v5850_v52, %s8639_s24  ;;  %s8660_s24 = smov 17  }
 0x478   : > { %5881 = vrot.lane.b32.xlu1 %v5830_v63, %s5991_s4 }
 0x479   : > { %5901 = vrot.lane.b32.xlu0 %v5850_v52, %s5991_s4 }
 0x47c   : > { %5886 = vrot.lane.b32.xlu1 %v5830_v63, %s8643_s5  ;;  %v7629_v63 = vld [vmem:[#allocation3 + $0x180] sm:$0xff] }
 0x47d   : > { %5906 = vrot.lane.b32.xlu0 %v5850_v52, %s8643_s5  ;;  %v7633_v52 = vld [vmem:[#allocation3 + $0x1b0] sm:$0xff]  ;;  %s8666_s5 = smov 119  }
 0x480   : > { %2358 = vrot.lane.b32.xlu1 %v7018_v39, %s8658_s27 }
 0x481   : > { %2360 = vrot.lane.b32.xlu0 %v7037_v29, %s8658_s27 }
 0x484   : > { %2362 = vrot.lane.b32.xlu1 %v7020_v17, %s8658_s27 }
 0x485   : > { %2364 = vrot.lane.b32.xlu0 %v7040_v31, %s8658_s27 }
 0x488   : > { %2366 = vrot.lane.b32.xlu1 %v7150_v18, %s8658_s27 }
 0x489   : > { %2368 = vrot.lane.b32.xlu0 %v7169_v8, %s8658_s27 }
 0x48c   : > { %2370 = vrot.lane.b32.xlu1 %v7158_v45, %s8658_s27 }
 0x48d   : > { %2372 = vrot.lane.b32.xlu0 %v7177_v59, %s8658_s27 }
 0x490   : > { %2374 = vrot.lane.b32.xlu1 %v7227_v0, %s8658_s27 }
 0x491   : > { %2376 = vrot.lane.b32.xlu0 %v7245_v26, %s8658_s27 }
 0x494   : > { %2378 = vrot.lane.b32.xlu1 %v7229_v55, %s8658_s27 }
 0x495   : > { %2380 = vrot.lane.b32.xlu0 %v7247_v42, %s8658_s27  ;;  %s8665_s27 = smov 9  }
 0x498   : > { %2406 = vrot.lane.b32.xlu1 %v7018_v39, %s8659_s22 }
 0x499   : > { %2408 = vrot.lane.b32.xlu0 %v7037_v29, %s8659_s22 }
 0x49c   : > { %2410 = vrot.lane.b32.xlu1 %v7020_v17, %s8659_s22 }
 0x49d   : > { %2412 = vrot.lane.b32.xlu0 %v7040_v31, %s8659_s22 }
 0x4a0   : > { %2414 = vrot.lane.b32.xlu1 %v7150_v18, %s8659_s22 }
 0x4a1   : > { %2416 = vrot.lane.b32.xlu0 %v7169_v8, %s8659_s22 }
 0x4a4   : > { %2418 = vrot.lane.b32.xlu1 %v7158_v45, %s8659_s22 }
 0x4a5   : > { %2420 = vrot.lane.b32.xlu0 %v7177_v59, %s8659_s22 }
 0x4a8   : > { %2422 = vrot.lane.b32.xlu1 %v7227_v0, %s8659_s22 }
 0x4a9   : > { %2424 = vrot.lane.b32.xlu0 %v7245_v26, %s8659_s22 }
 0x4ac   : > { %2426 = vrot.lane.b32.xlu1 %v7229_v55, %s8659_s22 }
 0x4ad   : > { %2428 = vrot.lane.b32.xlu0 %v7247_v42, %s8659_s22  ;;  %s8662_s22 = smov 110  }
 0x4b0   : > { %2454 = vrot.lane.b32.xlu1 %v7018_v39, %s8660_s24 }
 0x4b1   : > { %2456 = vrot.lane.b32.xlu0 %v7037_v29, %s8660_s24 }
 0x4b4   : > { %2458 = vrot.lane.b32.xlu1 %v7020_v17, %s8660_s24 }
 0x4b5   : > { %2460 = vrot.lane.b32.xlu0 %v7040_v31, %s8660_s24 }
 0x4b8   : > { %2462 = vrot.lane.b32.xlu1 %v7150_v18, %s8660_s24 }
 0x4b9   : > { %2464 = vrot.lane.b32.xlu0 %v7169_v8, %s8660_s24 }
 0x4bc   : > { %2466 = vrot.lane.b32.xlu1 %v7158_v45, %s8660_s24 }
 0x4bd   : > { %2468 = vrot.lane.b32.xlu0 %v7177_v59, %s8660_s24 }
 0x4c0   : > { %2470 = vrot.lane.b32.xlu1 %v7227_v0, %s8660_s24 }
 0x4c1   : > { %2472 = vrot.lane.b32.xlu0 %v7245_v26, %s8660_s24 }
 0x4c4   : > { %2474 = vrot.lane.b32.xlu1 %v7229_v55, %s8660_s24 }
 0x4c5   : > { %2476 = vrot.lane.b32.xlu0 %v7247_v42, %s8660_s24 }
 0x4c8   : > { %2502 = vrot.lane.b32.xlu1 %v7018_v39, %s5982_s28 }
 0x4c9   : > { %2504 = vrot.lane.b32.xlu0 %v7037_v29, %s5982_s28 }
 0x4cc   : > { %2506 = vrot.lane.b32.xlu1 %v7020_v17, %s5982_s28 }
 0x4cd   : > { %2508 = vrot.lane.b32.xlu0 %v7040_v31, %s5982_s28 }
 0x4d0   : > { %2510 = vrot.lane.b32.xlu1 %v7150_v18, %s5982_s28 }
 0x4d1   : > { %2512 = vrot.lane.b32.xlu0 %v7169_v8, %s5982_s28 }
 0x4d2   : > { %v5832_v51 = vpop.permute.xlu1 %5831 }
 0x4d3   : > { %v5834_v62 = vunpack.i.h.bf16 %v5832_v51  ;;  %v5833_v13 = vunpack.i.l.bf16 %v5832_v51  ;;  %v5852_v39 = vpop.permute.xlu0 %5851 }
 0x4d4   : > { %v5854_v14 = vunpack.i.h.bf16 %v5852_v39  ;;  %v5853_v29 = vunpack.i.l.bf16 %v5852_v39  ;;  %2514 = vrot.lane.b32.xlu1 %v7158_v45, %s5982_s28 }
 0x4d5   : > { %2516 = vrot.lane.b32.xlu0 %v7177_v59, %s5982_s28 }
 0x4d6   : > { %v3189_v17 = vsel %vm3185_vm12, %v5854_v14, %v5834_v62  ;;  %v3188_v31 = vsel %vm3185_vm12, %v5853_v29, %v5833_v13  ;;  %v5837_v57 = vpop.permute.xlu1 %5836  ;;  %v3186_v49 = vsel %vm3185_vm12, %v5833_v13, %v5853_v29  ;;  %v3187_v19 = vsel %vm3185_vm12, %v5834_v62, %v5854_v14 }
 0x4d7   : > { %v5839_v20 = vunpack.i.h.bf16 %v5837_v57  ;;  %v5838_v53 = vunpack.i.l.bf16 %v5837_v57  ;;  %v5857_v25 = vpop.permute.xlu0 %5856  ;;  %v5651_v41 = vpack.c.bf16 %v3187_v19, %v3186_v49  ;;  %v5653_v12 = vpack.c.bf16 %v3189_v17, %v3188_v31  ;;  %v7645_v49 = vld [vmem:[#allocation3 + $0x188] sm:$0xff]  ;;  %v7649_v19 = vld [vmem:[#allocation3 + $0x1b8] sm:$0xff] }
 0x4d8   : > { %v5859_v61 = vunpack.i.h.bf16 %v5857_v25  ;;  %v5858_v40 = vunpack.i.l.bf16 %v5857_v25  ;;  %2518 = vrot.lane.b32.xlu1 %v7227_v0, %s5982_s28 }
 0x4d9   : > { %2520 = vrot.lane.b32.xlu0 %v7245_v26, %s5982_s28  ;;  %5652 = vmatprep.subr.bf16.mxu1 %v5651_v41 }
 0x4da   : > { %v3206_v23 = vsel %vm3202_vm13, %v5859_v61, %v5839_v20  ;;  %v3205_v24 = vsel %vm3202_vm13, %v5858_v40, %v5838_v53  ;;  %v5842_v1 = vpop.permute.xlu1 %5841  ;;  %5654 = vmatpush1.bf16.msra.mxu1 %v5653_v12  ;;  %v3203_v4 = vsel %vm3202_vm13, %v5838_v53, %v5858_v40  ;;  %v3204_v16 = vsel %vm3202_vm13, %v5839_v20, %v5859_v61 }
 0x4db   : > { %v5844_v56 = vunpack.i.h.bf16 %v5842_v1  ;;  %v5843_v35 = vunpack.i.l.bf16 %v5842_v1  ;;  %v5862_v46 = vpop.permute.xlu0 %5861  ;;  %v5655_v36 = vpack.c.bf16 %v3204_v16, %v3203_v4  ;;  %v5657_v43 = vpack.c.bf16 %v3206_v23, %v3205_v24 }
 0x4dc   : > { %v5864_v2 = vunpack.i.h.bf16 %v5862_v46  ;;  %v5863_v37 = vunpack.i.l.bf16 %v5862_v46  ;;  %2522 = vrot.lane.b32.xlu1 %v7229_v55, %s5982_s28 }
 0x4dd   : > { %2524 = vrot.lane.b32.xlu0 %v7247_v42, %s5982_s28  ;;  %5656 = vmatprep.subr.bf16.mxu1 %v5655_v36 }
 0x4de   : > { %v3223_v34 = vsel %vm3219_vm14, %v5864_v2, %v5844_v56  ;;  %v3222_v5 = vsel %vm3219_vm14, %v5863_v37, %v5843_v35  ;;  %v5847_v11 = vpop.permute.xlu1 %5846  ;;  %5658 = vmatpush1.bf16.msra.mxu1 %v5657_v43  ;;  %v3220_v33 = vsel %vm3219_vm14, %v5843_v35, %v5863_v37  ;;  %v3221_v44 = vsel %vm3219_vm14, %v5844_v56, %v5864_v2 }
 0x4df   : > { %v5849_v48 = vunpack.i.h.bf16 %v5847_v11  ;;  %v5848_v50 = vunpack.i.l.bf16 %v5847_v11  ;;  %v5867_v27 = vpop.permute.xlu0 %5866  ;;  %v5659_v54 = vpack.c.bf16 %v3221_v44, %v3220_v33  ;;  %v5661_v58 = vpack.c.bf16 %v3223_v34, %v3222_v5 }
 0x4e0   : > { %v5869_v38 = vunpack.i.h.bf16 %v5867_v27  ;;  %v5868_v22 = vunpack.i.l.bf16 %v5867_v27  ;;  %2562 = vrot.lane.b32.xlu1 %v7629_v63, %s8657_s23 }
 0x4e1   : > { %2564 = vrot.lane.b32.xlu0 %v7633_v52, %s8657_s23  ;;  %5660 = vmatprep.subr.bf16.mxu1 %v5659_v54 }
 0x4e2   : > { %v3239_v6 = vsel %vm1516_vm6, %v5869_v38, %v5849_v48  ;;  %v3238_v10 = vsel %vm1516_vm6, %v5868_v22, %v5848_v50  ;;  %v5872_v47 = vpop.permute.xlu1 %5871  ;;  %5662 = vmatpush1.bf16.msra.mxu1 %v5661_v58  ;;  %v3236_v51 = vsel %vm1516_vm6, %v5848_v50, %v5868_v22  ;;  %v3237_v62 = vsel %vm1516_vm6, %v5849_v48, %v5869_v38 }
 0x4e3   : > { %v5874_v13 = vunpack.i.h.bf16 %v5872_v47  ;;  %v5873_v39 = vunpack.i.l.bf16 %v5872_v47  ;;  %v5892_v14 = vpop.permute.xlu0 %5891  ;;  %v5663_v29 = vpack.c.bf16 %v3237_v62, %v3236_v51  ;;  %v5665_v17 = vpack.c.bf16 %v3239_v6, %v3238_v10 }
 0x4e4   : > { %v5894_v31 = vunpack.i.h.bf16 %v5892_v14  ;;  %v5893_v57 = vunpack.i.l.bf16 %v5892_v14  ;;  %2566 = vrot.lane.b32.xlu1 %v7645_v49, %s8657_s23  ;;  %v3315_v14 = vld [vmem:[%s8606_s7] sm:$0xff] }
 0x4e5   : > { %2568 = vrot.lane.b32.xlu0 %v7649_v19, %s8657_s23  ;;  %5664 = vmatprep.subr.bf16.mxu1 %v5663_v29 }
 0x4e6   : > { %v5877_v20 = vpop.permute.xlu1 %5876  ;;  %5666 = vmatpush1.bf16.msra.mxu1 %v5665_v17  ;;  %v3258_v53 = vsel %vm1547_vm8, %v5893_v57, %v5873_v39  ;;  %v3259_v25 = vsel %vm1547_vm8, %v5894_v31, %v5874_v13  ;;  %v3257_v24 = vsel %vm1547_vm8, %v5874_v13, %v5894_v31  ;;  %v3256_v1 = vsel %vm1547_vm8, %v5873_v39, %v5893_v57  ;;  %v3561_v39 = vld [vmem:[%s8608_s9] sm:$0xff]  ;;  %v3318_v31 = vld [vmem:[%s8606_s7 + $0x18] sm:$0xff] }
 0x4e7   : > { %v5879_v41 = vunpack.i.h.bf16 %v5877_v20  ;;  %v5878_v12 = vunpack.i.l.bf16 %v5877_v20  ;;  %v5897_v61 = vpop.permute.xlu0 %5896  ;;  %5668 = vmatprep.subr.bf16.mxu1 %v5667_v3  ;;  %v5671_v4 = vpack.c.bf16 %v3259_v25, %v3258_v53  ;;  %v5673_v46 = vpack.c.bf16 %v3257_v24, %v3256_v1  ;;  %v3562_v20 = vld [vmem:[%s8608_s9 + $0x8] sm:$0xff]  ;;  %v3317_v25 = vld [vmem:[%s8606_s7 + $0x10] sm:$0xff] }
 0x4e8   : > { %v5899_v40 = vunpack.i.h.bf16 %v5897_v61  ;;  %v5898_v23 = vunpack.i.l.bf16 %v5897_v61  ;;  %2570 = vrot.lane.b32.xlu1 %v7150_v18, %s8657_s23 }
 0x4e9   : > { %2572 = vrot.lane.b32.xlu0 %v7169_v8, %s8657_s23 }
 0x4ea   : > { %v5882_v16 = vpop.permute.xlu1 %5881  ;;  %5670 = vmatpush1.bf16.msra.mxu1 %v5669_v30  ;;  %v3275_v28 = vsel %vm3272_vm15, %v5898_v23, %v5878_v12  ;;  %v3276_v18 = vsel %vm3272_vm15, %v5899_v40, %v5879_v41  ;;  %v3274_v32 = vsel %vm3272_vm15, %v5879_v41, %v5899_v40  ;;  %v3273_v9 = vsel %vm3272_vm15, %v5878_v12, %v5898_v23 }
 0x4eb   : > { %v5884_v60 = vunpack.i.h.bf16 %v5882_v16  ;;  %v5883_v3 = vunpack.i.l.bf16 %v5882_v16  ;;  %v5902_v56 = vpop.permute.xlu0 %5901  ;;  %5672 = vmatprep.subr.bf16.mxu1 %v5671_v4  ;;  %v5675_v30 = vpack.c.bf16 %v3276_v18, %v3275_v28  ;;  %v7750_v4 = vld [vmem:[#allocation3 + $0x190] sm:$0xff]  ;;  %v7754_v16 = vld [vmem:[#allocation3 + $0x1c0] sm:$0xff] }
 0x4ec   : > { %v5904_v35 = vunpack.i.h.bf16 %v5902_v56  ;;  %v5903_v8 = vunpack.i.l.bf16 %v5902_v56  ;;  %2574 = vrot.lane.b32.xlu1 %v7158_v45, %s8657_s23 }
 0x4ed   : > { %2576 = vrot.lane.b32.xlu0 %v7177_v59, %s8657_s23  ;;  %v5677_v59 = vpack.c.bf16 %v3274_v32, %v3273_v9 }
 0x4ee   : > { %v5887_v36 = vpop.permute.xlu1 %5886  ;;  %5674 = vmatpush1.bf16.msra.mxu1 %v5673_v46  ;;  %v3292_v43 = vsel %vm3289_vm0, %v5903_v8, %v5883_v3  ;;  %v3293_v2 = vsel %vm3289_vm0, %v5904_v35, %v5884_v60  ;;  %v3291_v33 = vsel %vm3289_vm0, %v5884_v60, %v5904_v35  ;;  %v3290_v44 = vsel %vm3289_vm0, %v5883_v3, %v5903_v8  ;;  %v7766_v8 = vld [vmem:[#allocation3 + $0x198] sm:$0xff]  ;;  %v7770_v46 = vld [vmem:[#allocation3 + $0x1c8] sm:$0xff] }
 0x4ef   : > { %v5889_v45 = vunpack.i.h.bf16 %v5887_v36  ;;  %v5888_v37 = vunpack.i.l.bf16 %v5887_v36  ;;  %v5907_v34 = vpop.permute.xlu0 %5906  ;;  %5676 = vmatprep.subr.bf16.mxu1 %v5675_v30  ;;  %v5679_v48 = vpack.c.bf16 %v3293_v2, %v3292_v43  ;;  %v5681_v58 = vpack.c.bf16 %v3291_v33, %v3290_v44  ;;  %v7774_v30 = vld [vmem:[#allocation3 + $0x1a0] sm:$0xff] }
 0x4f0   : > { %v5909_v5 = vunpack.i.h.bf16 %v5907_v34  ;;  %v5908_v11 = vunpack.i.l.bf16 %v5907_v34  ;;  %2578 = vrot.lane.b32.xlu1 %v7227_v0, %s8657_s23 }
 0x4f1   : > { %2580 = vrot.lane.b32.xlu0 %v7245_v26, %s8657_s23 }
 0x4f2   : > { %v2359_v50 = vpop.permute.xlu1 %2358  ;;  %5678 = vmatpush1.bf16.msra.mxu1 %v5677_v59  ;;  %v3309_v27 = vsel %vm3306_vm1, %v5908_v11, %v5888_v37  ;;  %v3310_v54 = vsel %vm3306_vm1, %v5909_v5, %v5889_v45  ;;  %v3308_v38 = vsel %vm3306_vm1, %v5889_v45, %v5909_v5  ;;  %v3307_v22 = vsel %vm3306_vm1, %v5888_v37, %v5908_v11  ;;  %v7784_v37 = vld [vmem:[#allocation3 + $0x1a8] sm:$0xff] }
 0x4f3   : > { %v2361_v0 = vpop.permute.xlu0 %2360  ;;  %5680 = vmatprep.subr.bf16.mxu1 %v5679_v48  ;;  %v5683_v6 = vpack.c.bf16 %v3310_v54, %v3309_v27  ;;  %v5685_v62 = vpack.c.bf16 %v3308_v38, %v3307_v22 }
 0x4f4   : > { %2582 = vrot.lane.b32.xlu1 %v7229_v55, %s8657_s23 }
 0x4f5   : > { %2584 = vrot.lane.b32.xlu0 %v7247_v42, %s8657_s23 }
 0x4f6   : > { %v2363_v10 = vpop.permute.xlu1 %2362  ;;  %5682 = vmatpush1.bf16.msra.mxu1 %v5681_v58 }
 0x4f7   : > { %v2390_v47 = vsel %vm1441_vm7, %v2359_v50, %v2363_v10  ;;  %v2365_v51 = vpop.permute.xlu0 %2364  ;;  %5684 = vmatprep.subr.bf16.mxu1 %v5683_v6 }
 0x4f8   : > { %2395 = vst [vmem:[#allocation3 + $0x8] sm:$0xff] %v2390_v47  ;;  %v2391_v55 = vsel %vm1441_vm7, %v2361_v0, %v2365_v51  ;;  %2610 = vrot.lane.b32.xlu1 %v7629_v63, %s8661_s0 }
 0x4f9   : > { %2401 = vst [vmem:[#allocation3 + $0x38] sm:$0xff] %v2391_v55  ;;  %2612 = vrot.lane.b32.xlu0 %v7633_v52, %s8661_s0  ;;  %v5964_v55 = vld [vmem:[#allocation3 + $0x1d0] sm:$0xff] }
 0x4fa   : > { %v2367_v13 = vpop.permute.xlu1 %2366  ;;  %5686 = vmatpush1.bf16.msra.mxu1 %v5685_v62 }
 0x4fb   : > { %v2388_v29 = vsel %vm1441_vm7, %v2363_v10, %v2367_v13  ;;  %v2369_v17 = vpop.permute.xlu0 %2368 }
 0x4fc   : > { %2396 = vst [vmem:[#allocation3 + $0x10] sm:$0xff] %v2388_v29  ;;  %v2389_v57 = vsel %vm1441_vm7, %v2365_v51, %v2369_v17  ;;  %2614 = vrot.lane.b32.xlu1 %v7645_v49, %s8661_s0  ;;  %v5965_v29 = vld [vmem:[#allocation3 + $0x1d8] sm:$0xff] }
 0x4fd   : > { %2402 = vst [vmem:[#allocation3 + $0x40] sm:$0xff] %v2389_v57  ;;  %3565 = vperm.xlu0 %5828, %v3561_v39   ;;  %3549 = vmatmul.mubr.f32.vlgmr.msra.gmra.mrb[16].mxu1 %v3315_v14 }
 0x4fe   : > { %v2371_v53 = vpop.permute.xlu1 %2370  ;;  %4860 = vmatprep.mubr.msk.f32.mxu1 %vm1803_vm3, %v3318_v31 }
 0x4ff   : > { %v2386_v41 = vsel %vm1441_vm7, %v2367_v13, %v2371_v53  ;;  %v2373_v12 = vpop.permute.xlu0 %2372 }
 0x500   : > { %2397 = vst [vmem:[#allocation3 + $0x18] sm:$0xff] %v2386_v41  ;;  %v2387_v61 = vsel %vm1441_vm7, %v2369_v17, %v2373_v12  ;;  %3570 = vperm.xlu1 %5829, %v3562_v20  }
 0x501   : > { %2403 = vst [vmem:[#allocation3 + $0x48] sm:$0xff] %v2387_v61  ;;  %2616 = vrot.lane.b32.xlu0 %v7649_v19, %s8661_s0  ;;  %3555 = vmatmul.mubr.f32.gmra.mrb[18].mxu1 %v3317_v25 }
 0x502   : > { %v2375_v40 = vpop.permute.xlu1 %2374 }
 0x503   : > { %v2384_v23 = vsel %vm1441_vm7, %v2371_v53, %v2375_v40  ;;  %v2377_v24 = vpop.permute.xlu0 %2376 }
 0x504   : > { %2398 = vst [vmem:[#allocation3 + $0x20] sm:$0xff] %v2384_v23  ;;  %v2385_v1 = vsel %vm1441_vm7, %v2373_v12, %v2377_v24  ;;  %2618 = vrot.lane.b32.xlu1 %v7750_v4, %s8661_s0 }
 0x505   : > { %2404 = vst [vmem:[#allocation3 + $0x50] sm:$0xff] %v2385_v1  ;;  %2620 = vrot.lane.b32.xlu0 %v7754_v16, %s8661_s0 }
 0x506   : > { %v2379_v28 = vpop.permute.xlu1 %2378 }
 0x507   : > { %v2382_v18 = vsel %vm1441_vm7, %v2375_v40, %v2379_v28  ;;  %v2392_v60 = vsel %vm1441_vm7, %v2379_v28, %v2359_v50  ;;  %v2381_v3 = vpop.permute.xlu0 %2380 }
 0x508   : > { %2394 = vst [vmem:[#allocation3] sm:$0xff] %v2392_v60  ;;  %2399 = vst [vmem:[#allocation3 + $0x28] sm:$0xff] %v2382_v18  ;;  %v2383_v56 = vsel %vm1441_vm7, %v2377_v24, %v2381_v3  ;;  %v2393_v35 = vsel %vm1441_vm7, %v2381_v3, %v2361_v0  ;;  %2622 = vrot.lane.b32.xlu1 %v7766_v8, %s8661_s0 }
 0x509   : > { %2400 = vst [vmem:[#allocation3 + $0x30] sm:$0xff] %v2393_v35  ;;  %2405 = vst [vmem:[#allocation3 + $0x58] sm:$0xff] %v2383_v56  ;;  %2624 = vrot.lane.b32.xlu0 %v7770_v46, %s8661_s0 }
 0x50a   : > { %v2407_v32 = vpop.permute.xlu1 %2406 }
 0x50b   : > { %v2409_v9 = vpop.permute.xlu0 %2408 }
 0x50c   : > { %2626 = vrot.lane.b32.xlu1 %v7774_v30, %s8661_s0 }
 0x50d   : > { %2628 = vrot.lane.b32.xlu0 %v7245_v26, %s8661_s0 }
 0x50e   : > { %v2411_v36 = vpop.permute.xlu1 %2410 }
 0x50f   : > { %v2438_v43 = vsel %vm1466_vm4, %v2407_v32, %v2411_v36  ;;  %v2413_v2 = vpop.permute.xlu0 %2412 }
 0x510   : > { %2443 = vst [vmem:[#allocation3 + $0x68] sm:$0xff] %v2438_v43  ;;  %v2439_v45 = vsel %vm1466_vm4, %v2409_v9, %v2413_v2  ;;  %2630 = vrot.lane.b32.xlu1 %v7784_v37, %s8661_s0 }
 0x511   : > { %2449 = vst [vmem:[#allocation3 + $0x98] sm:$0xff] %v2439_v45  ;;  %2632 = vrot.lane.b32.xlu0 %v7247_v42, %s8661_s0  ;;  %s8663_s0 = smov 109  }
 0x512   : > { %v2415_v34 = vpop.permute.xlu1 %2414 }
 0x513   : > { %v2436_v26 = vsel %vm1466_vm4, %v2411_v36, %v2415_v34  ;;  %v2417_v5 = vpop.permute.xlu0 %2416 }
 0x514   : > { %2444 = vst [vmem:[#allocation3 + $0x70] sm:$0xff] %v2436_v26  ;;  %v2437_v11 = vsel %vm1466_vm4, %v2413_v2, %v2417_v5  ;;  %2658 = vrot.lane.b32.xlu1 %v7629_v63, %s8662_s22 }
 0x515   : > { %2450 = vst [vmem:[#allocation3 + $0xa0] sm:$0xff] %v2437_v11  ;;  %2660 = vrot.lane.b32.xlu0 %v7633_v52, %s8662_s22 }
 0x516   : > { %v2419_v59 = vpop.permute.xlu1 %2418 }
 0x517   : > { %v2434_v42 = vsel %vm1466_vm4, %v2415_v34, %v2419_v59  ;;  %v2421_v33 = vpop.permute.xlu0 %2420 }
 0x518   : > { %2445 = vst [vmem:[#allocation3 + $0x78] sm:$0xff] %v2434_v42  ;;  %v2435_v44 = vsel %vm1466_vm4, %v2417_v5, %v2421_v33  ;;  %2662 = vrot.lane.b32.xlu1 %v7645_v49, %s8662_s22 }
 0x519   : > { %2451 = vst [vmem:[#allocation3 + $0xa8] sm:$0xff] %v2435_v44  ;;  %2664 = vrot.lane.b32.xlu0 %v7649_v19, %s8662_s22 }
 0x51a   : > { %v2423_v48 = vpop.permute.xlu1 %2422 }
 0x51b   : > { %v2432_v50 = vsel %vm1466_vm4, %v2419_v59, %v2423_v48  ;;  %v2425_v27 = vpop.permute.xlu0 %2424 }
 0x51c   : > { %2446 = vst [vmem:[#allocation3 + $0x80] sm:$0xff] %v2432_v50  ;;  %v2433_v54 = vsel %vm1466_vm4, %v2421_v33, %v2425_v27  ;;  %2666 = vrot.lane.b32.xlu1 %v7750_v4, %s8662_s22 }
 0x51d   : > { %2452 = vst [vmem:[#allocation3 + $0xb0] sm:$0xff] %v2433_v54  ;;  %2668 = vrot.lane.b32.xlu0 %v7754_v16, %s8662_s22 }
 0x51e   : > { %v2427_v0 = vpop.permute.xlu1 %2426 }
 0x51f   : > { %v2430_v58 = vsel %vm1466_vm4, %v2423_v48, %v2427_v0  ;;  %v2440_v38 = vsel %vm1466_vm4, %v2427_v0, %v2407_v32  ;;  %v2429_v22 = vpop.permute.xlu0 %2428 }
 0x520   : > { %2442 = vst [vmem:[#allocation3 + $0x60] sm:$0xff] %v2440_v38  ;;  %2447 = vst [vmem:[#allocation3 + $0x88] sm:$0xff] %v2430_v58  ;;  %v2431_v6 = vsel %vm1466_vm4, %v2425_v27, %v2429_v22  ;;  %v2441_v10 = vsel %vm1466_vm4, %v2429_v22, %v2409_v9  ;;  %2670 = vrot.lane.b32.xlu1 %v7766_v8, %s8662_s22  ;;  %vm4795_vm4 = vcmask (!%p4861_p5), 15360  }
 0x521   : > { %2448 = vst [vmem:[#allocation3 + $0x90] sm:$0xff] %v2441_v10  ;;  %2453 = vst [vmem:[#allocation3 + $0xb8] sm:$0xff] %v2431_v6  ;;  %2672 = vrot.lane.b32.xlu0 %v7770_v46, %s8662_s22 }
 0x522   : > { %v2455_v47 = vpop.permute.xlu1 %2454 }
 0x523   : > { %v2457_v51 = vpop.permute.xlu0 %2456 }
 0x524   : > { %2674 = vrot.lane.b32.xlu1 %v7774_v30, %s8662_s22 }
 0x525   : > { %2676 = vrot.lane.b32.xlu0 %v5964_v55, %s8662_s22 }
 0x526   : > { %v2459_v62 = vpop.permute.xlu1 %2458 }
 0x527   : > { %v2486_v13 = vsel %vm1491_vm5, %v2455_v47, %v2459_v62  ;;  %v2461_v39 = vpop.permute.xlu0 %2460 }
 0x528   : > { %2491 = vst [vmem:[#allocation3 + $0xc8] sm:$0xff] %v2486_v13  ;;  %v2487_v14 = vsel %vm1491_vm5, %v2457_v51, %v2461_v39  ;;  %2678 = vrot.lane.b32.xlu1 %v7784_v37, %s8662_s22 }
 0x529   : > { %2497 = vst [vmem:[#allocation3 + $0xf8] sm:$0xff] %v2487_v14  ;;  %2680 = vrot.lane.b32.xlu0 %v5965_v29, %s8662_s22  ;;  %s8667_s22 = smov 117  }
 0x52a   : > { %v2463_v17 = vpop.permute.xlu1 %2462 }
 0x52b   : > { %v2484_v31 = vsel %vm1491_vm5, %v2459_v62, %v2463_v17  ;;  %v2465_v57 = vpop.permute.xlu0 %2464 }
 0x52c   : > { %2492 = vst [vmem:[#allocation3 + $0xd0] sm:$0xff] %v2484_v31  ;;  %v2485_v20 = vsel %vm1491_vm5, %v2461_v39, %v2465_v57  ;;  %2706 = vrot.lane.b32.xlu1 %v7629_v63, %s8663_s0 }
 0x52d   : > { %2498 = vst [vmem:[#allocation3 + $0x100] sm:$0xff] %v2485_v20  ;;  %2708 = vrot.lane.b32.xlu0 %v7633_v52, %s8663_s0 }
 0x52e   : > { %v2467_v53 = vpop.permute.xlu1 %2466 }
 0x52f   : > { %v2482_v25 = vsel %vm1491_vm5, %v2463_v17, %v2467_v53  ;;  %v2469_v41 = vpop.permute.xlu0 %2468 }
 0x530   : > { %2493 = vst [vmem:[#allocation3 + $0xd8] sm:$0xff] %v2482_v25  ;;  %v2483_v12 = vsel %vm1491_vm5, %v2465_v57, %v2469_v41  ;;  %2710 = vrot.lane.b32.xlu1 %v7645_v49, %s8663_s0 }
 0x531   : > { %2499 = vst [vmem:[#allocation3 + $0x108] sm:$0xff] %v2483_v12  ;;  %2712 = vrot.lane.b32.xlu0 %v7649_v19, %s8663_s0 }
 0x532   : > { %v2471_v63 = vpop.permute.xlu1 %2470 }
 0x533   : > { %v2480_v52 = vsel %vm1491_vm5, %v2467_v53, %v2471_v63  ;;  %v2473_v61 = vpop.permute.xlu0 %2472 }
 0x534   : > { %2494 = vst [vmem:[#allocation3 + $0xe0] sm:$0xff] %v2480_v52  ;;  %v2481_v40 = vsel %vm1491_vm5, %v2469_v41, %v2473_v61  ;;  %2714 = vrot.lane.b32.xlu1 %v7750_v4, %s8663_s0 }
 0x535   : > { %2500 = vst [vmem:[#allocation3 + $0x110] sm:$0xff] %v2481_v40  ;;  %2716 = vrot.lane.b32.xlu0 %v7754_v16, %s8663_s0 }
 0x536   : > { %v2475_v49 = vpop.permute.xlu1 %2474 }
 0x537   : > { %v2478_v19 = vsel %vm1491_vm5, %v2471_v63, %v2475_v49  ;;  %v2488_v23 = vsel %vm1491_vm5, %v2475_v49, %v2455_v47  ;;  %v2477_v24 = vpop.permute.xlu0 %2476 }
 0x538   : > { %2490 = vst [vmem:[#allocation3 + $0xc0] sm:$0xff] %v2488_v23  ;;  %2495 = vst [vmem:[#allocation3 + $0xe8] sm:$0xff] %v2478_v19  ;;  %v2479_v1 = vsel %vm1491_vm5, %v2473_v61, %v2477_v24  ;;  %v2489_v4 = vsel %vm1491_vm5, %v2477_v24, %v2457_v51  ;;  %2718 = vrot.lane.b32.xlu1 %v7766_v8, %s8663_s0 }
 0x539   : > { %2496 = vst [vmem:[#allocation3 + $0xf0] sm:$0xff] %v2489_v4  ;;  %2501 = vst [vmem:[#allocation3 + $0x118] sm:$0xff] %v2479_v1  ;;  %2720 = vrot.lane.b32.xlu0 %v7770_v46, %s8663_s0 }
 0x53a   : > { %v2503_v16 = vpop.permute.xlu1 %2502 }
 0x53b   : > { %v2505_v28 = vpop.permute.xlu0 %2504 }
 0x53c   : > { %2722 = vrot.lane.b32.xlu1 %v7774_v30, %s8663_s0 }
 0x53d   : > { %2724 = vrot.lane.b32.xlu0 %v5964_v55, %s8663_s0 }
 0x53e   : > { %v2507_v18 = vpop.permute.xlu1 %2506 }
 0x53f   : > { %v2534_v60 = vsel %vm1516_vm6, %v2503_v16, %v2507_v18  ;;  %v2509_v3 = vpop.permute.xlu0 %2508 }
 0x540   : > { %2539 = vst [vmem:[#allocation3 + $0x128] sm:$0xff] %v2534_v60  ;;  %v2535_v56 = vsel %vm1516_vm6, %v2505_v28, %v2509_v3  ;;  %2726 = vrot.lane.b32.xlu1 %v7784_v37, %s8663_s0 }
 0x541   : > { %2545 = vst [vmem:[#allocation3 + $0x158] sm:$0xff] %v2535_v56  ;;  %2728 = vrot.lane.b32.xlu0 %v5965_v29, %s8663_s0 }
 0x542   : > { %v2511_v35 = vpop.permute.xlu1 %2510 }
 0x543   : > { %v2532_v8 = vsel %vm1516_vm6, %v2507_v18, %v2511_v35  ;;  %v2513_v46 = vpop.permute.xlu0 %2512 }
 0x544   : > { %2540 = vst [vmem:[#allocation3 + $0x130] sm:$0xff] %v2532_v8  ;;  %v2533_v32 = vsel %vm1516_vm6, %v2509_v3, %v2513_v46 }
 0x545   : > { %2546 = vst [vmem:[#allocation3 + $0x160] sm:$0xff] %v2533_v32 }
 0x546   : > { %v2515_v9 = vpop.permute.xlu1 %2514 }
 0x547   : > { %v2530_v30 = vsel %vm1516_vm6, %v2511_v35, %v2515_v9  ;;  %v2517_v36 = vpop.permute.xlu0 %2516 }
 0x548   : > { %2541 = vst [vmem:[#allocation3 + $0x138] sm:$0xff] %v2530_v30  ;;  %v2531_v43 = vsel %vm1516_vm6, %v2513_v46, %v2517_v36 }
 0x549   : > { %2547 = vst [vmem:[#allocation3 + $0x168] sm:$0xff] %v2531_v43 }
 0x54a   : > { %v2519_v2 = vpop.permute.xlu1 %2518 }
 0x54b   : > { %v2528_v45 = vsel %vm1516_vm6, %v2515_v9, %v2519_v2  ;;  %v2521_v37 = vpop.permute.xlu0 %2520 }
 0x54c   : > { %2542 = vst [vmem:[#allocation3 + $0x140] sm:$0xff] %v2528_v45  ;;  %v2529_v34 = vsel %vm1516_vm6, %v2517_v36, %v2521_v37 }
 0x54d   : > { %2548 = vst [vmem:[#allocation3 + $0x170] sm:$0xff] %v2529_v34 }
 0x54e   : > { %v2523_v26 = vpop.permute.xlu1 %2522 }
 0x54f   : > { %v2526_v5 = vsel %vm1516_vm6, %v2519_v2, %v2523_v26  ;;  %v2536_v11 = vsel %vm1516_vm6, %v2523_v26, %v2503_v16  ;;  %v2525_v59 = vpop.permute.xlu0 %2524 }
 0x550   : > { %2538 = vst [vmem:[#allocation3 + $0x120] sm:$0xff] %v2536_v11  ;;  %2543 = vst [vmem:[#allocation3 + $0x148] sm:$0xff] %v2526_v5  ;;  %v2527_v42 = vsel %vm1516_vm6, %v2521_v37, %v2525_v59  ;;  %v2537_v33 = vsel %vm1516_vm6, %v2525_v59, %v2505_v28 }
 0x551   : > { %2544 = vst [vmem:[#allocation3 + $0x150] sm:$0xff] %v2537_v33  ;;  %2549 = vst [vmem:[#allocation3 + $0x178] sm:$0xff] %v2527_v42 }
 0x552   : > { %v2563_v44 = vpop.permute.xlu1 %2562 }
 0x553   : > { %v2565_v48 = vpop.permute.xlu0 %2564 }
 0x556   : > { %v2567_v50 = vpop.permute.xlu1 %2566 }
 0x557   : > { %v2594_v27 = vsel %vm1547_vm8, %v2563_v44, %v2567_v50  ;;  %v2569_v54 = vpop.permute.xlu0 %2568 }
 0x558   : > { %2598 = vst [vmem:[#allocation3 + $0x1e0] sm:$0xff] %v2594_v27  ;;  %v2595_v0 = vsel %vm1547_vm8, %v2565_v48, %v2569_v54 }
 0x559   : > { %2604 = vst [vmem:[#allocation3 + $0x210] sm:$0xff] %v2595_v0 }
 0x55a   : > { %v2571_v58 = vpop.permute.xlu1 %2570 }
 0x55b   : > { %v2592_v38 = vsel %vm1547_vm8, %v2567_v50, %v2571_v58  ;;  %v2573_v22 = vpop.permute.xlu0 %2572 }
 0x55c   : > { %2599 = vst [vmem:[#allocation3 + $0x1e8] sm:$0xff] %v2592_v38  ;;  %v2593_v6 = vsel %vm1547_vm8, %v2569_v54, %v2573_v22 }
 0x55d   : > { %2605 = vst [vmem:[#allocation3 + $0x218] sm:$0xff] %v2593_v6 }
 0x55e   : > { %v2575_v10 = vpop.permute.xlu1 %2574 }
 0x55f   : > { %v2590_v47 = vsel %vm1547_vm8, %v2571_v58, %v2575_v10  ;;  %v2577_v51 = vpop.permute.xlu0 %2576 }
 0x560   : > { %2600 = vst [vmem:[#allocation3 + $0x1f0] sm:$0xff] %v2590_v47  ;;  %v2591_v55 = vsel %vm1547_vm8, %v2573_v22, %v2577_v51 }
 0x561   : > { %2606 = vst [vmem:[#allocation3 + $0x220] sm:$0xff] %v2591_v55 }
 0x562   : > { %v2579_v62 = vpop.permute.xlu1 %2578 }
 0x563   : > { %v2588_v13 = vsel %vm1547_vm8, %v2575_v10, %v2579_v62  ;;  %v2581_v39 = vpop.permute.xlu0 %2580 }
 0x564   : > { %2601 = vst [vmem:[#allocation3 + $0x1f8] sm:$0xff] %v2588_v13  ;;  %v2589_v14 = vsel %vm1547_vm8, %v2577_v51, %v2581_v39 }
 0x565   : > { %2607 = vst [vmem:[#allocation3 + $0x228] sm:$0xff] %v2589_v14 }
 0x566   : > { %v2583_v29 = vpop.permute.xlu1 %2582 }
 0x567   : > { %v2586_v17 = vsel %vm1547_vm8, %v2579_v62, %v2583_v29  ;;  %v2596_v31 = vsel %vm1547_vm8, %v2583_v29, %v2563_v44  ;;  %v2585_v57 = vpop.permute.xlu0 %2584 }
 0x568   : > { %2602 = vst [vmem:[#allocation3 + $0x200] sm:$0xff] %v2586_v17  ;;  %2603 = vst [vmem:[#allocation3 + $0x208] sm:$0xff] %v2596_v31  ;;  %v2587_v20 = vsel %vm1547_vm8, %v2581_v39, %v2585_v57  ;;  %v2597_v53 = vsel %vm1547_vm8, %v2585_v57, %v2565_v48 }
 0x569   : > { %2608 = vst [vmem:[#allocation3 + $0x230] sm:$0xff] %v2587_v20  ;;  %2609 = vst [vmem:[#allocation3 + $0x238] sm:$0xff] %v2597_v53 }
 0x56a   : > { %v2611_v25 = vpop.permute.xlu1 %2610 }
 0x56b   : > { %v2613_v63 = vpop.permute.xlu0 %2612 }
 0x56e   : > { %v2615_v41 = vpop.permute.xlu1 %2614 }
 0x56f   : > { %v2642_v12 = vsel %vm1572_vm9, %v2611_v25, %v2615_v41 }
 0x570   : > { %2646 = vst [vmem:[#allocation3 + $0x240] sm:$0xff] %v2642_v12 }
 0x57c   : > { %v7928_v52 = vpop.permute.xlu0 %3565 }
 0x57f   : > { %v7930_v61 = vpop.permute.xlu1 %3570 }
 0x580   : > { %v2617_v40 = vpop.permute.xlu0 %2616 }
 0x581   : > { %v2643_v49 = vsel %vm1572_vm9, %v2613_v63, %v2617_v40 }
 0x582   : > { %2652 = vst [vmem:[#allocation3 + $0x270] sm:$0xff] %v2643_v49 }
 0x583   : > { %v2619_v19 = vpop.permute.xlu1 %2618 }
 0x584   : > { %v2640_v23 = vsel %vm1572_vm9, %v2615_v41, %v2619_v19  ;;  %v2621_v24 = vpop.permute.xlu0 %2620 }
 0x585   : > { %2647 = vst [vmem:[#allocation3 + $0x248] sm:$0xff] %v2640_v23  ;;  %v2641_v1 = vsel %vm1572_vm9, %v2617_v40, %v2621_v24 }
 0x586   : > { %2653 = vst [vmem:[#allocation3 + $0x278] sm:$0xff] %v2641_v1 }
 0x587   : > { %v2623_v4 = vpop.permute.xlu1 %2622 }
 0x588   : > { %v2638_v16 = vsel %vm1572_vm9, %v2619_v19, %v2623_v4  ;;  %v2625_v28 = vpop.permute.xlu0 %2624 }
 0x589   : > { %2648 = vst [vmem:[#allocation3 + $0x250] sm:$0xff] %v2638_v16  ;;  %v2639_v18 = vsel %vm1572_vm9, %v2621_v24, %v2625_v28 }
 0x58a   : > { %2654 = vst [vmem:[#allocation3 + $0x280] sm:$0xff] %v2639_v18 }
 0x58b   : > { %v2627_v60 = vpop.permute.xlu1 %2626 }
 0x58c   : > { %v2636_v3 = vsel %vm1572_vm9, %v2623_v4, %v2627_v60  ;;  %v2629_v56 = vpop.permute.xlu0 %2628 }
 0x58d   : > { %2649 = vst [vmem:[#allocation3 + $0x258] sm:$0xff] %v2636_v3  ;;  %v2637_v35 = vsel %vm1572_vm9, %v2625_v28, %v2629_v56 }
 0x58e   : > { %2655 = vst [vmem:[#allocation3 + $0x288] sm:$0xff] %v2637_v35 }
 0x58f   : > { %v2631_v8 = vpop.permute.xlu1 %2630 }
 0x590   : > { %v2634_v46 = vsel %vm1572_vm9, %v2627_v60, %v2631_v8  ;;  %v2644_v32 = vsel %vm1572_vm9, %v2631_v8, %v2611_v25  ;;  %v2633_v9 = vpop.permute.xlu0 %2632 }
 0x591   : > { %2650 = vst [vmem:[#allocation3 + $0x260] sm:$0xff] %v2634_v46  ;;  %2651 = vst [vmem:[#allocation3 + $0x268] sm:$0xff] %v2644_v32  ;;  %v2635_v30 = vsel %vm1572_vm9, %v2629_v56, %v2633_v9  ;;  %v2645_v36 = vsel %vm1572_vm9, %v2633_v9, %v2613_v63  ;;  %v3581_v9 = vld [vmem:[%s8610_s11] sm:$0x3] }
 0x592   : > { %2656 = vst [vmem:[#allocation3 + $0x290] sm:$0xff] %v2635_v30  ;;  %2657 = vst [vmem:[#allocation3 + $0x298] sm:$0xff] %v2645_v36  ;;  %v3586_v30 = vrot.slane %v3581_v9, %v6414_v15  ;;  %v3590_v36 = vrot.slane %v3581_v9, %v6423_v21 }
 0x593   : > { %v2659_v43 = vpop.permute.xlu1 %2658 }
 0x594   : > { %v2661_v2 = vpop.permute.xlu0 %2660 }
 0x597   : > { %v2663_v45 = vpop.permute.xlu1 %2662 }
 0x598   : > { %v2690_v37 = vsel %vm1597_vm10, %v2659_v43, %v2663_v45  ;;  %v2665_v34 = vpop.permute.xlu0 %2664 }
 0x599   : > { %2694 = vst [vmem:[#allocation3 + $0x2a0] sm:$0xff] %v2690_v37  ;;  %v2691_v26 = vsel %vm1597_vm10, %v2661_v2, %v2665_v34 }
 0x59a   : > { %2700 = vst [vmem:[#allocation3 + $0x2d0] sm:$0xff] %v2691_v26 }
 0x59b   : > { %v2667_v5 = vpop.permute.xlu1 %2666 }
 0x59c   : > { %v2688_v11 = vsel %vm1597_vm10, %v2663_v45, %v2667_v5  ;;  %v2669_v59 = vpop.permute.xlu0 %2668 }
 0x59d   : > { %2695 = vst [vmem:[#allocation3 + $0x2a8] sm:$0xff] %v2688_v11  ;;  %v2689_v42 = vsel %vm1597_vm10, %v2665_v34, %v2669_v59 }
 0x59e   : > { %2701 = vst [vmem:[#allocation3 + $0x2d8] sm:$0xff] %v2689_v42 }
 0x59f   : > { %v2671_v33 = vpop.permute.xlu1 %2670 }
 0x5a0   : > { %v2686_v44 = vsel %vm1597_vm10, %v2667_v5, %v2671_v33  ;;  %v2673_v48 = vpop.permute.xlu0 %2672 }
 0x5a1   : > { %2696 = vst [vmem:[#allocation3 + $0x2b0] sm:$0xff] %v2686_v44  ;;  %v2687_v50 = vsel %vm1597_vm10, %v2669_v59, %v2673_v48 }
 0x5a2   : > { %2702 = vst [vmem:[#allocation3 + $0x2e0] sm:$0xff] %v2687_v50 }
 0x5a3   : > { %v2675_v27 = vpop.permute.xlu1 %2674 }
 0x5a4   : > { %v2684_v54 = vsel %vm1597_vm10, %v2671_v33, %v2675_v27  ;;  %v2677_v0 = vpop.permute.xlu0 %2676 }
 0x5a5   : > { %2697 = vst [vmem:[#allocation3 + $0x2b8] sm:$0xff] %v2684_v54  ;;  %v2685_v58 = vsel %vm1597_vm10, %v2673_v48, %v2677_v0 }
 0x5a6   : > { %2703 = vst [vmem:[#allocation3 + $0x2e8] sm:$0xff] %v2685_v58 }
 0x5a7   : > { %v2679_v38 = vpop.permute.xlu1 %2678 }
 0x5a8   : > { %v2682_v22 = vsel %vm1597_vm10, %v2675_v27, %v2679_v38  ;;  %v2692_v6 = vsel %vm1597_vm10, %v2679_v38, %v2659_v43  ;;  %v2681_v10 = vpop.permute.xlu0 %2680 }
 0x5a9   : > { %2698 = vst [vmem:[#allocation3 + $0x2c0] sm:$0xff] %v2682_v22  ;;  %2699 = vst [vmem:[#allocation3 + $0x2c8] sm:$0xff] %v2692_v6  ;;  %v2683_v47 = vsel %vm1597_vm10, %v2677_v0, %v2681_v10  ;;  %v2693_v51 = vsel %vm1597_vm10, %v2681_v10, %v2661_v2 }
 0x5aa   : > { %2704 = vst [vmem:[#allocation3 + $0x2f0] sm:$0xff] %v2683_v47  ;;  %2705 = vst [vmem:[#allocation3 + $0x2f8] sm:$0xff] %v2693_v51 }
 0x5ab   : > { %v2707_v55 = vpop.permute.xlu1 %2706 }
 0x5ac   : > { %v2709_v62 = vpop.permute.xlu0 %2708 }
 0x5af   : > { %v2711_v13 = vpop.permute.xlu1 %2710 }
 0x5b0   : > { %v2738_v39 = vsel %vm1622_vm11, %v2707_v55, %v2711_v13  ;;  %v2713_v14 = vpop.permute.xlu0 %2712 }
 0x5b1   : > { %2742 = vst [vmem:[#allocation3 + $0x300] sm:$0xff] %v2738_v39  ;;  %v2739_v29 = vsel %vm1622_vm11, %v2709_v62, %v2713_v14 }
 0x5b2   : > { %2748 = vst [vmem:[#allocation3 + $0x330] sm:$0xff] %v2739_v29 }
 0x5b3   : > { %v2715_v17 = vpop.permute.xlu1 %2714 }
 0x5b4   : > { %v2736_v31 = vsel %vm1622_vm11, %v2711_v13, %v2715_v17  ;;  %v2717_v57 = vpop.permute.xlu0 %2716 }
 0x5b5   : > { %2743 = vst [vmem:[#allocation3 + $0x308] sm:$0xff] %v2736_v31  ;;  %v2737_v20 = vsel %vm1622_vm11, %v2713_v14, %v2717_v57 }
 0x5b6   : > { %2749 = vst [vmem:[#allocation3 + $0x338] sm:$0xff] %v2737_v20 }
 0x5b7   : > { %v2719_v53 = vpop.permute.xlu1 %2718 }
 0x5b8   : > { %v2734_v25 = vsel %vm1622_vm11, %v2715_v17, %v2719_v53  ;;  %v2721_v41 = vpop.permute.xlu0 %2720 }
 0x5b9   : > { %2744 = vst [vmem:[#allocation3 + $0x310] sm:$0xff] %v2734_v25  ;;  %v2735_v12 = vsel %vm1622_vm11, %v2717_v57, %v2721_v41 }
 0x5ba   : > { %2750 = vst [vmem:[#allocation3 + $0x340] sm:$0xff] %v2735_v12 }
 0x5bb   : > { %v2723_v63 = vpop.permute.xlu1 %2722 }
 0x5bc   : > { %v2732_v40 = vsel %vm1622_vm11, %v2719_v53, %v2723_v63  ;;  %v2725_v49 = vpop.permute.xlu0 %2724 }
 0x5bd   : > { %2745 = vst [vmem:[#allocation3 + $0x318] sm:$0xff] %v2732_v40  ;;  %v2733_v19 = vsel %vm1622_vm11, %v2721_v41, %v2725_v49 }
 0x5be   : > { %2751 = vst [vmem:[#allocation3 + $0x348] sm:$0xff] %v2733_v19 }
 0x5bf   : > { %v2727_v23 = vpop.permute.xlu1 %2726 }
 0x5c0   : > { %v2730_v24 = vsel %vm1622_vm11, %v2723_v63, %v2727_v23  ;;  %v2740_v1 = vsel %vm1622_vm11, %v2727_v23, %v2707_v55  ;;  %v2729_v4 = vpop.permute.xlu0 %2728 }
 0x5c1   : > { %2746 = vst [vmem:[#allocation3 + $0x320] sm:$0xff] %v2730_v24  ;;  %2747 = vst [vmem:[#allocation3 + $0x328] sm:$0xff] %v2740_v1  ;;  %v2731_v16 = vsel %vm1622_vm11, %v2725_v49, %v2729_v4  ;;  %v2741_v28 = vsel %vm1622_vm11, %v2729_v4, %v2709_v62 }
 0x5c2   : > { %2752 = vst [vmem:[#allocation3 + $0x350] sm:$0xff] %v2731_v16  ;;  %2753 = vst [vmem:[#allocation3 + $0x358] sm:$0xff] %v2741_v28 }
 0x5d0   : > { %v3550_v18 = vpop.f32.mrb[16].mxu1 }
 0x5d1   : > { %v3573_v60 = vadd.f32 %v7928_v52, %v3550_v18  ;;  %v3552_v3 = vpop.f32.mrb[17].mxu1 }
 0x5d2   : > { %v3574_v56 = vadd.f32 %v7928_v52, %v3552_v3 }
 0x5d3   : > { %5946 = vtanh.f32 %v3573_v60 }
 0x5d4   : > { %5948 = vtanh.f32 %v3574_v56  ;;  %v3556_v35 = vpop.f32.mrb[18].mxu1 }
 0x5d5   : > { %v3575_v8 = vadd.f32 %v7930_v61, %v3556_v35  ;;  %v3558_v46 = vpop.f32.mrb[19].mxu1 }
 0x5d6   : > { %v3576_v32 = vadd.f32 %v7930_v61, %v3558_v46 }
 0x5d7   : > { %5950 = vtanh.f32 %v3575_v8 }
 0x5d8   : > { %5952 = vtanh.f32 %v3576_v32 }
 0x5dd   : > { %v5947_v43 = vpop.eup %5946 }
 0x5de   : > { %v5949_v52 = vpop.eup %5948  ;;  %v8011_v2 = vmul.f32 %v5947_v43, %v3586_v30 }
 0x5df   : > { %v8013_v45 = vmul.f32 %v5949_v52, %v3590_v36 }
 0x5e0   : > { %3661 = vst [vmem:[#allocation4 + $0x80] sm:$0xff] %v8011_v2  ;;  %3597 = vrot.lane.b32.xlu1 %v8011_v2, %s5987_s30 }
 0x5e1   : > { %v5951_v61 = vpop.eup %5950  ;;  %3662 = vst [vmem:[#allocation4 + $0x88] sm:$0xff] %v8013_v45  ;;  %3829 = vmatprep.mubr.f32.mxu0 (!%p4861_p5), %v8013_v45 }
 0x5e2   : > { %v5953_v37 = vpop.eup %5952  ;;  %v8019_v34 = vmul.f32 %v5951_v61, %v3586_v30 }
 0x5e3   : > { %v8021_v15 = vmul.f32 %v5953_v37, %v3590_v36 }
 0x5e4   : > { %3663 = vst [vmem:[#allocation4 + $0x90] sm:$0xff] %v8019_v34  ;;  %3613 = vrot.lane.b32.xlu1 %v8011_v2, %s8664_s3  ;;  %3599 = vrot.lane.b32.xlu0 %v8019_v34, %s5987_s30 }
 0x5e5   : > { %3664 = vst [vmem:[#allocation4 + $0x98] sm:$0xff] %v8021_v15 }
 0x5e8   : > { %3629 = vrot.lane.b32.xlu1 %v8011_v2, %s8665_s27  ;;  %3615 = vrot.lane.b32.xlu0 %v8019_v34, %s8664_s3 }
 0x5ec   : > { %3645 = vrot.lane.b32.xlu1 %v8011_v2, %s5982_s28  ;;  %3631 = vrot.lane.b32.xlu0 %v8019_v34, %s8665_s27 }
 0x5f0   : > { %3665 = vrot.lane.b32.xlu1 %v8011_v2, %s8657_s23  ;;  %3647 = vrot.lane.b32.xlu0 %v8019_v34, %s5982_s28 }
 0x5f4   : > { %3681 = vrot.lane.b32.xlu1 %v8011_v2, %s8666_s5  ;;  %3667 = vrot.lane.b32.xlu0 %v8019_v34, %s8657_s23 }
 0x5f8   : > { %3697 = vrot.lane.b32.xlu1 %v8011_v2, %s5991_s4  ;;  %3683 = vrot.lane.b32.xlu0 %v8019_v34, %s8666_s5 }
 0x5fc   : > { %3713 = vrot.lane.b32.xlu1 %v8011_v2, %s8667_s22  ;;  %3699 = vrot.lane.b32.xlu0 %v8019_v34, %s5991_s4 }
 0x600   : > { %3601 = vrot.lane.b32.xlu1 %v8013_v45, %s5987_s30  ;;  %3715 = vrot.lane.b32.xlu0 %v8019_v34, %s8667_s22 }
 0x604   : > { %3617 = vrot.lane.b32.xlu1 %v8013_v45, %s8664_s3  ;;  %3603 = vrot.lane.b32.xlu0 %v8021_v15, %s5987_s30 }
 0x608   : > { %3633 = vrot.lane.b32.xlu1 %v8013_v45, %s8665_s27  ;;  %3619 = vrot.lane.b32.xlu0 %v8021_v15, %s8664_s3 }
 0x60c   : > { %3649 = vrot.lane.b32.xlu1 %v8013_v45, %s5982_s28  ;;  %3635 = vrot.lane.b32.xlu0 %v8021_v15, %s8665_s27 }
 0x610   : > { %3669 = vrot.lane.b32.xlu1 %v8013_v45, %s8657_s23  ;;  %3651 = vrot.lane.b32.xlu0 %v8021_v15, %s5982_s28 }
 0x614   : > { %3685 = vrot.lane.b32.xlu1 %v8013_v45, %s8666_s5  ;;  %3671 = vrot.lane.b32.xlu0 %v8021_v15, %s8657_s23 }
 0x618   : > { %3701 = vrot.lane.b32.xlu1 %v8013_v45, %s5991_s4  ;;  %3687 = vrot.lane.b32.xlu0 %v8021_v15, %s8666_s5 }
 0x61c   : > { %3717 = vrot.lane.b32.xlu1 %v8013_v45, %s8667_s22  ;;  %3703 = vrot.lane.b32.xlu0 %v8021_v15, %s5991_s4  ;;  %v3736_v45 = vld [vmem:[%s8612_s13 + $0x18] sm:$0xff] (!%p4861_p5) }
 0x620   : > { %3719 = vrot.lane.b32.xlu0 %v8021_v15, %s8667_s22 }
 0x652   : > { %v3598_v21 = vpop.permute.xlu1 %3597 }
 0x656   : > { %v3614_v26 = vpop.permute.xlu1 %3613  ;;  %v3600_v5 = vpop.permute.xlu0 %3599 }
 0x65a   : > { %v3630_v11 = vpop.permute.xlu1 %3629  ;;  %v3616_v59 = vpop.permute.xlu0 %3615 }
 0x65e   : > { %v3646_v42 = vpop.permute.xlu1 %3645  ;;  %v3632_v33 = vpop.permute.xlu0 %3631 }
 0x662   : > { %v3666_v44 = vpop.permute.xlu1 %3665  ;;  %v3648_v48 = vpop.permute.xlu0 %3647 }
 0x666   : > { %v3682_v50 = vpop.permute.xlu1 %3681  ;;  %v3668_v27 = vpop.permute.xlu0 %3667 }
 0x66a   : > { %v8087_v54 = vpop.permute.xlu1 %3697  ;;  %v8089_v0 = vpop.permute.xlu0 %3683 }
 0x66e   : > { %v8091_v58 = vpop.permute.xlu1 %3713  ;;  %v8093_v38 = vpop.permute.xlu0 %3699 }
 0x672   : > { %v3602_v22 = vpop.permute.xlu1 %3601  ;;  %v8095_v6 = vpop.permute.xlu0 %3715 }
 0x673   : > { %v3605_v10 = vsel %vm3185_vm12, %v3598_v21, %v3602_v22  ;;  %v3607_v47 = vsel %vm3185_vm12, %v3602_v22, %v3598_v21  ;;  %v3754_v22 = vld [vmem:[%s8612_s13 + $0xa8] sm:$0xff] (!%p4861_p5) }
 0x674   : > { %3609 = vst [vmem:[#allocation4] sm:$0xff] %v3607_v47  ;;  %3610 = vst [vmem:[#allocation4 + $0x8] sm:$0xff] %v3605_v10  ;;  %v3737_v47 = vld [vmem:[%s8612_s13 + $0x20] sm:$0xff] (!%p4861_p5) }
 0x676   : > { %v3618_v51 = vpop.permute.xlu1 %3617  ;;  %v3604_v55 = vpop.permute.xlu0 %3603 }
 0x677   : > { %v3621_v62 = vsel %vm3202_vm13, %v3614_v26, %v3618_v51  ;;  %v3623_v13 = vsel %vm3202_vm13, %v3618_v51, %v3614_v26  ;;  %v3606_v39 = vsel %vm3185_vm12, %v3600_v5, %v3604_v55  ;;  %v3608_v14 = vsel %vm3185_vm12, %v3604_v55, %v3600_v5  ;;  %v3738_v51 = vld [vmem:[%s8612_s13 + $0x28] sm:$0xff] (!%p4861_p5)  ;;  %v3755_v55 = vld [vmem:[%s8612_s13 + $0xb0] sm:$0xff] (!%p4861_p5) }
 0x678   : > { %3625 = vst [vmem:[#allocation4 + $0x20] sm:$0xff] %v3623_v13  ;;  %3626 = vst [vmem:[#allocation4 + $0x28] sm:$0xff] %v3621_v62  ;;  %v3756_v62 = vld [vmem:[%s8612_s13 + $0xb8] sm:$0xff] (!%p4861_p5)  ;;  %v5697_v13 = vpack.c.bf16 (!%p4861_p5), %v3738_v51, %v3737_v47  ;;  %v3861_v47 = vld [vmem:[%s8613_s14 + $0xa8] sm:$0xff] (!%p4861_p5) }
 0x679   : > { %3611 = vst [vmem:[#allocation4 + $0x10] sm:$0xff] %v3608_v14  ;;  %3612 = vst [vmem:[#allocation4 + $0x18] sm:$0xff] %v3606_v39  ;;  %v5699_v39 = vpack.c.bf16 (!%p4861_p5), %v3756_v62, %v3755_v55  ;;  %v3739_v14 = vld [vmem:[%s8612_s13 + $0x30] sm:$0xff] (!%p4861_p5)  ;;  %v3863_v55 = vld [vmem:[%s8613_s14 + $0xb8] sm:$0xff] (!%p4861_p5) }
 0x67a   : > { %v3634_v29 = vpop.permute.xlu1 %3633  ;;  %v3620_v17 = vpop.permute.xlu0 %3619  ;;  %v3862_v51 = vld [vmem:[%s8613_s14 + $0xb0] sm:$0xff] (!%p4861_p5)  ;;  %v3864_v62 = vld [vmem:[%s8613_s14 + $0xc0] sm:$0xff] (!%p4861_p5) }
 0x67b   : > { %v3637_v31 = vsel %vm3219_vm14, %v3630_v11, %v3634_v29  ;;  %v3639_v57 = vsel %vm3219_vm14, %v3634_v29, %v3630_v11  ;;  %v3622_v20 = vsel %vm3202_vm13, %v3616_v59, %v3620_v17  ;;  %v3624_v53 = vsel %vm3202_vm13, %v3620_v17, %v3616_v59  ;;  %v3740_v29 = vld [vmem:[%s8612_s13 + $0x38] sm:$0xff] (!%p4861_p5)  ;;  %v3757_v17 = vld [vmem:[%s8612_s13 + $0xc0] sm:$0xff] (!%p4861_p5) }
 0x67c   : > { %3641 = vst [vmem:[#allocation4 + $0x40] sm:$0xff] %v3639_v57  ;;  %3642 = vst [vmem:[#allocation4 + $0x48] sm:$0xff] %v3637_v31  ;;  %v3758_v31 = vld [vmem:[%s8612_s13 + $0xc8] sm:$0xff] (!%p4861_p5)  ;;  %v5701_v57 = vpack.c.bf16 (!%p4861_p5), %v3740_v29, %v3739_v14  ;;  %v3867_v14 = vld [vmem:[%s8613_s14 + $0xd8] sm:$0xff] (!%p4861_p5) }
 0x67d   : > { %3627 = vst [vmem:[#allocation4 + $0x30] sm:$0xff] %v3624_v53  ;;  %3628 = vst [vmem:[#allocation4 + $0x38] sm:$0xff] %v3622_v20  ;;  %v5703_v20 = vpack.c.bf16 (!%p4861_p5), %v3758_v31, %v3757_v17  ;;  %v3741_v53 = vld [vmem:[%s8612_s13 + $0x40] sm:$0xff] (!%p4861_p5)  ;;  %v3869_v17 = vld [vmem:[%s8613_s14 + $0xe8] sm:$0xff] (!%p4861_p5) }
 0x67e   : > { %v3650_v25 = vpop.permute.xlu1 %3649  ;;  %v3636_v41 = vpop.permute.xlu0 %3635  ;;  %v3868_v29 = vld [vmem:[%s8613_s14 + $0xe0] sm:$0xff] (!%p4861_p5)  ;;  %v3870_v31 = vld [vmem:[%s8613_s14 + $0xf0] sm:$0xff] (!%p4861_p5) }
 0x67f   : > { %v3653_v12 = vsel %vm1516_vm6, %v3646_v42, %v3650_v25  ;;  %v3655_v63 = vsel %vm1516_vm6, %v3650_v25, %v3646_v42  ;;  %v3638_v40 = vsel %vm3219_vm14, %v3632_v33, %v3636_v41  ;;  %v3640_v49 = vsel %vm3219_vm14, %v3636_v41, %v3632_v33  ;;  %v3749_v42 = vld [vmem:[%s8612_s13 + $0x80] sm:$0xff] (!%p4861_p5)  ;;  %v3750_v33 = vld [vmem:[%s8612_s13 + $0x88] sm:$0xff] (!%p4861_p5)  ;;  %v3759_v41 = vld [vmem:[%s8612_s13 + $0xd0] sm:$0xff] (!%p4861_p5) }
 0x680   : > { %3657 = vst [vmem:[#allocation4 + $0x60] sm:$0xff] %v3655_v63  ;;  %3658 = vst [vmem:[#allocation4 + $0x68] sm:$0xff] %v3653_v12  ;;  %v5687_v7 = vpack.c.bf16 (!%p4861_p5), %v3750_v33, %v3749_v42  ;;  %v3742_v25 = vld [vmem:[%s8612_s13 + $0x48] sm:$0xff] (!%p4861_p5)  ;;  %v3760_v12 = vld [vmem:[%s8612_s13 + $0xd8] sm:$0xff] (!%p4861_p5) }
 0x681   : > { %3643 = vst [vmem:[#allocation4 + $0x50] sm:$0xff] %v3640_v49  ;;  %3644 = vst [vmem:[#allocation4 + $0x58] sm:$0xff] %v3638_v40  ;;  %v5705_v63 = vpack.c.bf16 (!%p4861_p5), %v3742_v25, %v3741_v53  ;;  %v5707_v40 = vpack.c.bf16 (!%p4861_p5), %v3760_v12, %v3759_v41  ;;  %v3743_v49 = vld [vmem:[%s8612_s13 + $0x50] sm:$0xff] (!%p4861_p5)  ;;  %v3847_v33 = vld [vmem:[%s8613_s14 + $0x38] sm:$0xff] (!%p4861_p5) }
 0x682   : > { %v3670_v19 = vpop.permute.xlu1 %3669  ;;  %v3652_v23 = vpop.permute.xlu0 %3651  ;;  %5688 = vmatprep.subr.bf16.mxu0 (!%p4861_p5), %v5687_v7  ;;  %v3846_v42 = vld [vmem:[%s8613_s14 + $0x30] sm:$0xff] (!%p4861_p5)  ;;  %v3849_v7 = vld [vmem:[%s8613_s14 + $0x48] sm:$0xff] (!%p4861_p5)  ;;  %v4260_v53 = vld [vmem:[%s8615_s16 + $0x18] sm:$0xff] (!%p4861_p5) }
 0x683   : > { %v3673_v24 = vsel %vm1547_vm8, %v3666_v44, %v3670_v19  ;;  %v3675_v1 = vsel %vm1547_vm8, %v3670_v19, %v3666_v44  ;;  %v3654_v4 = vsel %vm1516_vm6, %v3648_v48, %v3652_v23  ;;  %v3656_v16 = vsel %vm1516_vm6, %v3652_v23, %v3648_v48  ;;  %v3733_v44 = vld [vmem:[%s8612_s13] sm:$0xff] (!%p4861_p5)  ;;  %v3734_v48 = vld [vmem:[%s8612_s13 + $0x8] sm:$0xff] (!%p4861_p5)  ;;  %v3744_v19 = vld [vmem:[%s8612_s13 + $0x58] sm:$0xff] (!%p4861_p5) }
 0x684   : > { %3677 = vst [vmem:[#allocation4 + $0xa0] sm:$0xff] %v3673_v24  ;;  %3678 = vst [vmem:[#allocation4 + $0xa8] sm:$0xff] %v3675_v1  ;;  %v3761_v23 = vld [vmem:[%s8612_s13 + $0xe0] sm:$0xff] (!%p4861_p5)  ;;  %v3762_v24 = vld [vmem:[%s8612_s13 + $0xe8] sm:$0xff] (!%p4861_p5)  ;;  %v5709_v1 = vpack.c.bf16 (!%p4861_p5), %v3744_v19, %v3743_v49 }
 0x685   : > { %3659 = vst [vmem:[#allocation4 + $0x70] sm:$0xff] %v3656_v16  ;;  %3660 = vst [vmem:[#allocation4 + $0x78] sm:$0xff] %v3654_v4  ;;  %v5711_v4 = vpack.c.bf16 (!%p4861_p5), %v3762_v24, %v3761_v23  ;;  %v3745_v16 = vld [vmem:[%s8612_s13 + $0x60] sm:$0xff] (!%p4861_p5)  ;;  %v4195_v23 = vld [vmem:[%s8614_s15 + $0x10] sm:$0xff] (!%p4861_p5) }
 0x686   : > { %v3686_v28 = vpop.permute.xlu1 %3685  ;;  %v3672_v18 = vpop.permute.xlu0 %3671  ;;  %v4193_v41 = vld [vmem:[%s8614_s15] sm:$0xff] (!%p4861_p5) }
 0x687   : > { %v3689_v60 = vsel %vm3272_vm15, %v3682_v50, %v3686_v28  ;;  %v3691_v3 = vsel %vm3272_vm15, %v3686_v28, %v3682_v50  ;;  %v3674_v56 = vsel %vm1547_vm8, %v3668_v27, %v3672_v18  ;;  %v3676_v35 = vsel %vm1547_vm8, %v3672_v18, %v3668_v27  ;;  %v3751_v50 = vld [vmem:[%s8612_s13 + $0x90] sm:$0xff] (!%p4861_p5)  ;;  %v3752_v27 = vld [vmem:[%s8612_s13 + $0x98] sm:$0xff] (!%p4861_p5)  ;;  %v3746_v28 = vld [vmem:[%s8612_s13 + $0x68] sm:$0xff] (!%p4861_p5) }
 0x688   : > { %3693 = vst [vmem:[#allocation4 + $0xc0] sm:$0xff] %v3689_v60  ;;  %3694 = vst [vmem:[#allocation4 + $0xc8] sm:$0xff] %v3691_v3  ;;  %v3763_v18 = vld [vmem:[%s8612_s13 + $0xf0] sm:$0xff] (!%p4861_p5)  ;;  %v3764_v60 = vld [vmem:[%s8612_s13 + $0xf8] sm:$0xff] (!%p4861_p5)  ;;  %v5713_v3 = vpack.c.bf16 (!%p4861_p5), %v3746_v28, %v3745_v16 }
 0x689   : > { %3679 = vst [vmem:[#allocation4 + $0xb0] sm:$0xff] %v3674_v56  ;;  %3680 = vst [vmem:[#allocation4 + $0xb8] sm:$0xff] %v3676_v35  ;;  %v5715_v56 = vpack.c.bf16 (!%p4861_p5), %v3764_v60, %v3763_v18  ;;  %v3747_v35 = vld [vmem:[%s8612_s13 + $0x70] sm:$0xff] (!%p4861_p5)  ;;  %v4197_v18 = vld [vmem:[%s8614_s15 + $0x20] sm:$0xff] (!%p4861_p5) }
 0x68a   : > { %v3702_v8 = vpop.permute.xlu1 %3701  ;;  %v3688_v46 = vpop.permute.xlu0 %3687 }
 0x68b   : > { %v3705_v32 = vsel %vm3289_vm0, %v8087_v54, %v3702_v8  ;;  %v3707_v9 = vsel %vm3289_vm0, %v3702_v8, %v8087_v54  ;;  %v3690_v30 = vsel %vm3272_vm15, %v8089_v0, %v3688_v46  ;;  %v3692_v36 = vsel %vm3272_vm15, %v3688_v46, %v8089_v0  ;;  %v3748_v8 = vld [vmem:[%s8612_s13 + $0x78] sm:$0xff] (!%p4861_p5) }
 0x68c   : > { %3709 = vst [vmem:[#allocation4 + $0xe0] sm:$0xff] %v3705_v32  ;;  %3710 = vst [vmem:[#allocation4 + $0xe8] sm:$0xff] %v3707_v9  ;;  %v5689_v54 = vpack.c.bf16 (!%p4861_p5), %v3734_v48, %v3733_v44  ;;  %v5691_v0 = vpack.c.bf16 (!%p4861_p5), %v3752_v27, %v3751_v50  ;;  %v5717_v46 = vpack.c.bf16 (!%p4861_p5), %v3748_v8, %v3747_v35  ;;  %v3840_v32 = vld [vmem:[%s8613_s14] sm:$0xff] (!%p4861_p5)  ;;  %v3850_v48 = vld [vmem:[%s8613_s14 + $0x50] sm:$0xff] (!%p4861_p5) }
 0x68d   : > { %3695 = vst [vmem:[#allocation4 + $0xd0] sm:$0xff] %v3690_v30  ;;  %3696 = vst [vmem:[#allocation4 + $0xd8] sm:$0xff] %v3692_v36  ;;  %5092 = vmatprep.mubr.msk.f32.mxu1 (!%p4861_p5), %vm1803_vm3, %v3840_v32  ;;  %v4257_v9 = vld [vmem:[%s8615_s16] sm:$0xff] (!%p4861_p5)  ;;  %v4258_v30 = vld [vmem:[%s8615_s16 + $0x8] sm:$0xff] (!%p4861_p5) }
 0x68e   : > { %v3718_v43 = vpop.permute.xlu1 %3717  ;;  %v3704_v52 = vpop.permute.xlu0 %3703  ;;  %3732 = sbr.rel (%p4861_p5) target bundleno = 2883 (0xb43), region = 112  ;;  %5690 = vmatpush3.bf16.msra.mxu0 (!%p4861_p5), %v5689_v54  ;;  %v5723_v36 = vpack.c.bf16 (!%p4861_p5), %v4258_v30, %v4257_v9  ;;  %v3848_v44 = vld [vmem:[%s8613_s14 + $0x40] sm:$0xff] (!%p4861_p5)  ;;  %v3851_v50 = vld [vmem:[%s8613_s14 + $0x58] sm:$0xff] (!%p4861_p5)  ;;  %v3853_v54 = vld [vmem:[%s8613_s14 + $0x68] sm:$0xff] (!%p4861_p5) }
 0x68f   : > { %v3721_v61 = vsel %vm3306_vm1, %v8091_v58, %v3718_v43  ;;  %v3723_v37 = vsel %vm3306_vm1, %v3718_v43, %v8091_v58  ;;  %v3706_v21 = vsel %vm3289_vm0, %v8093_v38, %v3704_v52  ;;  %v3708_v26 = vsel %vm3289_vm0, %v3704_v52, %v8093_v38  ;;  %v3735_v58 = vld [vmem:[%s8612_s13 + $0x10] sm:$0xff] (!%p4861_p5)  ;;  %v3753_v38 = vld [vmem:[%s8612_s13 + $0xa0] sm:$0xff] (!%p4861_p5)  ;;  %5692 = vmatprep.subr.bf16.mxu0 (!%p4861_p5), %v5691_v0  ;;  %v4200_v9 = vld [vmem:[%s8614_s15 + $0x38] sm:$0xff] (!%p4861_p5) }
 0x690   : > { %3725 = vst [vmem:[#allocation4 + $0x100] sm:$0xff] %v3721_v61  ;;  %3726 = vst [vmem:[#allocation4 + $0x108] sm:$0xff] %v3723_v37  ;;  %v5695_v10 = vpack.c.bf16 (!%p4861_p5), %v3754_v22, %v3753_v38  ;;  %v3852_v27 = vld [vmem:[%s8613_s14 + $0x60] sm:$0xff] (!%p4861_p5)  ;;  %v3854_v0 = vld [vmem:[%s8613_s14 + $0x70] sm:$0xff] (!%p4861_p5) }
 0x691   : > { %3711 = vst [vmem:[#allocation4 + $0xf0] sm:$0xff] %v3706_v21  ;;  %3712 = vst [vmem:[#allocation4 + $0xf8] sm:$0xff] %v3708_v26  ;;  %v3841_v21 = vld [vmem:[%s8613_s14 + $0x8] sm:$0xff] (!%p4861_p5)  ;;  %v3842_v26 = vld [vmem:[%s8613_s14 + $0x10] sm:$0xff] (!%p4861_p5) }
 0x692   : > { %v3720_v5 = vpop.permute.xlu0 %3719  ;;  %v3857_v38 = vld [vmem:[%s8613_s14 + $0x88] sm:$0xff] (!%p4861_p5)  ;;  %v3858_v22 = vld [vmem:[%s8613_s14 + $0x90] sm:$0xff] (!%p4861_p5) }
 0x693   : > { %v3722_v11 = vsel %vm3306_vm1, %v8095_v6, %v3720_v5  ;;  %v3724_v59 = vsel %vm3306_vm1, %v3720_v5, %v8095_v6  ;;  %v5693_v6 = vpack.c.bf16 (!%p4861_p5), %v3736_v45, %v3735_v58  ;;  %v3843_v5 = vld [vmem:[%s8613_s14 + $0x18] sm:$0xff] (!%p4861_p5)  ;;  %v3856_v45 = vld [vmem:[%s8613_s14 + $0x80] sm:$0xff] (!%p4861_p5) }
 0x694   : > { %3727 = vst [vmem:[#allocation4 + $0x110] sm:$0xff] %v3722_v11  ;;  %3728 = vst [vmem:[#allocation4 + $0x118] sm:$0xff] %v3724_v59  ;;  %v3844_v11 = vld [vmem:[%s8613_s14 + $0x20] sm:$0xff] (!%p4861_p5)  ;;  %v3845_v59 = vld [vmem:[%s8613_s14 + $0x28] sm:$0xff] (!%p4861_p5) }
 0x695   : > { %5694 = vmatpush3.bf16.msra.mxu0 %v5693_v6  ;;  %v3855_v58 = vld [vmem:[%s8613_s14 + $0x78] sm:$0xff] }
 0x696   : > { %5696 = vmatprep.subr.bf16.mxu0 %v5695_v10  ;;  %v3859_v6 = vld [vmem:[%s8613_s14 + $0x98] sm:$0xff]  ;;  %v3860_v10 = vld [vmem:[%s8613_s14 + $0xa0] sm:$0xff] }
 0x699   : > { %5698 = vmatpush3.bf16.msra.mxu0 %v5697_v13  ;;  %v3865_v13 = vld [vmem:[%s8613_s14 + $0xc8] sm:$0xff] }
 0x69a   : > { %5700 = vmatprep.subr.bf16.mxu0 %v5699_v39  ;;  %v3866_v39 = vld [vmem:[%s8613_s14 + $0xd0] sm:$0xff] }
 0x69d   : > { %5702 = vmatpush3.bf16.msra.mxu0 %v5701_v57  ;;  %v3871_v57 = vld [vmem:[%s8613_s14 + $0xf8] sm:$0xff] }
 0x69e   : > { %5704 = vmatprep.subr.bf16.mxu0 %v5703_v20  ;;  %v4259_v20 = vld [vmem:[%s8615_s16 + $0x10] sm:$0xff] }
 0x69f   : > { %v5727_v25 = vpack.c.bf16 %v4260_v53, %v4259_v20  ;;  %v4214_v53 = vld [vmem:[%s8614_s15 + $0xa8] sm:$0xff] }
 0x6a1   : > { %5706 = vmatpush3.bf16.msra.mxu0 %v5705_v63  ;;  %v4194_v63 = vld [vmem:[%s8614_s15 + $0x8] sm:$0xff] }
 0x6a2   : > { %5708 = vmatprep.subr.bf16.mxu0 %v5707_v40 }
 0x6a5   : > { %5710 = vmatpush3.bf16.msra.mxu0 %v5709_v1  ;;  %v4196_v1 = vld [vmem:[%s8614_s15 + $0x18] sm:$0xff] }
 0x6a6   : > { %5712 = vmatprep.subr.bf16.mxu0 %v5711_v4 }
 0x6a9   : > { %5714 = vmatpush3.bf16.msra.mxu0 %v5713_v3  ;;  %v4198_v3 = vld [vmem:[%s8614_s15 + $0x28] sm:$0xff] }
 0x6aa   : > { %5716 = vmatprep.subr.bf16.mxu0 %v5715_v56 }
 0x6ad   : > { %5718 = vmatpush3.bf16.msra.mxu0 %v5717_v46  ;;  %v4199_v46 = vld [vmem:[%s8614_s15 + $0x30] sm:$0xff] }
 0x6ae   : > { %5724 = vmatprep.subr.bf16.mxu0 %v5723_v36 }
 0x6b0   : > { %3830 = vmatmul.mubr.f32.vlgmr.msra.gmra.mrb[0].mxu0 %v8011_v2 }
 0x6b1   : > { %3834 = vmatprep.mubr.f32.mxu0 %v8021_v15  ;;  %5726 = vmatpush3.bf16.msra.mxu0 %v5723_v36 }
 0x6b2   : > { %5728 = vmatprep.subr.bf16.mxu0 %v5727_v25 }
 0x6b4   : > { %3835 = vmatmul.mubr.f32.gmra.mrb[2].mxu0 %v8019_v34 }
 0x6b5   : > { %5730 = vmatpush3.bf16.msra.mxu0 %v5727_v25 }
 0x783   : > { %v4962_v2 = vpop.f32.mrb[0].mxu0 }
 0x784   : > { %v4963_v15 = vpop.f32.mrb[1].mxu0 }
 0x785   : > { %v4964_v34 = vadd.f32 %v4963_v15, %v4962_v2  ;;  %v4201_v15 = vld [vmem:[%s8614_s15 + $0x40] sm:$0xff] }
 0x787   : > { %v4965_v43 = vpop.f32.mrb[2].mxu0 }
 0x788   : > { %v4966_v52 = vpop.f32.mrb[3].mxu0 }
 0x789   : > { %v4967_v61 = vadd.f32 %v4966_v52, %v4965_v43  ;;  %v4202_v43 = vld [vmem:[%s8614_s15 + $0x48] sm:$0xff] }
 0x78b   : > { %v5719_v37 = vpack.c.bf16 %v4967_v61, %v4964_v34 }
 0x78d   : > { %5720 = vmatprep.subr.bf16.mxu1 %v5719_v37 }
 0x78e   : > { %5722 = vmatpush3.bf16.msra.mxu1 %v5719_v37 }
 0x791   : > { %5093 = vmatmul.mubr.msk.f32.vlgmr.msra.gmra.mrb[0].mxu1 %vm1803_vm3, %v3841_v21  ;;  %v4203_v21 = vld [vmem:[%s8614_s15 + $0x50] sm:$0xff] }
 0x792   : > { %5095 = vmatprep.mubr.msk.f32.mxu1 %vm1803_vm3, %v3842_v26 }
 0x795   : > { %5096 = vmatmul.mubr.msk.f32.gmra.mrb[2].mxu1 %vm1803_vm3, %v3843_v5  ;;  %v4204_v5 = vld [vmem:[%s8614_s15 + $0x58] sm:$0xff] }
 0x796   : > { %5098 = vmatprep.mubr.msk.f32.mxu1 %vm1803_vm3, %v3844_v11 }
 0x799   : > { %5099 = vmatmul.mubr.msk.f32.gmra.mrb[4].mxu1 %vm1803_vm3, %v3845_v59 }
 0x79a   : > { %5101 = vmatprep.mubr.msk.f32.mxu1 %vm1803_vm3, %v3846_v42 }
 0x79d   : > { %5102 = vmatmul.mubr.msk.f32.gmra.mrb[6].mxu1 %vm1803_vm3, %v3847_v33  ;;  %v4205_v33 = vld [vmem:[%s8614_s15 + $0x60] sm:$0xff] }
 0x79e   : > { %5104 = vmatprep.mubr.msk.f32.mxu1 %vm1803_vm3, %v3848_v44 }
 0x7a1   : > { %5105 = vmatmul.mubr.msk.f32.gmra.mrb[8].mxu1 %vm1803_vm3, %v3849_v7  ;;  %v4206_v7 = vld [vmem:[%s8614_s15 + $0x68] sm:$0xff] }
 0x7a2   : > { %5107 = vmatprep.mubr.msk.f32.mxu1 %vm1803_vm3, %v3850_v48 }
 0x7a5   : > { %5108 = vmatmul.mubr.msk.f32.gmra.mrb[10].mxu1 %vm1803_vm3, %v3851_v50 }
 0x7a6   : > { %5110 = vmatprep.mubr.msk.f32.mxu1 %vm1803_vm3, %v3852_v27 }
 0x7a9   : > { %5111 = vmatmul.mubr.msk.f32.gmra.mrb[12].mxu1 %vm1803_vm3, %v3853_v54  ;;  %v4207_v54 = vld [vmem:[%s8614_s15 + $0x70] sm:$0xff] }
 0x7aa   : > { %5113 = vmatprep.mubr.msk.f32.mxu1 %vm1803_vm3, %v3854_v0 }
 0x7ad   : > { %5114 = vmatmul.mubr.msk.f32.gmra.mrb[14].mxu1 %vm1803_vm3, %v3855_v58  ;;  %v4208_v58 = vld [vmem:[%s8614_s15 + $0x78] sm:$0xff] }
 0x7ae   : > { %5116 = vmatprep.mubr.msk.f32.mxu1 %vm1803_vm3, %v3856_v45 }
 0x7b1   : > { %5117 = vmatmul.mubr.msk.f32.gmra.mrb[16].mxu1 %vm1803_vm3, %v3857_v38 }
 0x7b2   : > { %5119 = vmatprep.mubr.msk.f32.mxu1 %vm1803_vm3, %v3858_v22 }
 0x7b5   : > { %5120 = vmatmul.mubr.msk.f32.gmra.mrb[18].mxu1 %vm1803_vm3, %v3859_v6  ;;  %v4209_v6 = vld [vmem:[%s8614_s15 + $0x80] sm:$0xff] }
 0x7b6   : > { %5122 = vmatprep.mubr.msk.f32.mxu1 %vm1803_vm3, %v3860_v10 }
 0x7b9   : > { %5123 = vmatmul.mubr.msk.f32.gmra.mrb[20].mxu1 %vm1803_vm3, %v3861_v47  ;;  %v4210_v47 = vld [vmem:[%s8614_s15 + $0x88] sm:$0xff] }
 0x7ba   : > { %5125 = vmatprep.mubr.msk.f32.mxu1 %vm1803_vm3, %v3862_v51 }
 0x7bd   : > { %5126 = vmatmul.mubr.msk.f32.gmra.mrb[22].mxu1 %vm1803_vm3, %v3863_v55 }
 0x7be   : > { %5128 = vmatprep.mubr.msk.f32.mxu1 %vm1803_vm3, %v3864_v62 }
 0x7c1   : > { %5129 = vmatmul.mubr.msk.f32.gmra.mrb[24].mxu1 %vm1803_vm3, %v3865_v13  ;;  %v4211_v13 = vld [vmem:[%s8614_s15 + $0x90] sm:$0xff] }
 0x7c2   : > { %5131 = vmatprep.mubr.msk.f32.mxu1 %vm1803_vm3, %v3866_v39 }
 0x7c5   : > { %5132 = vmatmul.mubr.msk.f32.gmra.mrb[26].mxu1 %vm1803_vm3, %v3867_v14  ;;  %v4212_v14 = vld [vmem:[%s8614_s15 + $0x98] sm:$0xff] }
 0x7c6   : > { %5134 = vmatprep.mubr.msk.f32.mxu1 %vm1803_vm3, %v3868_v29 }
 0x7c9   : > { %5135 = vmatmul.mubr.msk.f32.gmra.mrb[28].mxu1 %vm1803_vm3, %v3869_v17 }
 0x7ca   : > { %5137 = vmatprep.mubr.msk.f32.mxu1 %vm1803_vm3, %v3870_v31 }
 0x7cd   : > { %5138 = vmatmul.mubr.msk.f32.gmra.mrb[30].mxu1 %vm1803_vm3, %v3871_v57  ;;  %v4213_v57 = vld [vmem:[%s8614_s15 + $0xa0] sm:$0xff]  ;;  %vm4797_vm3 = vcmask 10240  }
 0x864   : > { %v5094_v12 = vpop.f32.mrb[0].mxu1 }
 0x865   : > { %v4034_v40 = vpop.f32.mrb[1].mxu1  ;;  %v4226_v19 = vmul.f32 %v5094_v12, %v4194_v63  ;;  %v4215_v63 = vld [vmem:[%s8614_s15 + $0xb0] sm:$0xff] }
 0x866   : > { %v4225_v49 = vmul.f32 %v4193_v41, %v4034_v40 }
 0x868   : > { %v5097_v24 = vpop.f32.mrb[2].mxu1  ;;  %5148 = vmatprep.mubr.msk.f32.mxu0 %vm4261_vm2, %v4225_v49  ;;  %v4216_v49 = vld [vmem:[%s8614_s15 + $0xb8] sm:$0xff] }
 0x869   : > { %v4044_v4 = vpop.f32.mrb[3].mxu1  ;;  %5149 = vmatmul.mubr.msk.f32.vlgmr.msra.gmra.mrb[4].mxu0 %vm4261_vm2, %v4226_v19  ;;  %v4228_v28 = vmul.f32 %v5097_v24, %v4196_v1  ;;  %v4217_v1 = vld [vmem:[%s8614_s15 + $0xc0] sm:$0xff] }
 0x86a   : > { %v4227_v16 = vmul.f32 %v4195_v23, %v4044_v4 }
 0x86c   : > { %v5100_v60 = vpop.f32.mrb[4].mxu1  ;;  %5151 = vmatprep.mubr.msk.f32.mxu0 %vm4261_vm2, %v4227_v16  ;;  %v4218_v16 = vld [vmem:[%s8614_s15 + $0xc8] sm:$0xff] }
 0x86d   : > { %v4054_v56 = vpop.f32.mrb[5].mxu1  ;;  %5152 = vmatmul.mubr.msk.f32.gmra.mrb[6].mxu0 %vm4261_vm2, %v4228_v28  ;;  %v4230_v8 = vmul.f32 %v5100_v60, %v4198_v3  ;;  %v4219_v3 = vld [vmem:[%s8614_s15 + $0xd0] sm:$0xff] }
 0x86e   : > { %v4229_v35 = vmul.f32 %v4197_v18, %v4054_v56 }
 0x870   : > { %v5103_v32 = vpop.f32.mrb[6].mxu1  ;;  %5154 = vmatprep.mubr.msk.f32.mxu0 %vm4261_vm2, %v4229_v35  ;;  %v4220_v35 = vld [vmem:[%s8614_s15 + $0xd8] sm:$0xff] }
 0x871   : > { %v4064_v30 = vpop.f32.mrb[7].mxu1  ;;  %5155 = vmatmul.mubr.msk.f32.gmra.mrb[8].mxu0 %vm4261_vm2, %v4230_v8  ;;  %v4232_v2 = vmul.f32 %v5103_v32, %v4200_v9  ;;  %v4221_v9 = vld [vmem:[%s8614_s15 + $0xe0] sm:$0xff] }
 0x872   : > { %v4231_v36 = vmul.f32 %v4199_v46, %v4064_v30 }
 0x874   : > { %v5106_v34 = vpop.f32.mrb[8].mxu1  ;;  %5157 = vmatprep.mubr.msk.f32.mxu0 %vm4261_vm2, %v4231_v36  ;;  %v4222_v36 = vld [vmem:[%s8614_s15 + $0xe8] sm:$0xff] }
 0x875   : > { %v4074_v52 = vpop.f32.mrb[9].mxu1  ;;  %5158 = vmatmul.mubr.msk.f32.gmra.mrb[10].mxu0 %vm4261_vm2, %v4232_v2  ;;  %v4234_v37 = vmul.f32 %v5106_v34, %v4202_v43  ;;  %v4223_v43 = vld [vmem:[%s8614_s15 + $0xf0] sm:$0xff] }
 0x876   : > { %v4233_v61 = vmul.f32 %v4201_v15, %v4074_v52 }
 0x878   : > { %v5109_v26 = vpop.f32.mrb[10].mxu1  ;;  %5160 = vmatprep.mubr.msk.f32.mxu0 %vm4261_vm2, %v4233_v61  ;;  %v4224_v61 = vld [vmem:[%s8614_s15 + $0xf8] sm:$0xff] }
 0x879   : > { %v4084_v11 = vpop.f32.mrb[11].mxu1  ;;  %5161 = vmatmul.mubr.msk.f32.gmra.mrb[12].mxu0 %vm4261_vm2, %v4234_v37  ;;  %v4236_v42 = vmul.f32 %v5109_v26, %v4204_v5  ;;  %v4584_v5 = vld [vmem:[%s8616_s17 + $0x8] sm:$0xff] }
 0x87a   : > { %v4235_v59 = vmul.f32 %v4203_v21, %v4084_v11  ;;  %4679 = vmatprep.mubr.f32.mxu1 %v4584_v5  ;;  %v4591_v11 = vld [vmem:[%s8617_s18] sm:$0xff] }
 0x87c   : > { %v5112_v44 = vpop.f32.mrb[12].mxu1  ;;  %5163 = vmatprep.mubr.msk.f32.mxu0 %vm4261_vm2, %v4235_v59  ;;  %v4593_v59 = vld [vmem:[%s8617_s18 + $0x10] sm:$0xff] }
 0x87d   : > { %v4094_v48 = vpop.f32.mrb[13].mxu1  ;;  %5164 = vmatmul.mubr.msk.f32.gmra.mrb[14].mxu0 %vm4261_vm2, %v4236_v42  ;;  %v4238_v27 = vmul.f32 %v5112_v44, %v4206_v7  ;;  %v5993_v42 = vmov 0   ;;  %v4594_v44 = vld [vmem:[%s8617_s18 + $0x18] sm:$0xff]  ;;  %v4702_v7 = vld [vmem:[%s8619_s20] sm:$0xff] }
 0x87e   : > { %v4237_v50 = vmul.f32 %v4205_v33, %v4094_v48  ;;  %5966 = vset.pattern.permute.xlu0 %v5993_v42  ;;  %5967 = vset.pattern.permute.xlu1 %v5993_v42  ;;  %v4592_v33 = vld [vmem:[%s8617_s18 + $0x8] sm:$0xff] }
 0x87f   : > { %4597 = vperm.xlu0 %5966, %v4591_v11   ;;  %4607 = vperm.xlu1 %5967, %v4593_v59   ;;  %v4703_v48 = vld [vmem:[%s8619_s20 + $0x8] sm:$0x7] }
 0x880   : > { %v5115_v0 = vpop.f32.mrb[14].mxu1  ;;  %5166 = vmatprep.mubr.msk.f32.mxu0 %vm4261_vm2, %v4237_v50 }
 0x881   : > { %v4104_v45 = vpop.f32.mrb[15].mxu1  ;;  %5167 = vmatmul.mubr.msk.f32.gmra.mrb[16].mxu0 %vm4261_vm2, %v4238_v27  ;;  %v4240_v22 = vmul.f32 %v5115_v0, %v4208_v58 }
 0x882   : > { %v4239_v38 = vmul.f32 %v4207_v54, %v4104_v45 }
 0x883   : > { %4602 = vperm.xlu0 %5966, %v4592_v33   ;;  %4612 = vperm.xlu1 %5967, %v4594_v44  }
 0x884   : > { %v5118_v10 = vpop.f32.mrb[16].mxu1  ;;  %5169 = vmatprep.mubr.msk.f32.mxu0 %vm4261_vm2, %v4239_v38 }
 0x885   : > { %v4114_v51 = vpop.f32.mrb[17].mxu1  ;;  %5170 = vmatmul.mubr.msk.f32.gmra.mrb[18].mxu0 %vm4261_vm2, %v4240_v22  ;;  %v4242_v62 = vmul.f32 %v5118_v10, %v4210_v47 }
 0x886   : > { %v4241_v55 = vmul.f32 %v4209_v6, %v4114_v51 }
 0x887   : > { %4706 = vperm.xlu0 %5966, %v4702_v7   ;;  %4711 = vperm.xlu1 %5967, %v4703_v48  }
 0x888   : > { %v5121_v39 = vpop.f32.mrb[18].mxu1  ;;  %5172 = vmatprep.mubr.msk.f32.mxu0 %vm4261_vm2, %v4241_v55 }
 0x889   : > { %v4124_v29 = vpop.f32.mrb[19].mxu1  ;;  %5173 = vmatmul.mubr.msk.f32.gmra.mrb[20].mxu0 %vm4261_vm2, %v4242_v62  ;;  %v4244_v31 = vmul.f32 %v5121_v39, %v4212_v14 }
 0x88a   : > { %v4243_v17 = vmul.f32 %v4211_v13, %v4124_v29 }
 0x88c   : > { %v5124_v20 = vpop.f32.mrb[20].mxu1  ;;  %5175 = vmatprep.mubr.msk.f32.mxu0 %vm4261_vm2, %v4243_v17 }
 0x88d   : > { %v4134_v25 = vpop.f32.mrb[21].mxu1  ;;  %5176 = vmatmul.mubr.msk.f32.gmra.mrb[22].mxu0 %vm4261_vm2, %v4244_v31  ;;  %v4246_v12 = vmul.f32 %v5124_v20, %v4214_v53 }
 0x88e   : > { %v4245_v41 = vmul.f32 %v4213_v57, %v4134_v25 }
 0x890   : > { %v5127_v40 = vpop.f32.mrb[22].mxu1  ;;  %5178 = vmatprep.mubr.msk.f32.mxu0 %vm4261_vm2, %v4245_v41 }
 0x891   : > { %v4144_v19 = vpop.f32.mrb[23].mxu1  ;;  %5179 = vmatmul.mubr.msk.f32.gmra.mrb[24].mxu0 %vm4261_vm2, %v4246_v12  ;;  %v4248_v24 = vmul.f32 %v5127_v40, %v4216_v49 }
 0x892   : > { %v4247_v23 = vmul.f32 %v4215_v63, %v4144_v19 }
 0x894   : > { %v5130_v4 = vpop.f32.mrb[24].mxu1  ;;  %5181 = vmatprep.mubr.msk.f32.mxu0 %vm4261_vm2, %v4247_v23 }
 0x895   : > { %v4154_v28 = vpop.f32.mrb[25].mxu1  ;;  %5182 = vmatmul.mubr.msk.f32.gmra.mrb[26].mxu0 %vm4261_vm2, %v4248_v24  ;;  %v4250_v60 = vmul.f32 %v5130_v4, %v4218_v16 }
 0x896   : > { %v4249_v18 = vmul.f32 %v4217_v1, %v4154_v28 }
 0x898   : > { %v5133_v56 = vpop.f32.mrb[26].mxu1  ;;  %5184 = vmatprep.mubr.msk.f32.mxu0 %vm4261_vm2, %v4249_v18 }
 0x899   : > { %v4164_v8 = vpop.f32.mrb[27].mxu1  ;;  %5185 = vmatmul.mubr.msk.f32.gmra.mrb[28].mxu0 %vm4261_vm2, %v4250_v60  ;;  %v4252_v32 = vmul.f32 %v5133_v56, %v4220_v35 }
 0x89a   : > { %v4251_v46 = vmul.f32 %v4219_v3, %v4164_v8 }
 0x89c   : > { %v5136_v30 = vpop.f32.mrb[28].mxu1  ;;  %5187 = vmatprep.mubr.msk.f32.mxu0 %vm4261_vm2, %v4251_v46 }
 0x89d   : > { %v4174_v2 = vpop.f32.mrb[29].mxu1  ;;  %5188 = vmatmul.mubr.msk.f32.gmra.mrb[30].mxu0 %vm4261_vm2, %v4252_v32  ;;  %v4254_v34 = vmul.f32 %v5136_v30, %v4222_v36 }
 0x89e   : > { %v4253_v15 = vmul.f32 %v4221_v9, %v4174_v2 }
 0x8a0   : > { %v5139_v52 = vpop.f32.mrb[30].mxu1  ;;  %5190 = vmatprep.mubr.msk.f32.mxu0 %vm4261_vm2, %v4253_v15  ;;  %v4583_v15 = vld [vmem:[%s8616_s17] sm:$0xff] }
 0x8a1   : > { %v4184_v37 = vpop.f32.mrb[31].mxu1  ;;  %5191 = vmatmul.mubr.msk.f32.gmra.mrb[32].mxu0 %vm4261_vm2, %v4254_v34  ;;  %v4256_v26 = vmul.f32 %v5139_v52, %v4224_v61  ;;  %v4586_v34 = vld [vmem:[%s8616_s17 + $0x18] sm:$0xff]  ;;  %v4588_v52 = vld [vmem:[%s8616_s17 + $0x28] sm:$0xff]  ;;  %v4587_v61 = vld [vmem:[%s8616_s17 + $0x20] sm:$0xff] }
 0x8a2   : > { %v4255_v21 = vmul.f32 %v4223_v43, %v4184_v37  ;;  %v4585_v43 = vld [vmem:[%s8616_s17 + $0x10] sm:$0xff]  ;;  %v4590_v37 = vld [vmem:[%s8616_s17 + $0x38] sm:$0xff] }
 0x8a4   : > { %5193 = vmatprep.mubr.msk.f32.mxu0 %vm4261_vm2, %v4255_v21  ;;  %v4589_v21 = vld [vmem:[%s8616_s17 + $0x30] sm:$0xff] }
 0x8a5   : > { %5194 = vmatmul.mubr.msk.f32.gmra.mrb[34].mxu0 %vm4261_vm2, %v4256_v26  ;;  %v4700_v26 = vld [vmem:[%s8618_s19] sm:$0xff] }
 0x8fe   : > { %v4598_v11 = vpop.permute.xlu0 %4597 }
 0x902   : > { %v4603_v48 = vpop.permute.xlu0 %4602 }
 0x93c   : > { %v5150_v50 = vpop.f32.mrb[4].mxu0 }
 0x93d   : > { %v4424_v27 = vpop.f32.mrb[5].mxu0 }
 0x93e   : > { %v5733_v54 = vpack.c.bf16 %v5150_v50, %v4424_v27 }
 0x940   : > { %v5153_v0 = vpop.f32.mrb[6].mxu0 }
 0x941   : > { %v4434_v58 = vpop.f32.mrb[7].mxu0 }
 0x942   : > { %v5737_v45 = vpack.c.bf16 %v5153_v0, %v4434_v58  ;;  %v4608_v0 = vpop.permute.xlu1 %4607 }
 0x944   : > { %v5156_v38 = vpop.f32.mrb[8].mxu0 }
 0x945   : > { %v4444_v22 = vpop.f32.mrb[9].mxu0 }
 0x946   : > { %v5741_v6 = vpack.c.bf16 %v5156_v38, %v4444_v22 }
 0x948   : > { %v5159_v10 = vpop.f32.mrb[10].mxu0 }
 0x949   : > { %v4454_v47 = vpop.f32.mrb[11].mxu0 }
 0x94a   : > { %v5745_v51 = vpack.c.bf16 %v5159_v10, %v4454_v47  ;;  %v4613_v47 = vpop.permute.xlu1 %4612 }
 0x94c   : > { %v5162_v55 = vpop.f32.mrb[12].mxu0 }
 0x94d   : > { %v4464_v62 = vpop.f32.mrb[13].mxu0 }
 0x94e   : > { %v5749_v13 = vpack.c.bf16 %v5162_v55, %v4464_v62 }
 0x950   : > { %v5165_v39 = vpop.f32.mrb[14].mxu0 }
 0x951   : > { %v4474_v14 = vpop.f32.mrb[15].mxu0 }
 0x952   : > { %v5753_v29 = vpack.c.bf16 %v5165_v39, %v4474_v14  ;;  %v4712_v39 = vpop.permute.xlu1 %4711 }
 0x954   : > { %v5168_v17 = vpop.f32.mrb[16].mxu0 }
 0x955   : > { %v4484_v31 = vpop.f32.mrb[17].mxu0 }
 0x956   : > { %v5757_v57 = vpack.c.bf16 %v5168_v17, %v4484_v31 }
 0x958   : > { %v5171_v20 = vpop.f32.mrb[18].mxu0 }
 0x959   : > { %v4494_v53 = vpop.f32.mrb[19].mxu0 }
 0x95a   : > { %v5761_v25 = vpack.c.bf16 %v5171_v20, %v4494_v53 }
 0x95c   : > { %v5174_v41 = vpop.f32.mrb[20].mxu0 }
 0x95d   : > { %v4504_v12 = vpop.f32.mrb[21].mxu0 }
 0x95e   : > { %v5731_v63 = vpack.c.bf16 %v5174_v41, %v4504_v12 }
 0x960   : > { %v5177_v40 = vpop.f32.mrb[22].mxu0  ;;  %5732 = vmatprep.subr.bf16.mxu1 %v5731_v63 }
 0x961   : > { %v4514_v49 = vpop.f32.mrb[23].mxu0  ;;  %5734 = vmatpush3.bf16.msra.mxu1 %v5733_v54 }
 0x962   : > { %v5735_v19 = vpack.c.bf16 %v5177_v40, %v4514_v49 }
 0x964   : > { %v5180_v23 = vpop.f32.mrb[24].mxu0  ;;  %5736 = vmatprep.subr.bf16.mxu1 %v5735_v19 }
 0x965   : > { %v4524_v24 = vpop.f32.mrb[25].mxu0  ;;  %5738 = vmatpush3.bf16.msra.mxu1 %v5737_v45 }
 0x966   : > { %v5739_v1 = vpack.c.bf16 %v5180_v23, %v4524_v24 }
 0x968   : > { %v5183_v4 = vpop.f32.mrb[26].mxu0  ;;  %5740 = vmatprep.subr.bf16.mxu1 %v5739_v1 }
 0x969   : > { %v4534_v16 = vpop.f32.mrb[27].mxu0  ;;  %5742 = vmatpush3.bf16.msra.mxu1 %v5741_v6 }
 0x96a   : > { %v5743_v28 = vpack.c.bf16 %v5183_v4, %v4534_v16 }
 0x96c   : > { %v5186_v18 = vpop.f32.mrb[28].mxu0  ;;  %5744 = vmatprep.subr.bf16.mxu1 %v5743_v28 }
 0x96d   : > { %v4544_v60 = vpop.f32.mrb[29].mxu0  ;;  %5746 = vmatpush3.bf16.msra.mxu1 %v5745_v51 }
 0x96e   : > { %v5747_v3 = vpack.c.bf16 %v5186_v18, %v4544_v60 }
 0x970   : > { %v5189_v56 = vpop.f32.mrb[30].mxu0  ;;  %5748 = vmatprep.subr.bf16.mxu1 %v5747_v3 }
 0x971   : > { %v4554_v35 = vpop.f32.mrb[31].mxu0  ;;  %5750 = vmatpush3.bf16.msra.mxu1 %v5749_v13  ;;  %v4701_v13 = vld [vmem:[%s8618_s19 + $0x8] sm:$0x7] }
 0x972   : > { %v5751_v8 = vpack.c.bf16 %v5189_v56, %v4554_v35 }
 0x974   : > { %v5192_v46 = vpop.f32.mrb[32].mxu0  ;;  %5752 = vmatprep.subr.bf16.mxu1 %v5751_v8 }
 0x975   : > { %v4564_v32 = vpop.f32.mrb[33].mxu0  ;;  %5754 = vmatpush3.bf16.msra.mxu1 %v5753_v29  ;;  %v4707_v29 = vpop.permute.xlu0 %4706 }
 0x976   : > { %v5755_v9 = vpack.c.bf16 %v5192_v46, %v4564_v32 }
 0x978   : > { %v5195_v30 = vpop.f32.mrb[34].mxu0  ;;  %5756 = vmatprep.subr.bf16.mxu1 %v5755_v9 }
 0x979   : > { %v4574_v36 = vpop.f32.mrb[35].mxu0  ;;  %5758 = vmatpush3.bf16.msra.mxu1 %v5757_v57 }
 0x97a   : > { %v5759_v2 = vpack.c.bf16 %v5195_v30, %v4574_v36 }
 0x97c   : > { %5760 = vmatprep.subr.bf16.mxu1 %v5759_v2 }
 0x97d   : > { %5762 = vmatpush3.bf16.msra.mxu1 %v5761_v25 }
 0x980   : > { %4680 = vmatmul.mubr.f32.vlgmr.msra.gmra.mrb[32].mxu1 %v4583_v15 }
 0x981   : > { %4684 = vmatprep.mubr.f32.mxu1 %v4586_v34 }
 0x984   : > { %4685 = vmatmul.mubr.f32.gmra.mrb[34].mxu1 %v4585_v43 }
 0x985   : > { %4689 = vmatprep.mubr.f32.mxu1 %v4588_v52 }
 0x988   : > { %4690 = vmatmul.mubr.f32.gmra.mrb[36].mxu1 %v4587_v61 }
 0x989   : > { %4694 = vmatprep.mubr.f32.mxu1 %v4590_v37 }
 0x98c   : > { %4695 = vmatmul.mubr.f32.gmra.mrb[38].mxu1 %v4589_v21 }
 0x98d   : > { %5204 = vmatprep.mubr.msk.f32.mxu1 %vm4261_vm2, %v4700_v26 }
 0xa53   : > { %v5070_v5 = vpop.f32.mrb[32].mxu1 }
 0xa54   : > { %v5071_v59 = vpop.f32.mrb[33].mxu1 }
 0xa55   : > { %v5072_v42 = vadd.f32 %v5071_v59, %v5070_v5 }
 0xa57   : > { %v5073_v33 = vpop.f32.mrb[34].mxu1  ;;  %v4682_v50 = vadd.f32 %v5072_v42, %v4598_v11 }
 0xa58   : > { %v5074_v44 = vpop.f32.mrb[35].mxu1 }
 0xa59   : > { %v5075_v7 = vadd.f32 %v5074_v44, %v5073_v33 }
 0xa5b   : > { %v5076_v27 = vpop.f32.mrb[36].mxu1  ;;  %v4687_v54 = vadd.f32 %v5075_v7, %v4603_v48 }
 0xa5c   : > { %v5077_v58 = vpop.f32.mrb[37].mxu1 }
 0xa5d   : > { %v5763_v45 = vpack.c.bf16 %v4687_v54, %v4682_v50  ;;  %v5078_v38 = vadd.f32 %v5077_v58, %v5076_v27 }
 0xa5f   : > { %v5079_v22 = vpop.f32.mrb[38].mxu1  ;;  %5764 = vmatprep.subr.bf16.mxu1 %v5763_v45  ;;  %v4692_v51 = vadd.f32 %v5078_v38, %v4608_v0 }
 0xa60   : > { %v5080_v6 = vpop.f32.mrb[39].mxu1  ;;  %5766 = vmatpush3.bf16.msra.mxu1 %v5763_v45 }
 0xa61   : > { %v5081_v10 = vadd.f32 %v5080_v6, %v5079_v22 }
 0xa63   : > { %v4697_v55 = vadd.f32 %v5081_v10, %v4613_v47 }
 0xa65   : > { %v5767_v62 = vpack.c.bf16 %v4697_v55, %v4692_v51 }
 0xa67   : > { %5768 = vmatprep.subr.bf16.mxu1 %v5767_v62 }
 0xa68   : > { %5770 = vmatpush3.bf16.msra.mxu1 %v5767_v62 }
 0xa6b   : > { %5205 = vmatmul.mubr.msk.f32.vlgmr.msra.gmra.mrb[40].mxu1 %vm4261_vm2, %v4701_v13 }
 0xb3e   : > { %v5206_v14 = vpop.f32.mrb[40].mxu1 }
 0xb3f   : > { %v4792_v17 = vadd.f32 %v5206_v14, %v4712_v39  ;;  %v4786_v31 = vpop.f32.mrb[41].mxu1 }
 0xb40   : > { %v4787_v57 = vadd.f32 %v4786_v31, %v4707_v29 }
 0xb41   : > { %4798 = vst.msk [vmem:[%s8620_s21 + $0x8] sm:$0x7] %vm4797_vm3, %v4792_v17 }
 0xb42   : > { %4796 = vst.msk [vmem:[%s8620_s21] sm:$0xff] %vm4795_vm4, %v4787_v57 }
 0xb43 PF: > { %s31_s2 = sadd.s32 1, %s5974_s2  }
 0xb44   : > { %p28_p6 = scmp.ge.s32.totalorder %s31_s2, 10  }
 0xb46   :  { %30 = sbr.rel (!%p28_p6) target bundleno = 7 (0x7), region = 138 }

</bundles_post_ra>
